<compile_context>
chip_gen: v7x
topology: tpu7x:2x2x1
jax: 0.10.0
libtpu: 0.0.40
codegen_flags: <defaults>
</compile_context>

<pallas_src>
import math

import jax
import jax.numpy as jnp
from jax.experimental import pallas as pl
from jax.experimental.pallas import tpu as pltpu

# ---------------- configuration (small synthetic shapes) ----------------
BATCH = 200                 # deliberately NOT a tile multiple (exercises batch padding)
INPUT_DIM = 1024            # K-tiled over the grid (2 steps of 512 here)
HIDDEN_DIM = 32
LATENT_DIM = 16
LATENT_PAD = 128            # latent padded to a full 128-lane tile (lane-dense output,
                            # tile-aligned mu/logvar split); sliced back in the wrapper
LN_EPS = 1e-1               # RecVAE Encoder uses LayerNorm(eps=1e-1)
NORM_EPS = 1e-12            # F.normalize clamp
MIXTURE_WEIGHTS = (3.0 / 20.0, 3.0 / 4.0, 1.0 / 10.0)
LOG2PI = math.log(2.0 * math.pi)
# Folded per-component constants: log(w_k) - 0.5*log(2*pi)
MIX_CONST = tuple(math.log(w) - 0.5 * LOG2PI for w in MIXTURE_WEIGHTS)


# ---------------- Pallas kernel ----------------
def composite_prior_kernel(x_ref, z_ref, w1_ref, wres_ref, vec_ref,
                           whead_ref, bhead_ref, prior_ref, out_ref,
                           acc_ref, ss_ref):
    k = pl.program_id(1)

    # ---- K-tiled first layer: accumulate x @ w1 and sum(x^2) over input_dim ----
    @pl.when(k == 0)
    def _():
        acc_ref[...] = jnp.zeros_like(acc_ref)
        ss_ref[...] = jnp.zeros_like(ss_ref)

    x = x_ref[...]
    acc_ref[...] += jnp.dot(x.astype(jnp.bfloat16), w1_ref[...],
                            preferred_element_type=jnp.float32)
    ss_ref[...] += jnp.sum(x * x, axis=-1, keepdims=True)

    # ---- rest of the network + mixture only on the last K step ----
    @pl.when(k == pl.num_programs(1) - 1)
    def _():
        def swish(a):
            return a * jax.nn.sigmoid(a)

        def layer_norm(a, g, b):
            mean = jnp.mean(a, axis=-1, keepdims=True)
            var = jnp.mean((a - mean) ** 2, axis=-1, keepdims=True)
            return (a - mean) * jax.lax.rsqrt(var + LN_EPS) * g + b

        # Packed [15, H] slab: rows 0-4 linear biases, 5-9 LN gammas, 10-14 LN betas.
        def bias(i):
            return vec_ref[i:i + 1, :]

        def gamma(i):
            return vec_ref[5 + i:6 + i, :]

        def beta(i):
            return vec_ref[10 + i:11 + i, :]

        # F.normalize is a per-row scalar, so it commutes with the matmul:
        # (x @ w1) * rsqrt(max(||x||^2, eps^2)) == (x / max(||x||, eps)) @ w1.
        inv_norm = jax.lax.rsqrt(jnp.maximum(ss_ref[...], NORM_EPS * NORM_EPS))
        h = layer_norm(swish(acc_ref[...] * inv_norm + bias(0)), gamma(0), beta(0))
        s = h                                  # running dense-residual sum h1+...+hk
        for j in range(4):                     # layers 2..5, weights stacked in wres
            pre = jnp.dot(h.astype(jnp.bfloat16), wres_ref[j],
                          preferred_element_type=jnp.float32) + bias(j + 1) + s
            h = layer_norm(swish(pre), gamma(j + 1), beta(j + 1))
            s = s + h

        # Fused fc_mu | fc_logvar head; each half is padded to 128 lanes so the
        # split lands exactly on a (8,128) tile boundary (no relayout/masked select).
        head = jnp.dot(h.astype(jnp.bfloat16), whead_ref[...],
                       preferred_element_type=jnp.float32) + bhead_ref[...]
        post_mu = head[:, :LATENT_PAD]
        post_logvar = head[:, LATENT_PAD:]

        z = z_ref[...]
        mu_p = prior_ref[0:1, :]
        lv_p = prior_ref[1:2, :]
        lv_u = prior_ref[2:3, :]

        d_p = (z - mu_p) ** 2                  # shared by standard & uniform terms
        g_stnd = -0.5 * (lv_p + d_p * jnp.exp(-lv_p)) + MIX_CONST[0]
        g_post = (-0.5 * (post_logvar + (z - post_mu) ** 2 * jnp.exp(-post_logvar))
                  + MIX_CONST[1])
        g_unif = -0.5 * (lv_u + d_p * jnp.exp(-lv_u)) + MIX_CONST[2]

        # logsumexp over the 3-component mixture (g_stnd/g_unif always finite here)
        m = jnp.maximum(jnp.maximum(g_stnd, g_post), g_unif)
        out_ref[...] = m + jnp.log(
            jnp.exp(g_stnd - m) + jnp.exp(g_post - m) + jnp.exp(g_unif - m))


# ---------------- tiling helpers ----------------
def _choose_batch_tile(B):
    # Largest tile <= 512 that still yields >= 2 grid steps after padding, so both
    # v7x TensorCores get work and per-step overhead is amortized.
    for tb in (512, 256, 128, 64, 32, 16, 8):
        if B > tb:
            return tb
    return 8


def _choose_k_tile(in_dim):
    for tk in (512, 256, 128):
        if in_dim % tk == 0:
            return tk
    return in_dim          # tiny / ragged input_dim: one full-width K step


# ---------------- wrapper ----------------
def composite_prior(x, z, params):
    w1, wres, vec, whead, bhead, priors = params
    B, in_dim = x.shape
    L = z.shape[1]
    H = w1.shape[1]
    Lp = priors.shape[1]

    tb = _choose_batch_tile(B)
    n_b = pl.cdiv(B, tb)
    Bp = n_b * tb
    tk = _choose_k_tile(in_dim)
    n_k = in_dim // tk

    # Pad batch to the tile (zero rows are harmless: ss=0 -> normalized x stays 0,
    # and the rows are sliced off) and pad z's lane dim to LATENT_PAD.
    xp = jnp.pad(x, ((0, Bp - B), (0, 0))) if Bp != B else x
    zp = jnp.pad(z, ((0, Bp - B), (0, Lp - L)))

    grid = (n_b, n_k)      # reduction (input_dim) axis last

    in_specs = [
        pl.BlockSpec((tb, tk), lambda i, k: (i, k)),        # x batch/K tile (f32)
        pl.BlockSpec((tb, Lp), lambda i, k: (i, 0)),        # z batch tile (lane-padded)
        pl.BlockSpec((tk, H), lambda i, k: (k, 0)),         # w1 K tile (bf16)
        pl.BlockSpec(wres.shape, lambda i, k: (0, 0, 0)),   # resident bf16 weights
        pl.BlockSpec(vec.shape, lambda i, k: (0, 0)),       # packed biases/LN (f32)
        pl.BlockSpec(whead.shape, lambda i, k: (0, 0)),     # fused head (bf16)
        pl.BlockSpec(bhead.shape, lambda i, k: (0, 0)),
        pl.BlockSpec(priors.shape, lambda i, k: (0, 0)),
    ]

    flops = 2 * Bp * (in_dim * H + 4 * H * H + H * 2 * Lp) + Bp * (40 * H + 14 * Lp)
    transcendentals = Bp * (5 * H + 4 * Lp)
    bytes_accessed = (xp.size * 4 + zp.size * 4 + Bp * Lp * 4
                      + (w1.size + wres.size + whead.size) * 2
                      + (vec.size + bhead.size + priors.size) * 4)

    out = pl.pallas_call(
        composite_prior_kernel,
        out_shape=jax.ShapeDtypeStruct((Bp, Lp), jnp.float32),
        grid=grid,
        in_specs=in_specs,
        out_specs=pl.BlockSpec((tb, Lp), lambda i, k: (i, 0)),
        scratch_shapes=[pltpu.VMEM((tb, H), jnp.float32),   # x @ w1 accumulator
                        pltpu.VMEM((tb, 1), jnp.float32)],  # sum(x^2) accumulator
        compiler_params=pltpu.CompilerParams(
            dimension_semantics=("parallel", "arbitrary"),
            vmem_limit_bytes=32 * 1024 * 1024),
        cost_estimate=pl.CostEstimate(flops=int(flops),
                                      transcendentals=int(transcendentals),
                                      bytes_accessed=int(bytes_accessed)),
    )(xp, zp, w1, wres, vec, whead, bhead, priors)

    return out[:B, :L]


# ---------------- deterministic parameter construction (packed / padded layout) ----
def make_params(key):
    keys = jax.random.split(key, 11)

    def dense_w(kk, fan_in, fan_out):
        scale = 1.0 / math.sqrt(fan_in)
        return jax.random.uniform(kk, (fan_in, fan_out), jnp.float32, -scale, scale)

    # Matmul weights stored in bf16 (halves HBM streaming / resident VMEM);
    # biases, LayerNorm params and priors stay f32 (all elementwise math is f32).
    w1 = dense_w(keys[0], INPUT_DIM, HIDDEN_DIM).astype(jnp.bfloat16)
    wres = jnp.stack(
        [dense_w(keys[1 + i], HIDDEN_DIM, HIDDEN_DIM) for i in range(4)],
        axis=0).astype(jnp.bfloat16)                                   # [4, H, H]

    bias_rows = jax.random.uniform(keys[5], (5, HIDDEN_DIM), jnp.float32, -0.1, 0.1)
    gamma_rows = 1.0 + jax.random.uniform(keys[6], (5, HIDDEN_DIM), jnp.float32, -0.1, 0.1)
    beta_rows = jax.random.uniform(keys[7], (5, HIDDEN_DIM), jnp.float32, -0.1, 0.1)
    vec = jnp.concatenate([bias_rows, gamma_rows, beta_rows], axis=0)  # [15, H]

    lane_pad = ((0, 0), (0, LATENT_PAD - LATENT_DIM))
    wmu = dense_w(keys[8], HIDDEN_DIM, LATENT_DIM)
    wlv = dense_w(keys[9], HIDDEN_DIM, LATENT_DIM)
    whead = jnp.concatenate([jnp.pad(wmu, lane_pad), jnp.pad(wlv, lane_pad)],
                            axis=1).astype(jnp.bfloat16)               # [H, 2*Lp]
    braw = jax.random.uniform(keys[10], (1, 2 * LATENT_DIM), jnp.float32, -0.1, 0.1)
    bhead = jnp.concatenate(
        [jnp.pad(braw[:, :LATENT_DIM], lane_pad),
         jnp.pad(braw[:, LATENT_DIM:], lane_pad)], axis=1)             # [1, 2*Lp]

    priors = jnp.stack([
        jnp.zeros((LATENT_PAD,), jnp.float32),                         # mu_prior
        jnp.zeros((LATENT_PAD,), jnp.float32),                         # logvar_prior
        jnp.pad(jnp.full((LATENT_DIM,), 10.0, jnp.float32),
                (0, LATENT_PAD - LATENT_DIM)),                         # logvar_uniform
    ], axis=0)                                                         # [3, Lp]

    return (w1, wres, vec, whead, bhead, priors)


# ---------------- pure-JAX reference (PyTorch ordering; same bf16-weight / ----------
# ---------------- bf16-MXU-input, f32-accumulate numeric contract) -----------------
def composite_prior_ref(x, z, params):
    w1, wres, vec, whead, bhead, priors = params
    b = [vec[i:i + 1, :] for i in range(5)]
    g = [vec[5 + i:6 + i, :] for i in range(5)]
    be = [vec[10 + i:11 + i, :] for i in range(5)]
    mu_p = priors[0:1, :LATENT_DIM]
    lv_p = priors[1:2, :LATENT_DIM]
    lv_u = priors[2:3, :LATENT_DIM]

    def mm(a, w):
        return jnp.dot(a.astype(jnp.bfloat16), w.astype(jnp.bfloat16),
                       preferred_element_type=jnp.float32)

    def swish(a):
        return a * jax.nn.sigmoid(a)

    def ln(a, gg, bb):
        mean = jnp.mean(a, axis=-1, keepdims=True)
        var = jnp.mean((a - mean) ** 2, axis=-1, keepdims=True)
        return (a - mean) / jnp.sqrt(var + LN_EPS) * gg + bb

    norm = jnp.maximum(jnp.sqrt(jnp.sum(x * x, axis=-1, keepdims=True)), NORM_EPS)
    xn = x / norm

    h1 = ln(swish(mm(xn, w1) + b[0]), g[0], be[0])
    h2 = ln(swish(mm(h1, wres[0]) + b[1] + h1), g[1], be[1])
    h3 = ln(swish(mm(h2, wres[1]) + b[2] + h1 + h2), g[2], be[2])
    h4 = ln(swish(mm(h3, wres[2]) + b[3] + h1 + h2 + h3), g[3], be[3])
    h5 = ln(swish(mm(h4, wres[3]) + b[4] + h1 + h2 + h3 + h4), g[4], be[4])

    head = mm(h5, whead) + bhead
    post_mu = head[:, :LATENT_DIM]
    post_lv = head[:, LATENT_PAD:LATENT_PAD + LATENT_DIM]

    def lnp(zz, mu, lv):
        return -0.5 * (lv + LOG2PI + (zz - mu) ** 2 / jnp.exp(lv))

    gs = jnp.stack(
        [lnp(z, mu_p, lv_p) + math.log(MIXTURE_WEIGHTS[0]),
         lnp(z, post_mu, post_lv) + math.log(MIXTURE_WEIGHTS[1]),
         lnp(z, mu_p, lv_u) + math.log(MIXTURE_WEIGHTS[2])],
        axis=-1)
    return jax.scipy.special.logsumexp(gs, axis=-1)


if __name__ == "__main__":
    key = jax.random.PRNGKey(0)
    kx, kz, kp = jax.random.split(key, 3)

    # x is a (nonnegative) interaction-count-like input, z a latent sample.
    x = jax.random.uniform(kx, (BATCH, INPUT_DIM), jnp.float32, 0.0, 1.0)
    z = jax.random.normal(kz, (BATCH, LATENT_DIM), jnp.float32)
    params = make_params(kp)

    out = jax.block_until_ready(composite_prior(x, z, params))
    ref = composite_prior_ref(x, z, params)

    assert out.shape == (BATCH, LATENT_DIM)
    max_diff = jnp.max(jnp.abs(out - ref))
    assert jnp.allclose(out, ref, atol=5e-2, rtol=5e-2), f"max abs diff {max_diff}"
    print("KERNEL_OK")
</pallas_src>

<mosaic_0001>
module attributes {stable_mosaic.version = 11 : i64} {
  func.func @composite_prior_kernel(%arg0: i32, %arg1: i32, %arg2: memref<128x512xf32, #tpu.memory_space<vmem>>, %arg3: memref<128x128xf32, #tpu.memory_space<vmem>>, %arg4: memref<512x32xbf16, #tpu.memory_space<vmem>>, %arg5: memref<4x32x32xbf16, #tpu.memory_space<vmem>>, %arg6: memref<15x32xf32, #tpu.memory_space<vmem>>, %arg7: memref<32x256xbf16, #tpu.memory_space<vmem>>, %arg8: memref<1x256xf32, #tpu.memory_space<vmem>>, %arg9: memref<3x128xf32, #tpu.memory_space<vmem>>, %arg10: memref<128x128xf32, #tpu.memory_space<vmem>>, %arg11: memref<128x32xf32, #tpu.memory_space<vmem>>, %arg12: memref<128x1xf32, #tpu.memory_space<vmem>>) attributes {dimension_semantics = [#tpu.dimension_semantics<parallel>, #tpu.dimension_semantics<arbitrary>], iteration_bounds = array<i64: 2, 2>, scalar_prefetch = 0 : i64, scratch_operands = 2 : i64, tpu.core_type = #tpu.core_type<tc>, window_params = [{transform_indices = @transform_0, window_bounds = array<i64: 128, 512>}, {transform_indices = @transform_1, window_bounds = array<i64: 128, 128>}, {transform_indices = @transform_2, window_bounds = array<i64: 512, 32>}, {pipeline_mode = #tpu.pipeline_mode<synchronous>, transform_indices = @transform_3, window_bounds = array<i64: 4, 32, 32>}, {pipeline_mode = #tpu.pipeline_mode<synchronous>, transform_indices = @transform_4, window_bounds = array<i64: 15, 32>}, {pipeline_mode = #tpu.pipeline_mode<synchronous>, transform_indices = @transform_5, window_bounds = array<i64: 32, 256>}, {pipeline_mode = #tpu.pipeline_mode<synchronous>, transform_indices = @transform_6, window_bounds = array<i64: 1, 256>}, {pipeline_mode = #tpu.pipeline_mode<synchronous>, transform_indices = @transform_7, window_bounds = array<i64: 3, 128>}, {transform_indices = @transform_8, window_bounds = array<i64: 128, 128>}]} {
    %c0_i32 = arith.constant 0 : i32
    %0 = arith.cmpi eq, %arg1, %c0_i32 : i32
    %1 = arith.extui %0 : i1 to i32
    %c0_i32_0 = arith.constant 0 : i32
    %2 = arith.cmpi ne, %1, %c0_i32_0 : i32
    scf.if %2 {
      %cst_14 = arith.constant 0.000000e+00 : f32
      %19 = vector.broadcast %cst_14 : f32 to vector<128x32xf32>
      %c0_15 = arith.constant 0 : index
      %c0_16 = arith.constant 0 : index
      %20 = vector.load %arg11[%c0_15, %c0_16] : memref<128x32xf32, #tpu.memory_space<vmem>>, vector<128x32xf32>
      tpu.vector_store %arg11[%c0_15, %c0_16], %19 {strides = array<i32>} : memref<128x32xf32, #tpu.memory_space<vmem>>, vector<128x32xf32>,
      %cst_17 = arith.constant 0.000000e+00 : f32
      %21 = vector.broadcast %cst_17 : f32 to vector<128x1xf32>
      %c0_18 = arith.constant 0 : index
      %c0_19 = arith.constant 0 : index
      %22 = vector.load %arg12[%c0_18, %c0_19] : memref<128x1xf32, #tpu.memory_space<vmem>>, vector<128x1xf32>
      tpu.vector_store %arg12[%c0_18, %c0_19], %21 {strides = array<i32>} : memref<128x1xf32, #tpu.memory_space<vmem>>, vector<128x1xf32>,
    } else {
    }
    %c0 = arith.constant 0 : index
    %c0_1 = arith.constant 0 : index
    %3 = vector.load %arg2[%c0, %c0_1] : memref<128x512xf32, #tpu.memory_space<vmem>>, vector<128x512xf32>
    %c0_2 = arith.constant 0 : index
    %c0_3 = arith.constant 0 : index
    %4 = vector.load %arg11[%c0_2, %c0_3] : memref<128x32xf32, #tpu.memory_space<vmem>>, vector<128x32xf32>
    %5 = arith.truncf %3 : vector<128x512xf32> to vector<128x512xbf16>
    %c0_4 = arith.constant 0 : index
    %c0_5 = arith.constant 0 : index
    %6 = vector.load %arg4[%c0_4, %c0_5] : memref<512x32xbf16, #tpu.memory_space<vmem>>, vector<512x32xbf16>
    %cst = arith.constant dense<0.000000e+00> : vector<128x32xf32>
    %7 = tpu.matmul %5, %6, %cst {dimension_numbers = #tpu.dot_dimension_numbers<[1], [0], [0], [1], [0, 0, 1, 1], [], []>} : vector<128x512xbf16>, vector<512x32xbf16>, vector<128x32xf32> -> vector<128x32xf32>
    %8 = arith.addf %4, %7 : vector<128x32xf32>
    %c0_6 = arith.constant 0 : index
    %c0_7 = arith.constant 0 : index
    %9 = vector.load %arg11[%c0_6, %c0_7] : memref<128x32xf32, #tpu.memory_space<vmem>>, vector<128x32xf32>
    tpu.vector_store %arg11[%c0_6, %c0_7], %8 {strides = array<i32>} : memref<128x32xf32, #tpu.memory_space<vmem>>, vector<128x32xf32>,
    %c0_8 = arith.constant 0 : index
    %c0_9 = arith.constant 0 : index
    %10 = vector.load %arg12[%c0_8, %c0_9] : memref<128x1xf32, #tpu.memory_space<vmem>>, vector<128x1xf32>
    %11 = arith.mulf %3, %3 : vector<128x512xf32>
    %cst_10 = arith.constant dense<0.000000e+00> : vector<128xf32>
    %12 = vector.multi_reduction <add>, %11, %cst_10 [1] : vector<128x512xf32> to vector<128xf32>
    %13 = vector.shape_cast %12 : vector<128xf32> to vector<128x1xf32>
    %14 = arith.addf %10, %13 : vector<128x1xf32>
    %c0_11 = arith.constant 0 : index
    %c0_12 = arith.constant 0 : index
    %15 = vector.load %arg12[%c0_11, %c0_12] : memref<128x1xf32, #tpu.memory_space<vmem>>, vector<128x1xf32>
    tpu.vector_store %arg12[%c0_11, %c0_12], %14 {strides = array<i32>} : memref<128x1xf32, #tpu.memory_space<vmem>>, vector<128x1xf32>,
    %c1_i32 = arith.constant 1 : i32
    %16 = arith.cmpi eq, %arg1, %c1_i32 : i32
    %17 = arith.extui %16 : i1 to i32
    %c0_i32_13 = arith.constant 0 : i32
    %18 = arith.cmpi ne, %17, %c0_i32_13 : i32
    scf.if %18 {
      %c0_14 = arith.constant 0 : index
      %c0_15 = arith.constant 0 : index
      %19 = vector.load %arg12[%c0_14, %c0_15] : memref<128x1xf32, #tpu.memory_space<vmem>>, vector<128x1xf32>
      %cst_16 = arith.constant 1.000000e-24 : f32
      %20 = vector.broadcast %cst_16 : f32 to vector<128x1xf32>
      %21 = arith.maximumf %19, %20 : vector<128x1xf32>
      %22 = math.rsqrt %21 : vector<128x1xf32>
      %c0_17 = arith.constant 0 : index
      %c0_18 = arith.constant 0 : index
      %23 = vector.load %arg11[%c0_17, %c0_18] : memref<128x32xf32, #tpu.memory_space<vmem>>, vector<128x32xf32>
      %24 = vector.broadcast %22 : vector<128x1xf32> to vector<128x32xf32>
      %25 = arith.mulf %23, %24 : vector<128x32xf32>
      %c0_19 = arith.constant 0 : index
      %c0_20 = arith.constant 0 : index
      %26 = vector.load %arg6[%c0_19, %c0_20] : memref<15x32xf32, #tpu.memory_space<vmem>>, vector<1x32xf32>
      %27 = vector.broadcast %26 : vector<1x32xf32> to vector<128x32xf32>
      %28 = arith.addf %25, %27 : vector<128x32xf32>
      %29 = arith.negf %28 : vector<128x32xf32>
      %30 = math.exp %29 : vector<128x32xf32>
      %cst_21 = arith.constant 1.000000e+00 : f32
      %31 = vector.broadcast %cst_21 : f32 to vector<128x32xf32>
      %32 = arith.addf %31, %30 : vector<128x32xf32>
      %33 = arith.divf %31, %32 : vector<128x32xf32>
      %34 = arith.mulf %28, %33 : vector<128x32xf32>
      %c5 = arith.constant 5 : index
      %c0_22 = arith.constant 0 : index
      %35 = vector.load %arg6[%c5, %c0_22] : memref<15x32xf32, #tpu.memory_space<vmem>>, vector<1x32xf32>
      %c10 = arith.constant 10 : index
      %c0_23 = arith.constant 0 : index
      %36 = vector.load %arg6[%c10, %c0_23] : memref<15x32xf32, #tpu.memory_space<vmem>>, vector<1x32xf32>
      %cst_24 = arith.constant dense<0.000000e+00> : vector<128xf32>
      %37 = vector.multi_reduction <add>, %34, %cst_24 [1] : vector<128x32xf32> to vector<128xf32>
      %38 = vector.shape_cast %37 : vector<128xf32> to vector<128x1xf32>
      %cst_25 = arith.constant 3.200000e+01 : f32
      %39 = vector.broadcast %cst_25 : f32 to vector<128x1xf32>
      %40 = arith.divf %38, %39 : vector<128x1xf32>
      %41 = vector.broadcast %40 : vector<128x1xf32> to vector<128x32xf32>
      %42 = arith.subf %34, %41 : vector<128x32xf32>
      %43 = arith.mulf %42, %42 : vector<128x32xf32>
      %cst_26 = arith.constant dense<0.000000e+00> : vector<128xf32>
      %44 = vector.multi_reduction <add>, %43, %cst_26 [1] : vector<128x32xf32> to vector<128xf32>
      %45 = vector.shape_cast %44 : vector<128xf32> to vector<128x1xf32>
      %cst_27 = arith.constant 3.200000e+01 : f32
      %46 = vector.broadcast %cst_27 : f32 to vector<128x1xf32>
      %47 = arith.divf %45, %46 : vector<128x1xf32>
      %48 = vector.broadcast %40 : vector<128x1xf32> to vector<128x32xf32>
      %49 = arith.subf %34, %48 : vector<128x32xf32>
      %cst_28 = arith.constant 1.000000e-01 : f32
      %50 = vector.broadcast %cst_28 : f32 to vector<128x1xf32>
      %51 = arith.addf %47, %50 : vector<128x1xf32>
      %52 = math.rsqrt %51 : vector<128x1xf32>
      %53 = vector.broadcast %52 : vector<128x1xf32> to vector<128x32xf32>
      %54 = arith.mulf %49, %53 : vector<128x32xf32>
      %55 = vector.broadcast %35 : vector<1x32xf32> to vector<128x32xf32>
      %56 = arith.mulf %54, %55 : vector<128x32xf32>
      %57 = vector.broadcast %36 : vector<1x32xf32> to vector<128x32xf32>
      %58 = arith.addf %56, %57 : vector<128x32xf32>
      %59 = arith.truncf %58 : vector<128x32xf32> to vector<128x32xbf16>
      %c0_29 = arith.constant 0 : index
      %c0_30 = arith.constant 0 : index
      %c0_31 = arith.constant 0 : index
      %60 = vector.load %arg5[%c0_29, %c0_30, %c0_31] : memref<4x32x32xbf16, #tpu.memory_space<vmem>>, vector<1x32x32xbf16>
      %61 = vector.shape_cast %60 : vector<1x32x32xbf16> to vector<32x32xbf16>
      %cst_32 = arith.constant dense<0.000000e+00> : vector<128x32xf32>
      %62 = tpu.matmul %59, %61, %cst_32 {dimension_numbers = #tpu.dot_dimension_numbers<[1], [0], [0], [1], [0, 0, 1, 1], [], []>} : vector<128x32xbf16>, vector<32x32xbf16>, vector<128x32xf32> -> vector<128x32xf32>
      %c1 = arith.constant 1 : index
      %c0_33 = arith.constant 0 : index
      %63 = vector.load %arg6[%c1, %c0_33] : memref<15x32xf32, #tpu.memory_space<vmem>>, vector<1x32xf32>
      %64 = vector.broadcast %63 : vector<1x32xf32> to vector<128x32xf32>
      %65 = arith.addf %62, %64 : vector<128x32xf32>
      %66 = arith.addf %65, %58 : vector<128x32xf32>
      %67 = arith.negf %66 : vector<128x32xf32>
      %68 = math.exp %67 : vector<128x32xf32>
      %cst_34 = arith.constant 1.000000e+00 : f32
      %69 = vector.broadcast %cst_34 : f32 to vector<128x32xf32>
      %70 = arith.addf %69, %68 : vector<128x32xf32>
      %71 = arith.divf %69, %70 : vector<128x32xf32>
      %72 = arith.mulf %66, %71 : vector<128x32xf32>
      %c6 = arith.constant 6 : index
      %c0_35 = arith.constant 0 : index
      %73 = vector.load %arg6[%c6, %c0_35] : memref<15x32xf32, #tpu.memory_space<vmem>>, vector<1x32xf32>
      %c11 = arith.constant 11 : index
      %c0_36 = arith.constant 0 : index
      %74 = vector.load %arg6[%c11, %c0_36] : memref<15x32xf32, #tpu.memory_space<vmem>>, vector<1x32xf32>
      %cst_37 = arith.constant dense<0.000000e+00> : vector<128xf32>
      %75 = vector.multi_reduction <add>, %72, %cst_37 [1] : vector<128x32xf32> to vector<128xf32>
      %76 = vector.shape_cast %75 : vector<128xf32> to vector<128x1xf32>
      %cst_38 = arith.constant 3.200000e+01 : f32
      %77 = vector.broadcast %cst_38 : f32 to vector<128x1xf32>
      %78 = arith.divf %76, %77 : vector<128x1xf32>
      %79 = vector.broadcast %78 : vector<128x1xf32> to vector<128x32xf32>
      %80 = arith.subf %72, %79 : vector<128x32xf32>
      %81 = arith.mulf %80, %80 : vector<128x32xf32>
      %cst_39 = arith.constant dense<0.000000e+00> : vector<128xf32>
      %82 = vector.multi_reduction <add>, %81, %cst_39 [1] : vector<128x32xf32> to vector<128xf32>
      %83 = vector.shape_cast %82 : vector<128xf32> to vector<128x1xf32>
      %cst_40 = arith.constant 3.200000e+01 : f32
      %84 = vector.broadcast %cst_40 : f32 to vector<128x1xf32>
      %85 = arith.divf %83, %84 : vector<128x1xf32>
      %86 = vector.broadcast %78 : vector<128x1xf32> to vector<128x32xf32>
      %87 = arith.subf %72, %86 : vector<128x32xf32>
      %cst_41 = arith.constant 1.000000e-01 : f32
      %88 = vector.broadcast %cst_41 : f32 to vector<128x1xf32>
      %89 = arith.addf %85, %88 : vector<128x1xf32>
      %90 = math.rsqrt %89 : vector<128x1xf32>
      %91 = vector.broadcast %90 : vector<128x1xf32> to vector<128x32xf32>
      %92 = arith.mulf %87, %91 : vector<128x32xf32>
      %93 = vector.broadcast %73 : vector<1x32xf32> to vector<128x32xf32>
      %94 = arith.mulf %92, %93 : vector<128x32xf32>
      %95 = vector.broadcast %74 : vector<1x32xf32> to vector<128x32xf32>
      %96 = arith.addf %94, %95 : vector<128x32xf32>
      %97 = arith.addf %58, %96 : vector<128x32xf32>
      %98 = arith.truncf %96 : vector<128x32xf32> to vector<128x32xbf16>
      %c1_42 = arith.constant 1 : index
      %c0_43 = arith.constant 0 : index
      %c0_44 = arith.constant 0 : index
      %99 = vector.load %arg5[%c1_42, %c0_43, %c0_44] : memref<4x32x32xbf16, #tpu.memory_space<vmem>>, vector<1x32x32xbf16>
      %100 = vector.shape_cast %99 : vector<1x32x32xbf16> to vector<32x32xbf16>
      %cst_45 = arith.constant dense<0.000000e+00> : vector<128x32xf32>
      %101 = tpu.matmul %98, %100, %cst_45 {dimension_numbers = #tpu.dot_dimension_numbers<[1], [0], [0], [1], [0, 0, 1, 1], [], []>} : vector<128x32xbf16>, vector<32x32xbf16>, vector<128x32xf32> -> vector<128x32xf32>
      %c2 = arith.constant 2 : index
      %c0_46 = arith.constant 0 : index
      %102 = vector.load %arg6[%c2, %c0_46] : memref<15x32xf32, #tpu.memory_space<vmem>>, vector<1x32xf32>
      %103 = vector.broadcast %102 : vector<1x32xf32> to vector<128x32xf32>
      %104 = arith.addf %101, %103 : vector<128x32xf32>
      %105 = arith.addf %104, %97 : vector<128x32xf32>
      %106 = arith.negf %105 : vector<128x32xf32>
      %107 = math.exp %106 : vector<128x32xf32>
      %cst_47 = arith.constant 1.000000e+00 : f32
      %108 = vector.broadcast %cst_47 : f32 to vector<128x32xf32>
      %109 = arith.addf %108, %107 : vector<128x32xf32>
      %110 = arith.divf %108, %109 : vector<128x32xf32>
      %111 = arith.mulf %105, %110 : vector<128x32xf32>
      %c7 = arith.constant 7 : index
      %c0_48 = arith.constant 0 : index
      %112 = vector.load %arg6[%c7, %c0_48] : memref<15x32xf32, #tpu.memory_space<vmem>>, vector<1x32xf32>
      %c12 = arith.constant 12 : index
      %c0_49 = arith.constant 0 : index
      %113 = vector.load %arg6[%c12, %c0_49] : memref<15x32xf32, #tpu.memory_space<vmem>>, vector<1x32xf32>
      %cst_50 = arith.constant dense<0.000000e+00> : vector<128xf32>
      %114 = vector.multi_reduction <add>, %111, %cst_50 [1] : vector<128x32xf32> to vector<128xf32>
      %115 = vector.shape_cast %114 : vector<128xf32> to vector<128x1xf32>
      %cst_51 = arith.constant 3.200000e+01 : f32
      %116 = vector.broadcast %cst_51 : f32 to vector<128x1xf32>
      %117 = arith.divf %115, %116 : vector<128x1xf32>
      %118 = vector.broadcast %117 : vector<128x1xf32> to vector<128x32xf32>
      %119 = arith.subf %111, %118 : vector<128x32xf32>
      %120 = arith.mulf %119, %119 : vector<128x32xf32>
      %cst_52 = arith.constant dense<0.000000e+00> : vector<128xf32>
      %121 = vector.multi_reduction <add>, %120, %cst_52 [1] : vector<128x32xf32> to vector<128xf32>
      %122 = vector.shape_cast %121 : vector<128xf32> to vector<128x1xf32>
      %cst_53 = arith.constant 3.200000e+01 : f32
      %123 = vector.broadcast %cst_53 : f32 to vector<128x1xf32>
      %124 = arith.divf %122, %123 : vector<128x1xf32>
      %125 = vector.broadcast %117 : vector<128x1xf32> to vector<128x32xf32>
      %126 = arith.subf %111, %125 : vector<128x32xf32>
      %cst_54 = arith.constant 1.000000e-01 : f32
      %127 = vector.broadcast %cst_54 : f32 to vector<128x1xf32>
      %128 = arith.addf %124, %127 : vector<128x1xf32>
      %129 = math.rsqrt %128 : vector<128x1xf32>
      %130 = vector.broadcast %129 : vector<128x1xf32> to vector<128x32xf32>
      %131 = arith.mulf %126, %130 : vector<128x32xf32>
      %132 = vector.broadcast %112 : vector<1x32xf32> to vector<128x32xf32>
      %133 = arith.mulf %131, %132 : vector<128x32xf32>
      %134 = vector.broadcast %113 : vector<1x32xf32> to vector<128x32xf32>
      %135 = arith.addf %133, %134 : vector<128x32xf32>
      %136 = arith.addf %97, %135 : vector<128x32xf32>
      %137 = arith.truncf %135 : vector<128x32xf32> to vector<128x32xbf16>
      %c2_55 = arith.constant 2 : index
      %c0_56 = arith.constant 0 : index
      %c0_57 = arith.constant 0 : index
      %138 = vector.load %arg5[%c2_55, %c0_56, %c0_57] : memref<4x32x32xbf16, #tpu.memory_space<vmem>>, vector<1x32x32xbf16>
      %139 = vector.shape_cast %138 : vector<1x32x32xbf16> to vector<32x32xbf16>
      %cst_58 = arith.constant dense<0.000000e+00> : vector<128x32xf32>
      %140 = tpu.matmul %137, %139, %cst_58 {dimension_numbers = #tpu.dot_dimension_numbers<[1], [0], [0], [1], [0, 0, 1, 1], [], []>} : vector<128x32xbf16>, vector<32x32xbf16>, vector<128x32xf32> -> vector<128x32xf32>
      %c3 = arith.constant 3 : index
      %c0_59 = arith.constant 0 : index
      %141 = vector.load %arg6[%c3, %c0_59] : memref<15x32xf32, #tpu.memory_space<vmem>>, vector<1x32xf32>
      %142 = vector.broadcast %141 : vector<1x32xf32> to vector<128x32xf32>
      %143 = arith.addf %140, %142 : vector<128x32xf32>
      %144 = arith.addf %143, %136 : vector<128x32xf32>
      %145 = arith.negf %144 : vector<128x32xf32>
      %146 = math.exp %145 : vector<128x32xf32>
      %cst_60 = arith.constant 1.000000e+00 : f32
      %147 = vector.broadcast %cst_60 : f32 to vector<128x32xf32>
      %148 = arith.addf %147, %146 : vector<128x32xf32>
      %149 = arith.divf %147, %148 : vector<128x32xf32>
      %150 = arith.mulf %144, %149 : vector<128x32xf32>
      %c8 = arith.constant 8 : index
      %c0_61 = arith.constant 0 : index
      %151 = vector.load %arg6[%c8, %c0_61] : memref<15x32xf32, #tpu.memory_space<vmem>>, vector<1x32xf32>
      %c13 = arith.constant 13 : index
      %c0_62 = arith.constant 0 : index
      %152 = vector.load %arg6[%c13, %c0_62] : memref<15x32xf32, #tpu.memory_space<vmem>>, vector<1x32xf32>
      %cst_63 = arith.constant dense<0.000000e+00> : vector<128xf32>
      %153 = vector.multi_reduction <add>, %150, %cst_63 [1] : vector<128x32xf32> to vector<128xf32>
      %154 = vector.shape_cast %153 : vector<128xf32> to vector<128x1xf32>
      %cst_64 = arith.constant 3.200000e+01 : f32
      %155 = vector.broadcast %cst_64 : f32 to vector<128x1xf32>
      %156 = arith.divf %154, %155 : vector<128x1xf32>
      %157 = vector.broadcast %156 : vector<128x1xf32> to vector<128x32xf32>
      %158 = arith.subf %150, %157 : vector<128x32xf32>
      %159 = arith.mulf %158, %158 : vector<128x32xf32>
      %cst_65 = arith.constant dense<0.000000e+00> : vector<128xf32>
      %160 = vector.multi_reduction <add>, %159, %cst_65 [1] : vector<128x32xf32> to vector<128xf32>
      %161 = vector.shape_cast %160 : vector<128xf32> to vector<128x1xf32>
      %cst_66 = arith.constant 3.200000e+01 : f32
      %162 = vector.broadcast %cst_66 : f32 to vector<128x1xf32>
      %163 = arith.divf %161, %162 : vector<128x1xf32>
      %164 = vector.broadcast %156 : vector<128x1xf32> to vector<128x32xf32>
      %165 = arith.subf %150, %164 : vector<128x32xf32>
      %cst_67 = arith.constant 1.000000e-01 : f32
      %166 = vector.broadcast %cst_67 : f32 to vector<128x1xf32>
      %167 = arith.addf %163, %166 : vector<128x1xf32>
      %168 = math.rsqrt %167 : vector<128x1xf32>
      %169 = vector.broadcast %168 : vector<128x1xf32> to vector<128x32xf32>
      %170 = arith.mulf %165, %169 : vector<128x32xf32>
      %171 = vector.broadcast %151 : vector<1x32xf32> to vector<128x32xf32>
      %172 = arith.mulf %170, %171 : vector<128x32xf32>
      %173 = vector.broadcast %152 : vector<1x32xf32> to vector<128x32xf32>
      %174 = arith.addf %172, %173 : vector<128x32xf32>
      %175 = arith.addf %136, %174 : vector<128x32xf32>
      %176 = arith.truncf %174 : vector<128x32xf32> to vector<128x32xbf16>
      %c3_68 = arith.constant 3 : index
      %c0_69 = arith.constant 0 : index
      %c0_70 = arith.constant 0 : index
      %177 = vector.load %arg5[%c3_68, %c0_69, %c0_70] : memref<4x32x32xbf16, #tpu.memory_space<vmem>>, vector<1x32x32xbf16>
      %178 = vector.shape_cast %177 : vector<1x32x32xbf16> to vector<32x32xbf16>
      %cst_71 = arith.constant dense<0.000000e+00> : vector<128x32xf32>
      %179 = tpu.matmul %176, %178, %cst_71 {dimension_numbers = #tpu.dot_dimension_numbers<[1], [0], [0], [1], [0, 0, 1, 1], [], []>} : vector<128x32xbf16>, vector<32x32xbf16>, vector<128x32xf32> -> vector<128x32xf32>
      %c4 = arith.constant 4 : index
      %c0_72 = arith.constant 0 : index
      %180 = vector.load %arg6[%c4, %c0_72] : memref<15x32xf32, #tpu.memory_space<vmem>>, vector<1x32xf32>
      %181 = vector.broadcast %180 : vector<1x32xf32> to vector<128x32xf32>
      %182 = arith.addf %179, %181 : vector<128x32xf32>
      %183 = arith.addf %182, %175 : vector<128x32xf32>
      %184 = arith.negf %183 : vector<128x32xf32>
      %185 = math.exp %184 : vector<128x32xf32>
      %cst_73 = arith.constant 1.000000e+00 : f32
      %186 = vector.broadcast %cst_73 : f32 to vector<128x32xf32>
      %187 = arith.addf %186, %185 : vector<128x32xf32>
      %188 = arith.divf %186, %187 : vector<128x32xf32>
      %189 = arith.mulf %183, %188 : vector<128x32xf32>
      %c9 = arith.constant 9 : index
      %c0_74 = arith.constant 0 : index
      %190 = vector.load %arg6[%c9, %c0_74] : memref<15x32xf32, #tpu.memory_space<vmem>>, vector<1x32xf32>
      %c14 = arith.constant 14 : index
      %c0_75 = arith.constant 0 : index
      %191 = vector.load %arg6[%c14, %c0_75] : memref<15x32xf32, #tpu.memory_space<vmem>>, vector<1x32xf32>
      %cst_76 = arith.constant dense<0.000000e+00> : vector<128xf32>
      %192 = vector.multi_reduction <add>, %189, %cst_76 [1] : vector<128x32xf32> to vector<128xf32>
      %193 = vector.shape_cast %192 : vector<128xf32> to vector<128x1xf32>
      %cst_77 = arith.constant 3.200000e+01 : f32
      %194 = vector.broadcast %cst_77 : f32 to vector<128x1xf32>
      %195 = arith.divf %193, %194 : vector<128x1xf32>
      %196 = vector.broadcast %195 : vector<128x1xf32> to vector<128x32xf32>
      %197 = arith.subf %189, %196 : vector<128x32xf32>
      %198 = arith.mulf %197, %197 : vector<128x32xf32>
      %cst_78 = arith.constant dense<0.000000e+00> : vector<128xf32>
      %199 = vector.multi_reduction <add>, %198, %cst_78 [1] : vector<128x32xf32> to vector<128xf32>
      %200 = vector.shape_cast %199 : vector<128xf32> to vector<128x1xf32>
      %cst_79 = arith.constant 3.200000e+01 : f32
      %201 = vector.broadcast %cst_79 : f32 to vector<128x1xf32>
      %202 = arith.divf %200, %201 : vector<128x1xf32>
      %203 = vector.broadcast %195 : vector<128x1xf32> to vector<128x32xf32>
      %204 = arith.subf %189, %203 : vector<128x32xf32>
      %cst_80 = arith.constant 1.000000e-01 : f32
      %205 = vector.broadcast %cst_80 : f32 to vector<128x1xf32>
      %206 = arith.addf %202, %205 : vector<128x1xf32>
      %207 = math.rsqrt %206 : vector<128x1xf32>
      %208 = vector.broadcast %207 : vector<128x1xf32> to vector<128x32xf32>
      %209 = arith.mulf %204, %208 : vector<128x32xf32>
      %210 = vector.broadcast %190 : vector<1x32xf32> to vector<128x32xf32>
      %211 = arith.mulf %209, %210 : vector<128x32xf32>
      %212 = vector.broadcast %191 : vector<1x32xf32> to vector<128x32xf32>
      %213 = arith.addf %211, %212 : vector<128x32xf32>
      %214 = arith.truncf %213 : vector<128x32xf32> to vector<128x32xbf16>
      %c0_81 = arith.constant 0 : index
      %c0_82 = arith.constant 0 : index
      %215 = vector.load %arg7[%c0_81, %c0_82] : memref<32x256xbf16, #tpu.memory_space<vmem>>, vector<32x256xbf16>
      %cst_83 = arith.constant dense<0.000000e+00> : vector<128x256xf32>
      %216 = tpu.matmul %214, %215, %cst_83 {dimension_numbers = #tpu.dot_dimension_numbers<[1], [0], [0], [1], [0, 0, 1, 1], [], []>} : vector<128x32xbf16>, vector<32x256xbf16>, vector<128x256xf32> -> vector<128x256xf32>
      %c0_84 = arith.constant 0 : index
      %c0_85 = arith.constant 0 : index
      %217 = vector.load %arg8[%c0_84, %c0_85] : memref<1x256xf32, #tpu.memory_space<vmem>>, vector<1x256xf32>
      %218 = vector.broadcast %217 : vector<1x256xf32> to vector<128x256xf32>
      %219 = arith.addf %216, %218 : vector<128x256xf32>
      %220 = vector.extract_strided_slice %219 {offsets = [0, 0], sizes = [128, 128], strides = [1, 1]} : vector<128x256xf32> to vector<128x128xf32>
      %221 = vector.extract_strided_slice %219 {offsets = [0, 128], sizes = [128, 128], strides = [1, 1]} : vector<128x256xf32> to vector<128x128xf32>
      %c0_86 = arith.constant 0 : index
      %c0_87 = arith.constant 0 : index
      %222 = vector.load %arg3[%c0_86, %c0_87] : memref<128x128xf32, #tpu.memory_space<vmem>>, vector<128x128xf32>
      %c0_88 = arith.constant 0 : index
      %c0_89 = arith.constant 0 : index
      %223 = vector.load %arg9[%c0_88, %c0_89] : memref<3x128xf32, #tpu.memory_space<vmem>>, vector<1x128xf32>
      %c1_90 = arith.constant 1 : index
      %c0_91 = arith.constant 0 : index
      %224 = vector.load %arg9[%c1_90, %c0_91] : memref<3x128xf32, #tpu.memory_space<vmem>>, vector<1x128xf32>
      %c2_92 = arith.constant 2 : index
      %c0_93 = arith.constant 0 : index
      %225 = vector.load %arg9[%c2_92, %c0_93] : memref<3x128xf32, #tpu.memory_space<vmem>>, vector<1x128xf32>
      %226 = vector.broadcast %223 : vector<1x128xf32> to vector<128x128xf32>
      %227 = arith.subf %222, %226 : vector<128x128xf32>
      %228 = arith.mulf %227, %227 : vector<128x128xf32>
      %cst_94 = arith.constant 0.000000e+00 : f32
      %229 = vector.broadcast %cst_94 : f32 to vector<1x128xf32>
      %230 = arith.subf %229, %224 : vector<1x128xf32>
      %231 = math.exp %230 : vector<1x128xf32>
      %232 = vector.broadcast %231 : vector<1x128xf32> to vector<128x128xf32>
      %233 = arith.mulf %228, %232 : vector<128x128xf32>
      %234 = vector.broadcast %224 : vector<1x128xf32> to vector<128x128xf32>
      %235 = arith.addf %234, %233 : vector<128x128xf32>
      %cst_95 = arith.constant -5.000000e-01 : f32
      %236 = vector.broadcast %cst_95 : f32 to vector<128x128xf32>
      %237 = arith.mulf %236, %235 : vector<128x128xf32>
      %cst_96 = arith.constant -2.81605864 : f32
      %238 = vector.broadcast %cst_96 : f32 to vector<128x128xf32>
      %239 = arith.addf %237, %238 : vector<128x128xf32>
      %240 = arith.subf %222, %220 : vector<128x128xf32>
      %241 = arith.mulf %240, %240 : vector<128x128xf32>
      %cst_97 = arith.constant 0.000000e+00 : f32
      %242 = vector.broadcast %cst_97 : f32 to vector<128x128xf32>
      %243 = arith.subf %242, %221 : vector<128x128xf32>
      %244 = math.exp %243 : vector<128x128xf32>
      %245 = arith.mulf %241, %244 : vector<128x128xf32>
      %246 = arith.addf %221, %245 : vector<128x128xf32>
      %cst_98 = arith.constant -5.000000e-01 : f32
      %247 = vector.broadcast %cst_98 : f32 to vector<128x128xf32>
      %248 = arith.mulf %247, %246 : vector<128x128xf32>
      %cst_99 = arith.constant -1.20662057 : f32
      %249 = vector.broadcast %cst_99 : f32 to vector<128x128xf32>
      %250 = arith.addf %248, %249 : vector<128x128xf32>
      %cst_100 = arith.constant 0.000000e+00 : f32
      %251 = vector.broadcast %cst_100 : f32 to vector<1x128xf32>
      %252 = arith.subf %251, %225 : vector<1x128xf32>
      %253 = math.exp %252 : vector<1x128xf32>
      %254 = vector.broadcast %253 : vector<1x128xf32> to vector<128x128xf32>
      %255 = arith.mulf %228, %254 : vector<128x128xf32>
      %256 = vector.broadcast %225 : vector<1x128xf32> to vector<128x128xf32>
      %257 = arith.addf %256, %255 : vector<128x128xf32>
      %cst_101 = arith.constant -5.000000e-01 : f32
      %258 = vector.broadcast %cst_101 : f32 to vector<128x128xf32>
      %259 = arith.mulf %258, %257 : vector<128x128xf32>
      %cst_102 = arith.constant -3.22152352 : f32
      %260 = vector.broadcast %cst_102 : f32 to vector<128x128xf32>
      %261 = arith.addf %259, %260 : vector<128x128xf32>
      %262 = arith.maximumf %239, %250 : vector<128x128xf32>
      %263 = arith.maximumf %262, %261 : vector<128x128xf32>
      %264 = arith.subf %239, %263 : vector<128x128xf32>
      %265 = math.exp %264 : vector<128x128xf32>
      %266 = arith.subf %250, %263 : vector<128x128xf32>
      %267 = math.exp %266 : vector<128x128xf32>
      %268 = arith.addf %265, %267 : vector<128x128xf32>
      %269 = arith.subf %261, %263 : vector<128x128xf32>
      %270 = math.exp %269 : vector<128x128xf32>
      %271 = arith.addf %268, %270 : vector<128x128xf32>
      %272 = math.log %271 : vector<128x128xf32>
      %273 = arith.addf %263, %272 : vector<128x128xf32>
      %c0_103 = arith.constant 0 : index
      %c0_104 = arith.constant 0 : index
      %274 = vector.load %arg10[%c0_103, %c0_104] : memref<128x128xf32, #tpu.memory_space<vmem>>, vector<128x128xf32>
      tpu.vector_store %arg10[%c0_103, %c0_104], %273 {strides = array<i32>} : memref<128x128xf32, #tpu.memory_space<vmem>>, vector<128x128xf32>,
    } else {
    }
    return
  }
  func.func @transform_0(%arg0: i32, %arg1: i32) -> (i32, i32) {
    %c0_i32 = arith.constant 0 : i32
    return %arg0, %arg1 : i32, i32
  }
  func.func @transform_1(%arg0: i32, %arg1: i32) -> (i32, i32) {
    %c0_i32 = arith.constant 0 : i32
    %c0_i32_0 = arith.constant 0 : i32
    return %arg0, %c0_i32 : i32, i32
  }
  func.func @transform_2(%arg0: i32, %arg1: i32) -> (i32, i32) {
    %c0_i32 = arith.constant 0 : i32
    %c0_i32_0 = arith.constant 0 : i32
    return %arg1, %c0_i32 : i32, i32
  }
  func.func @transform_3(%arg0: i32, %arg1: i32) -> (i32, i32, i32) {
    %c0_i32 = arith.constant 0 : i32
    %c0_i32_0 = arith.constant 0 : i32
    %c0_i32_1 = arith.constant 0 : i32
    %c0_i32_2 = arith.constant 0 : i32
    return %c0_i32, %c0_i32_0, %c0_i32_1 : i32, i32, i32
  }
  func.func @transform_4(%arg0: i32, %arg1: i32) -> (i32, i32) {
    %c0_i32 = arith.constant 0 : i32
    %c0_i32_0 = arith.constant 0 : i32
    %c0_i32_1 = arith.constant 0 : i32
    return %c0_i32, %c0_i32_0 : i32, i32
  }
  func.func @transform_5(%arg0: i32, %arg1: i32) -> (i32, i32) {
    %c0_i32 = arith.constant 0 : i32
    %c0_i32_0 = arith.constant 0 : i32
    %c0_i32_1 = arith.constant 0 : i32
    return %c0_i32, %c0_i32_0 : i32, i32
  }
  func.func @transform_6(%arg0: i32, %arg1: i32) -> (i32, i32) {
    %c0_i32 = arith.constant 0 : i32
    %c0_i32_0 = arith.constant 0 : i32
    %c0_i32_1 = arith.constant 0 : i32
    return %c0_i32, %c0_i32_0 : i32, i32
  }
  func.func @transform_7(%arg0: i32, %arg1: i32) -> (i32, i32) {
    %c0_i32 = arith.constant 0 : i32
    %c0_i32_0 = arith.constant 0 : i32
    %c0_i32_1 = arith.constant 0 : i32
    return %c0_i32, %c0_i32_0 : i32, i32
  }
  func.func @transform_8(%arg0: i32, %arg1: i32) -> (i32, i32) {
    %c0_i32 = arith.constant 0 : i32
    %c0_i32_0 = arith.constant 0 : i32
    return %arg0, %c0_i32 : i32, i32
  }
}

</mosaic_0001>

<bundles_post_ra>
// kernel: tpu_custom_call.1
= control target key start
LH: loop header
LB: loop body
LE: loop exit
PB: predicated region body
PF: predicated region fallthrough
CT: control target
= control target key end

     0   :  { %s9603_s0 = inlined_call_operand.hbm [shape: f32[256,1024], index: 0, kind: input, shape index: {}]   ;;  %s9604_s1 = inlined_call_operand.vmem [shape: f32[256,128], index: 1, kind: input, shape index: {}]   ;;  %s9605_s2 = inlined_call_operand.vmem [shape: bf16[1024,32], index: 2, kind: input, shape index: {}]   ;;  %s9606_s3 = inlined_call_operand.vmem [shape: bf16[4,32,32], index: 3, kind: input, shape index: {}]   ;;  %s9607_s4 = inlined_call_operand.vmem [shape: f32[15,32], index: 4, kind: input, shape index: {}]   ;;  %s9608_s5 = inlined_call_operand.vmem [shape: bf16[32,256], index: 5, kind: input, shape index: {}]   ;;  %s9609_s6 = inlined_call_operand.vmem [shape: f32[1,256], index: 6, kind: input, shape index: {}]   ;;  %s9610_s7 = inlined_call_operand.vmem [shape: f32[3,128], index: 7, kind: input, shape index: {}]   ;;  %s9611_s8 = inlined_call_operand.hbm [shape: f32[256,128], index: 8, kind: output, shape index: {}]  }
   0x1   :  { %9633 = sst [smem:[#allocation28_spill]] %s9609_s6 }
   0x2   :  { %9634 = sst [smem:[#allocation29_spill]] %s9610_s7 }
   0x3   :  { %9635 = sst [smem:[#allocation30_spill]] %s9611_s8 }
   0x4   :  { %13 = vsyncpa [#allocation5], 0 }
   0x5   :  { %15 = vsyncpa [#allocation5 + $0x1], 0 }
   0x6   :  { %16 = vsyncpa [#allocation6], 0 }
   0x7   :  { %18 = vsyncpa [#allocation6 + $0x1], 0  ;;  %s6359_s27 = smov 0   ;;  %s6361_s28 = smov 0  }
   0x8   :  { %s6363_s29 = smov 0   ;;  %s6365_s30 = smov 0  }
   0x9   :  { %s6367_s9 = smov 0   ;;  %s6369_s10 = smov 0  }
   0xa   :  { %s6371_s11 = smov 0   ;;  %s6373_s12 = smov 0  }
   0xb   :  { %s6375_s13 = smov 0   ;;  %s6377_s14 = smov 0  }
   0xc   :  { %s6379_s15 = smov 0  }
   0xd LB: > { %9636 = sst [smem:[#allocation10_spill]] %s6283_s10  ;;  %s4853_s16 = sadd.s32 4294967295, %s6303_s15   ;;  %s6303_s15 = sphi %s6379_s15, %s24_s15   ;;  %s6299_s14 = sphi %s6377_s14, %s9692_s14   ;;  %s6295_s13 = sphi %s6375_s13, %s9691_s13   ;;  %s6291_s12 = sphi %s6373_s12, %s9690_s12   ;;  %s6287_s11 = sphi %s6371_s11, %s9689_s11   ;;  %s6283_s10 = sphi %s6369_s10, %s9681_s10   ;;  %s6279_s9 = sphi %s6367_s9, %s9688_s9   ;;  %s6275_s30 = sphi %s6365_s30, %s9687_s30   ;;  %s6271_s29 = sphi %s6363_s29, %s9686_s29   ;;  %s6267_s28 = sphi %s6361_s28, %s9685_s28   ;;  %s6263_s27 = sphi %s6359_s27, %s9684_s27  }
   0xe   : > { %s4854_s17 = sadd.s32 4294967294, %s6303_s15   ;;  %s33_s18 = sadd.s32 1, %s6295_s13 }
   0xf   : > { %s36_s19 = sadd.s32 1, %s6299_s14  ;;  %p34_p0 = scmp.ge.s32.totalorder %s33_s18, 2 }
  0x10   : > { %s45_s20 = sadd.s32 1, %s6283_s10  ;;  %p52_p1 = scmp.ne.s32.totalorder %s6283_s10, %s6279_s9 }
  0x11   : > { %p53_p2 = scmp.eq.s32.totalorder %s6303_s15, 0  ;;  %s9694_s18 = smov (%p34_p0, %s33_s18), 0 }
  0x12   : > { %9637 = sst [smem:[#allocation11_spill]] %s9694_s18  ;;  %s9696_s19 = smov (!%p34_p0, %s36_s19), %s6299_s14 }
  0x13   : > { %s41_s21 = ssub.s32 %s6295_s13, %s9694_s18  ;;  %p6425_p3 = por %p53_p2, %p52_p1 }
  0x14   : > { %p38_p4 = scmp.ge.s32.totalorder %s9696_s19, 2  ;;  %p58_p5 = scmp.ne.s32.totalorder %s6279_s9, %s6275_s30 }
  0x15   : > { %p59_p6 = scmp.eq.s32.totalorder %s4853_s16, 0  ;;  %s228_s23 = sadd.s32 1, %s6271_s29 }
  0x16   : > { %s9698_s19 = smov (%p38_p4, %s9696_s19), 0  ;;  %p238_p8 = scmp.ne.s32.totalorder %s6271_s29, %s6267_s28 }
  0x17   : > { %9639 = sst [smem:[#allocation12_spill]] %s9698_s19  ;;  %p6433_p7 = por %p59_p6, %p58_p5 }
  0x18   : > { %s40_s25 = ssub.s32 %s6299_s14, %s9698_s19  ;;  %p239_p9 = scmp.eq.s32.totalorder %s4853_s16, 3 }
  0x19   : > { %s42_s26 = sor.u32 %s41_s21, %s40_s25  ;;  %p226_p10 = scmp.eq.s32.totalorder %s40_s25, 0 }
  0x1a   : > { %p43_p11 = scmp.eq.s32.totalorder %s42_s26, 0  ;;  %p6441_p12 = por %p239_p9, %p238_p8 }
  0x1b   : > { %s6446_s18 = scalar_select %p226_p10, %s6271_s29, %s228_s23  }
  0x1c   : > { %s9641_s30 = scalar_select %p6441_p12, 1, 0 }
  0x1d   : > { %s6449_s8 = scalar_select %p43_p11, %s6283_s10, %s45_s20  }
  0x1e   : > { %9642 = sst [smem:[#allocation13_spill]] %s9641_s30  ;;  %p244_p13 = scmp.ne.s32.totalorder %s6267_s28, %s6263_s27 }
  0x1f   : > { %9643 = sst [smem:[#allocation14_spill]] %s6449_s8  ;;  %p245_p0 = scmp.eq.s32.totalorder %s4854_s17, 3 }
  0x20   : > { %p5330_p1 = scmp.lt.s32.totalorder %s6303_s15, 4  ;;  %s280_s16 = sand.u32 1, %s6283_s10  }
  0x21   : > { %p6454_p2 = por %p245_p0, %p244_p13  ;;  %s4857_s21 = sshll.u32 %s280_s16, 9 }
  0x22   : > { %s4859_s25 = sshll.u32 %s6295_s13, 2  ;;  %s5068_s26 = sshll.u32 %s6299_s14, 7 }
  0x23   : > { %s9644_s6 = scalar_select %p6454_p2, 1, 0 }
  0x24   : > { %s284_s19 = scalar_lea.vmem [#allocation4], %s4857_s21  ;;  %s291_s30 = sadd.s32 %s5068_s26, %s4859_s25 }
  0x25   : > { %s294_s7 = sshll.u32 %s284_s19, 4  ;;  %s4861_s23 = sshll.u32 %s291_s30, 7  ;;  %s6461_s7 = int_to_ptr.vmem [resolvable:$true] %s294_s7 }
  0x26   : > { %p6465_p4 = pnand %p5330_p1, %p6425_p3  ;;  %s6472_s10 = scalar_lea.hbm %s9603_s0, %s4861_s23 }
  0x27   : > { %s6475_s19 = scalar_lea.sflag [#allocation5], %s280_s16  ;;  %s6151_s30 = scalar_lea.hbm %s6472_s10, 8192 }
  0x28   : > { %p6152_p6 = scmp.ne.s32.totalorder %s6472_s10, %s6151_s30  ;;  %p6153_p3 = pneg %p6465_p4 }
  0x29   : > { %s6156_s21 = scalar_lea.hbm %s9603_s0, 32768  ;;  %p6157_p10 = scmp.lt.u32.totalorder %s6472_s10, %s9603_s0 }
  0x2a   : > { %p6154_p8 = pnand %p6153_p3, %p6152_p6  ;;  %p6158_p11 = scmp.lt.u32.totalorder %s6156_s21, %s6151_s30 }
  0x2b   : > { %p6160_p0 = scmp.lt.u32.totalorder %s6151_s30, %s6472_s10 }
  0x2c   : > { %p6155_p9 = pneg %p6154_p8  ;;  %p6159_p13 = por %p6158_p11, %p6157_p10 }
  0x2e   : > { %p6161_p1 = por %p6160_p0, %p6159_p13 }
  0x30   : > { %p6162_p5 = pnand %p6161_p1, %p6155_p9 }
  0x32   : > { %6165 = shalt.err (!%p6162_p5)
}
  0x33   : > { %s6166_s16 = scalar_lea.vmem %s6461_s7, 8192  ;;  %s6305_s23 = smov [#allocation4]  }
  0x34   : > { %p6167_p6 = scmp.ne.s32.totalorder %s6461_s7, %s6166_s16  ;;  %s6171_s17 = sshll.u32 %s6305_s23, 4  ;;  %s6172_s17 = int_to_ptr.vmem [resolvable:$false] %s6171_s17 }
  0x35   : > { %s6173_s8 = scalar_lea.vmem %s6172_s17, 16384  ;;  %p6174_p12 = scmp.lt.s32.totalorder %s6461_s7, %s6172_s17 }
  0x36   : > { %p6169_p8 = pnand %p6167_p6, %p6153_p3  ;;  %p6175_p10 = scmp.lt.s32.totalorder %s6173_s8, %s6166_s16 }
  0x38   : > { %p6170_p2 = pneg %p6169_p8  ;;  %p6176_p11 = por %p6175_p10, %p6174_p12 }
  0x3a   : > { %p6177_p13 = pnand %p6176_p11, %p6170_p2 }
  0x3c   : > { %6180 = shalt.err (!%p6177_p13)
}
  0x3d   : > { %s6306_s30 = smov 1024   ;;  %s6307_s22 = smov 512  }
  0x3e   : > { %s6308_s21 = smov 32   ;;  %p320_p5 = scmp.lt.s32.totalorder %s6303_s15, 5 }
  0x3f   : > { %5325 = dma.hbm_to_vmem [thread:$0]  (!%p6465_p4), %s6472_s10, 8192, %s6461_s7, %s6475_s19, %s6306_s30, %s6307_s22, %s6308_s21  }
  0x40   : > { %p9646_p3 = scmp.ge.s32.totalorder %s6303_s15, 1 }
  0x42   : > { %p321_p9 = pnand %p9646_p3, %p320_p5 }
  0x43   : > { %s326_s25 = sand.u32 (!%p321_p9), 1, %s6279_s9  }
  0x44   : > { %324 = sbr.rel (%p321_p9) target bundleno = 3564 (0xdec), region = 52  ;;  %s4863_s26 = sshll.u32 (!%p321_p9), %s326_s25, 9 }
  0x45   : > { %s327_s16 = scalar_lea.sflag (!%p321_p9), [#allocation5], %s326_s25  ;;  %s6507_s23 = scalar_lea.vmem (!%p321_p9), [#allocation4], %s4863_s26 }
  0x4b   : > { %6254 = dma.done.wait (%p6433_p7), %s327_s16, 8192  }
  0x4c   : > { %6256 = vsyncadd (%p6433_p7), %s327_s16, 4294959104  ;;  %s370_s7 = sand.u32 1, %s6267_s28   ;;  %s4865_s10 = sshll.u32 %s6291_s12, 4 }
  0x4d   : > { %s4864_s20 = sshll.u32 %s370_s7, 7  ;;  %p376_p12 = scmp.lt.s32.totalorder %s4865_s10, 31 }
  0x4e   : > { %s4867_s19 = sshll.u32 %s6287_s11, 6  ;;  %s6528_s16 = scalar_lea.vmem [#allocation7], %s4864_s20 }
  0x4f   : > { %s9700_s10 = smov (!%p376_p12, %s4865_s10), 31  ;;  %p382_p2 = scmp.lt.s32.totalorder %s4867_s19, 127 }
  0x50   : > { %s4866_s17 = sshll.u32 %s9700_s10, 3  ;;  %p4869_p7 = scmp.ne.s32.totalorder %s6287_s11, 0 }
  0x51   : > { %s6521_s22 = scalar_lea.vmem %s9604_s1, %s4866_s17  ;;  %s9702_s19 = smov (!%p382_p2, %s4867_s19), 127  ;;  %vm393_vm0 = vcmask (!%p4869_p7), 261120   ;;  %vm410_vm1 = vcmask (!%p4869_p7), 7168   ;;  %v6309_v0 = vmov (!%p4869_p7), 0.0  }
  0x52   : > { %s4868_s24 = sshll.u32 %s9702_s19, 2  ;;  %392 = sbr.rel (%p4869_p7) target bundleno = 98 (0x62), region = 60  ;;  %394 = vst.msk [vmem:[#allocation2] sm:$0xff] (!%p4869_p7), %vm393_vm0, %v6309_v0  ;;  %395 = vst.msk [vmem:[#allocation2 + $0x8] sm:$0xff] (!%p4869_p7), %vm393_vm0, %v6309_v0 }
  0x53   : > { %s6526_s26 = scalar_lea.vmem %s9605_s2, %s4868_s24  ;;  %396 = vst.msk [vmem:[#allocation2 + $0x10] sm:$0xff] (!%p4869_p7), %vm393_vm0, %v6309_v0  ;;  %397 = vst.msk [vmem:[#allocation2 + $0x18] sm:$0xff] (!%p4869_p7), %vm393_vm0, %v6309_v0 }
  0x54   : > { %398 = vst.msk [vmem:[#allocation2 + $0x20] sm:$0xff] (!%p4869_p7), %vm393_vm0, %v6309_v0  ;;  %399 = vst.msk [vmem:[#allocation2 + $0x28] sm:$0xff] (!%p4869_p7), %vm393_vm0, %v6309_v0 }
  0x55   : > { %400 = vst.msk [vmem:[#allocation2 + $0x30] sm:$0xff] (!%p4869_p7), %vm393_vm0, %v6309_v0  ;;  %401 = vst.msk [vmem:[#allocation2 + $0x38] sm:$0xff] (!%p4869_p7), %vm393_vm0, %v6309_v0 }
  0x56   : > { %402 = vst.msk [vmem:[#allocation2 + $0x40] sm:$0xff] (!%p4869_p7), %vm393_vm0, %v6309_v0  ;;  %403 = vst.msk [vmem:[#allocation2 + $0x48] sm:$0xff] (!%p4869_p7), %vm393_vm0, %v6309_v0 }
  0x57   : > { %404 = vst.msk [vmem:[#allocation2 + $0x50] sm:$0xff] (!%p4869_p7), %vm393_vm0, %v6309_v0  ;;  %405 = vst.msk [vmem:[#allocation2 + $0x58] sm:$0xff] (!%p4869_p7), %vm393_vm0, %v6309_v0 }
  0x58   : > { %406 = vst.msk [vmem:[#allocation2 + $0x60] sm:$0xff] (!%p4869_p7), %vm393_vm0, %v6309_v0  ;;  %407 = vst.msk [vmem:[#allocation2 + $0x68] sm:$0xff] (!%p4869_p7), %vm393_vm0, %v6309_v0 }
  0x59   : > { %408 = vst.msk [vmem:[#allocation2 + $0x70] sm:$0xff] %vm393_vm0, %v6309_v0  ;;  %409 = vst.msk [vmem:[#allocation2 + $0x78] sm:$0xff] %vm393_vm0, %v6309_v0 }
  0x5a   : > { %411 = vst.msk [vmem:[#allocation3] sm:$0xff] %vm410_vm1, %v6309_v0  ;;  %412 = vst.msk [vmem:[#allocation3 + $0x8] sm:$0xff] %vm410_vm1, %v6309_v0 }
  0x5b   : > { %413 = vst.msk [vmem:[#allocation3 + $0x10] sm:$0xff] %vm410_vm1, %v6309_v0  ;;  %414 = vst.msk [vmem:[#allocation3 + $0x18] sm:$0xff] %vm410_vm1, %v6309_v0 }
  0x5c   : > { %415 = vst.msk [vmem:[#allocation3 + $0x20] sm:$0xff] %vm410_vm1, %v6309_v0  ;;  %416 = vst.msk [vmem:[#allocation3 + $0x28] sm:$0xff] %vm410_vm1, %v6309_v0 }
  0x5d   : > { %417 = vst.msk [vmem:[#allocation3 + $0x30] sm:$0xff] %vm410_vm1, %v6309_v0  ;;  %418 = vst.msk [vmem:[#allocation3 + $0x38] sm:$0xff] %vm410_vm1, %v6309_v0 }
  0x5e   : > { %419 = vst.msk [vmem:[#allocation3 + $0x40] sm:$0xff] %vm410_vm1, %v6309_v0  ;;  %420 = vst.msk [vmem:[#allocation3 + $0x48] sm:$0xff] %vm410_vm1, %v6309_v0 }
  0x5f   : > { %421 = vst.msk [vmem:[#allocation3 + $0x50] sm:$0xff] %vm410_vm1, %v6309_v0  ;;  %422 = vst.msk [vmem:[#allocation3 + $0x58] sm:$0xff] %vm410_vm1, %v6309_v0 }
  0x60   : > { %423 = vst.msk [vmem:[#allocation3 + $0x60] sm:$0xff] %vm410_vm1, %v6309_v0  ;;  %424 = vst.msk [vmem:[#allocation3 + $0x68] sm:$0xff] %vm410_vm1, %v6309_v0 }
  0x61   : > { %425 = vst.msk [vmem:[#allocation3 + $0x70] sm:$0xff] %vm410_vm1, %v6309_v0  ;;  %426 = vst.msk [vmem:[#allocation3 + $0x78] sm:$0xff] %vm410_vm1, %v6309_v0 }
  0x62 PF: > { %v5427_v1 = vld [vmem:[%s6526_s26 + $0x40] sm:$0xff]   ;;  %v5431_v5 = vld [vmem:[%s6526_s26 + $0x48] sm:$0xff]   ;;  %v5435_v9 = vld [vmem:[%s6526_s26 + $0x50] sm:$0xff]   ;;  %vm1198_vm2 = vcmask 7168   ;;  %vm1005_vm3 = vcmask 261120   ;;  %p4902_p4 = scmp.ne.s32.totalorder %s6287_s11, 1 }
  0x63   : > { %v5428_v2 = vld [vmem:[%s6526_s26 + $0xc0] sm:$0xff]   ;;  %5070 = vmatprep.subr.bf16.mxu0 %v5427_v1  ;;  %v5432_v6 = vld [vmem:[%s6526_s26 + $0xc8] sm:$0xff]   ;;  %v5436_v10 = vld [vmem:[%s6526_s26 + $0xd0] sm:$0xff]  }
  0x64   : > { %v5429_v3 = vld [vmem:[%s6526_s26] sm:$0xff]   ;;  %5134 = vmatprep.subr.bf16.mxu1 %v5428_v2  ;;  %v5433_v7 = vld [vmem:[%s6526_s26 + $0x8] sm:$0xff]   ;;  %v5437_v11 = vld [vmem:[%s6526_s26 + $0x10] sm:$0xff]  }
  0x65   : > { %v5430_v4 = vld [vmem:[%s6526_s26 + $0x80] sm:$0xff]   ;;  %5071 = vmatpush3.bf16.msra.mxu0 %v5429_v3  ;;  %v5434_v8 = vld [vmem:[%s6526_s26 + $0x88] sm:$0xff]   ;;  %v5438_v12 = vld [vmem:[%s6526_s26 + $0x90] sm:$0xff]  }
  0x66   : > { %5135 = vmatpush3.bf16.msra.mxu1 %v5430_v4  ;;  %5072 = vmatprep.subr.bf16.mxu0 %v5431_v5  ;;  %v5439_v13 = vld [vmem:[%s6526_s26 + $0x58] sm:$0xff]   ;;  %v5443_v17 = vld [vmem:[%s6526_s26 + $0x60] sm:$0xff]   ;;  %v5447_v21 = vld [vmem:[%s6526_s26 + $0x68] sm:$0xff]  }
  0x67   : > { %5136 = vmatprep.subr.bf16.mxu1 %v5432_v6  ;;  %v5440_v14 = vld [vmem:[%s6526_s26 + $0xd8] sm:$0xff]   ;;  %v5444_v18 = vld [vmem:[%s6526_s26 + $0xe0] sm:$0xff]   ;;  %v5448_v22 = vld [vmem:[%s6526_s26 + $0xe8] sm:$0xff]  }
  0x68   : > { %v5441_v15 = vld [vmem:[%s6526_s26 + $0x18] sm:$0xff]   ;;  %v5445_v19 = vld [vmem:[%s6526_s26 + $0x20] sm:$0xff]   ;;  %v5449_v23 = vld [vmem:[%s6526_s26 + $0x28] sm:$0xff]  }
  0x69   : > { %5073 = vmatpush3.bf16.msra.mxu0 %v5433_v7  ;;  %v5442_v16 = vld [vmem:[%s6526_s26 + $0x98] sm:$0xff]   ;;  %v5446_v20 = vld [vmem:[%s6526_s26 + $0xa0] sm:$0xff]   ;;  %v5450_v24 = vld [vmem:[%s6526_s26 + $0xa8] sm:$0xff]  }
  0x6a   : > { %5137 = vmatpush3.bf16.msra.mxu1 %v5434_v8  ;;  %5074 = vmatprep.subr.bf16.mxu0 %v5435_v9  ;;  %v5451_v25 = vld [vmem:[%s6526_s26 + $0x70] sm:$0xff]   ;;  %v5455_v29 = vld [vmem:[%s6526_s26 + $0x78] sm:$0xff]   ;;  %v428_v33 = vld [vmem:[%s6507_s23 + $0x8] sm:$0xff] }
  0x6b   : > { %5138 = vmatprep.subr.bf16.mxu1 %v5436_v10  ;;  %v5452_v26 = vld [vmem:[%s6526_s26 + $0xf0] sm:$0xff]   ;;  %v5456_v30 = vld [vmem:[%s6526_s26 + $0xf8] sm:$0xff]   ;;  %v431_v34 = vld [vmem:[%s6507_s23 + $0x20] sm:$0xff]  ;;  %v1039_v61 = vmul.f32 %v428_v33, %v428_v33 }
  0x6c   : > { %v5453_v27 = vld [vmem:[%s6526_s26 + $0x30] sm:$0xff]   ;;  %v5457_v31 = vld [vmem:[%s6526_s26 + $0x38] sm:$0xff]   ;;  %v432_v35 = vld [vmem:[%s6507_s23 + $0x28] sm:$0xff]  ;;  %v1042_v56 = vmul.f32 %v431_v34, %v431_v34 }
  0x6d   : > { %5075 = vmatpush3.bf16.msra.mxu0 %v5437_v11  ;;  %v5454_v28 = vld [vmem:[%s6526_s26 + $0xb0] sm:$0xff]   ;;  %v5458_v32 = vld [vmem:[%s6526_s26 + $0xb8] sm:$0xff]   ;;  %v508_v36 = vpack.c.bf16 %v432_v35, %v428_v33  ;;  %v427_v39 = vld [vmem:[%s6507_s23] sm:$0xff]  ;;  %v1043_v57 = vmul.f32 %v432_v35, %v432_v35 }
  0x6e   : > { %5139 = vmatpush3.bf16.msra.mxu1 %v5438_v12  ;;  %5076 = vmatprep.subr.bf16.mxu0 %v5439_v13  ;;  %v6599_v37 = vld [vmem:[%s6507_s23 + $0x18] sm:$0xff]  ;;  %v507_v41 = vpack.c.bf16 %v431_v34, %v427_v39  ;;  %v429_v42 = vld [vmem:[%s6507_s23 + $0x10] sm:$0xff]  ;;  %v436_v44 = vld [vmem:[%s6507_s23 + $0x48] sm:$0xff]  ;;  %v1038_v1 = vmul.f32 %v427_v39, %v427_v39 }
  0x6f   : > { %5140 = vmatprep.subr.bf16.mxu1 %v5440_v14  ;;  %v434_v38 = vld [vmem:[%s6507_s23 + $0x38] sm:$0xff]  ;;  %v6606_v43 = vld [vmem:[%s6507_s23 + $0x30] sm:$0xff]  ;;  %827 = vmatprep.mubr.bf16.mxu0 %v508_v36  ;;  %v440_v46 = vld [vmem:[%s6507_s23 + $0x68] sm:$0xff]  ;;  %v1047_v52 = vmul.f32 %v436_v44, %v436_v44  ;;  %v6634_v7 = vadd.f32 %v1043_v57, %v1042_v56  ;;  %v1040_v13 = vmul.f32 %v429_v42, %v429_v42 }
  0x70   : > { %v510_v40 = vpack.c.bf16 %v434_v38, %v6599_v37  ;;  %v509_v45 = vpack.c.bf16 %v6606_v43, %v429_v42  ;;  %v438_v47 = vld [vmem:[%s6507_s23 + $0x58] sm:$0xff]  ;;  %v512_v49 = vpack.c.bf16 %v440_v46, %v436_v44  ;;  %v435_v51 = vld [vmem:[%s6507_s23 + $0x40] sm:$0xff]  ;;  %v437_v54 = vld [vmem:[%s6507_s23 + $0x50] sm:$0xff]  ;;  %v6636_v8 = vmul.f32 %v434_v38, %v434_v38 }
  0x71   : > { %5077 = vmatpush3.bf16.msra.mxu0 %v5441_v15  ;;  %v6613_v48 = vld [vmem:[%s6507_s23 + $0x78] sm:$0xff]  ;;  %v439_v53 = vld [vmem:[%s6507_s23 + $0x60] sm:$0xff]  ;;  %v1046_v55 = vmul.f32 %v435_v51, %v435_v51  ;;  %v6620_v58 = vld [vmem:[%s6507_s23 + $0x70] sm:$0xff]  ;;  %v1048_v0 = vmul.f32 %v437_v54, %v437_v54  ;;  %v1051_v14 = vmul.f32 %v440_v46, %v440_v46  ;;  %v1041_v33 = vmul.f32 %v6599_v37, %v6599_v37 }
  0x72   : > { %5141 = vmatpush3.bf16.msra.mxu1 %v5442_v16  ;;  %5078 = vmatprep.subr.bf16.mxu0 %v5443_v17  ;;  %v514_v50 = vpack.c.bf16 %v6613_v48, %v438_v47  ;;  %v444_v59 = vld [vmem:[%s6507_s23 + $0x88] sm:$0xff]  ;;  %v6625_v62 = vld [vmem:[%s6507_s23 + $0x98] sm:$0xff]  ;;  %v511_v2 = vpack.c.bf16 %v439_v53, %v435_v51  ;;  %v513_v4 = vpack.c.bf16 %v6620_v58, %v437_v54  ;;  %v6632_v6 = vld [vmem:[%s6507_s23 + $0x80] sm:$0xff] }
  0x73   : > { %5142 = vmatprep.subr.bf16.mxu1 %v5444_v18  ;;  %924 = vmatprep.mubr.bf16.mxu1 %v510_v40  ;;  %v448_v60 = vld [vmem:[%s6507_s23 + $0xa8] sm:$0xff]  ;;  %v6628_v63 = vld [vmem:[%s6507_s23 + $0xb8] sm:$0xff]  ;;  %v1112_v3 = vadd.f32 %v1047_v52, %v1046_v55  ;;  %v6641_v10 = vld [vmem:[%s6507_s23 + $0xa0] sm:$0xff]  ;;  %v1049_v18 = vmul.f32 %v438_v47, %v438_v47 }
  0x74   : > { %v516_v5 = vpack.c.bf16 %v448_v60, %v444_v59  ;;  %v518_v9 = vpack.c.bf16 %v6628_v63, %v6625_v62  ;;  %v6644_v11 = vld [vmem:[%s6507_s23 + $0x90] sm:$0xff]  ;;  %v6650_v15 = vld [vmem:[%s6507_s23 + $0xc8] sm:$0xff]  ;;  %v6656_v17 = vld [vmem:[%s6507_s23 + $0xd8] sm:$0xff] }
  0x75   : > { %5079 = vmatpush3.bf16.msra.mxu0 %v5445_v19  ;;  %v6647_v12 = vld [vmem:[%s6507_s23 + $0xb0] sm:$0xff]  ;;  %v6653_v16 = vld [vmem:[%s6507_s23 + $0xe8] sm:$0xff]  ;;  %v1113_v19 = vadd.f32 %v1112_v3, %v1048_v0  ;;  %v6696_v36 = vmul.f32 %v6650_v15, %v6650_v15  ;;  %v6704_v37 = vld [vmem:[%s6507_s23 + $0x118] sm:$0xff]  ;;  %v1052_v3 = vmul.f32 %v6620_v58, %v6620_v58 }
  0x76   : > { %5143 = vmatpush3.bf16.msra.mxu1 %v5446_v20  ;;  %5080 = vmatprep.subr.bf16.mxu0 %v5447_v21  ;;  %v1102_v20 = vadd.f32 %v1039_v61, %v1038_v1  ;;  %v1050_v21 = vmul.f32 %v439_v53, %v439_v53  ;;  %v517_v34 = vpack.c.bf16 %v6647_v12, %v6644_v11  ;;  %v6701_v39 = vld [vmem:[%s6507_s23 + $0x128] sm:$0xff]  ;;  %v6707_v40 = vld [vmem:[%s6507_s23 + $0x138] sm:$0xff]  ;;  %v6714_v44 = vld [vmem:[%s6507_s23 + $0x100] sm:$0xff] }
  0x77   : > { %5144 = vmatprep.subr.bf16.mxu1 %v5448_v22  ;;  %v6658_v22 = vmul.f32 %v444_v59, %v444_v59  ;;  %v520_v35 = vpack.c.bf16 %v6653_v16, %v6650_v15  ;;  %v1067_v38 = vmul.f32 %v6653_v16, %v6653_v16  ;;  %v6720_v46 = vld [vmem:[%s6507_s23 + $0x110] sm:$0xff]  ;;  %v1114_v47 = vadd.f32 %v1113_v19, %v1049_v18  ;;  %v6736_v55 = vld [vmem:[%s6507_s23 + $0x148] sm:$0xff]  ;;  %v6773_v15 = vld [vmem:[%s6507_s23 + $0x160] sm:$0xff] }
  0x78   : > { %v6733_v54 = vld [vmem:[%s6507_s23 + $0x130] sm:$0xff]  ;;  %v6739_v56 = vld [vmem:[%s6507_s23 + $0x168] sm:$0xff]  ;;  %v1075_v59 = vmul.f32 %v6701_v39, %v6701_v39  ;;  %v1070_v1 = vmul.f32 %v6714_v44, %v6714_v44  ;;  %v1082_v18 = vmul.f32 %v6773_v15, %v6773_v15 }
  0x79   : > { %5081 = vmatpush3.bf16.msra.mxu0 %v5449_v23  ;;  %v6660_v23 = vmul.f32 %v448_v60, %v448_v60  ;;  %v526_v60 = vpack.c.bf16 %v6707_v40, %v6704_v37  ;;  %1115 = vadd.xlane.f32.xlu1 %v1114_v47  ;;  %v6770_v58 = vmul.f32 %v6739_v56, %v6739_v56  ;;  %v6787_v19 = vld [vmem:[%s6507_s23 + $0x1a8] sm:$0xff] }
  0x7a   : > { %5145 = vmatpush3.bf16.msra.mxu1 %v5450_v24  ;;  %5082 = vmatprep.subr.bf16.mxu0 %v5451_v25  ;;  %v6664_v24 = vmul.f32 %v6632_v6, %v6632_v6  ;;  %v6667_v25 = vld [vmem:[%s6507_s23 + $0xf8] sm:$0xff] }
  0x7b   : > { %5146 = vmatprep.subr.bf16.mxu1 %v5452_v26  ;;  %v6670_v26 = vld [vmem:[%s6507_s23 + $0xc0] sm:$0xff] }
  0x7d   : > { %5083 = vmatpush3.bf16.msra.mxu0 %v5453_v27  ;;  %v6673_v27 = vld [vmem:[%s6507_s23 + $0xe0] sm:$0xff] }
  0x7e   : > { %5147 = vmatpush3.bf16.msra.mxu1 %v5454_v28  ;;  %5084 = vmatprep.subr.bf16.mxu0 %v5455_v29  ;;  %v515_v28 = vpack.c.bf16 %v6641_v10, %v6632_v6  ;;  %v1058_v29 = vmul.f32 %v6641_v10, %v6641_v10  ;;  %v519_v42 = vpack.c.bf16 %v6673_v27, %v6670_v26  ;;  %v6760_v6 = vld [vmem:[%s6507_s23 + $0x140] sm:$0xff] }
  0x7f   : > { %5148 = vmatprep.subr.bf16.mxu1 %v5456_v30  ;;  %v6680_v30 = vld [vmem:[%s6507_s23 + $0xd0] sm:$0xff]  ;;  %v1066_v51 = vmul.f32 %v6673_v27, %v6673_v27  ;;  %v1044_v10 = vmul.f32 %v6606_v43, %v6606_v43  ;;  %v6777_v16 = vmul.f32 %v6760_v6, %v6760_v6  ;;  %v1053_v43 = vmul.f32 %v6613_v48, %v6613_v48 }
  0x80   : > { %v1073_v27 = vmul.f32 %v6704_v37, %v6704_v37 }
  0x81   : > { %5085 = vmatpush3.bf16.msra.mxu0 %v5457_v31  ;;  %v6683_v31 = vld [vmem:[%s6507_s23 + $0xf0] sm:$0xff] }
  0x82   : > { %5149 = vmatpush3.bf16.msra.mxu1 %v5458_v32  ;;  %v6686_v32 = vld [vmem:[%s6507_s23 + $0x108] sm:$0xff]  ;;  %v521_v52 = vpack.c.bf16 %v6683_v31, %v6680_v30 }
  0x83   : > { %v6730_v53 = vmul.f32 %v6686_v32, %v6686_v32  ;;  %v524_v57 = vpack.c.bf16 %v6701_v39, %v6686_v32  ;;  %v1108_v32 = vadd.f32 %v6634_v7, %v1044_v10  ;;  %v1056_v39 = vmul.f32 %v6644_v11, %v6644_v11 }
  0x84   : > { %828 = vmatmul.mubr.bf16.vlgmr.msra.gmra.mrb[0].mxu0 %v507_v41  ;;  %v522_v41 = vpack.c.bf16 %v6667_v25, %v6656_v17  ;;  %v1137_v11 = vadd.f32 %v1067_v38, %v1066_v51  ;;  %v1072_v10 = vmul.f32 %v6720_v46, %v6720_v46 }
  0x85   : > { %925 = vmatmul.mubr.bf16.vlgmr.msra.gmra.mrb[0].mxu1 %v509_v45  ;;  %835 = vmatprep.mubr.bf16.mxu0 %v512_v49  ;;  %v6717_v45 = vld [vmem:[%s6507_s23 + $0x120] sm:$0xff]  ;;  %v1103_v49 = vadd.f32 %v1102_v20, %v1040_v13  ;;  %v6766_v13 = vmul.f32 %v6736_v55, %v6736_v55 }
  0x86   : > { %932 = vmatprep.mubr.bf16.mxu1 %v514_v50  ;;  %v1062_v50 = vmul.f32 %v6670_v26, %v6670_v26  ;;  %v523_v0 = vpack.c.bf16 %v6717_v45, %v6714_v44  ;;  %v1077_v26 = vmul.f32 %v6707_v40, %v6707_v40  ;;  %v1157_v40 = vadd.f32 %v6770_v58, %v1082_v18 }
  0x87   : > { %v1104_v61 = vadd.f32 %v1103_v49, %v1041_v33  ;;  %v1061_v33 = vmul.f32 %v6628_v63, %v6628_v63  ;;  %v1109_v63 = vadd.f32 %v1108_v32, %v6636_v8  ;;  %v1076_v8 = vmul.f32 %v6733_v54, %v6733_v54 }
  0x89   : > { %1105 = vadd.xlane.f32.xlu0 %v1104_v61  ;;  %v1064_v61 = vmul.f32 %v6680_v30, %v6680_v30  ;;  %v6855_v30 = vld [vmem:[%s6507_s23 + $0x150] sm:$0xff] }
  0x8c   : > { %836 = vmatmul.mubr.bf16.gmra.mrb[4].mxu0 %v511_v2  ;;  %v1074_v2 = vmul.f32 %v6717_v45, %v6717_v45 }
  0x8d   : > { %933 = vmatmul.mubr.bf16.gmra.mrb[4].mxu1 %v513_v4  ;;  %843 = vmatprep.mubr.bf16.mxu0 %v516_v5  ;;  %v525_v4 = vpack.c.bf16 %v6733_v54, %v6720_v46  ;;  %v528_v5 = vpack.c.bf16 %v6739_v56, %v6736_v55  ;;  %v527_v55 = vpack.c.bf16 %v6773_v15, %v6760_v6 }
  0x8e   : > { %940 = vmatprep.mubr.bf16.mxu1 %v518_v9  ;;  %v1117_v9 = vadd.f32 %v1051_v14, %v1050_v21  ;;  %v6780_v14 = vld [vmem:[%s6507_s23 + $0x188] sm:$0xff]  ;;  %v1060_v21 = vmul.f32 %v6647_v12, %v6647_v12  ;;  %v1057_v12 = vmul.f32 %v6625_v62, %v6625_v62  ;;  %1110 = vadd.xlane.f32.xlu0 %v1109_v63  ;;  %v477_v63 = vld [vmem:[%s6507_s23 + $0x190] sm:$0xff] }
  0x8f   : > { %v6791_v20 = vmul.f32 %v6780_v14, %v6780_v14  ;;  %v1069_v62 = vmul.f32 %v6667_v25, %v6667_v25 }
  0x90   : > { %v1118_v48 = vadd.f32 %v1117_v9, %v1052_v3  ;;  %v1065_v9 = vmul.f32 %v6656_v17, %v6656_v17  ;;  %v470_v17 = vld [vmem:[%s6507_s23 + $0x158] sm:$0xff] }
  0x92   : > { %v1119_v47 = vadd.f32 %v1118_v48, %v1053_v43  ;;  %v474_v43 = vld [vmem:[%s6507_s23 + $0x178] sm:$0xff] }
  0x94   : > { %844 = vmatmul.mubr.bf16.gmra.mrb[8].mxu0 %v515_v28  ;;  %v6797_v28 = vmul.f32 %v6787_v19, %v6787_v19  ;;  %1120 = vadd.xlane.f32.xlu1 %v1119_v47  ;;  %v1081_v47 = vmul.f32 %v470_v17, %v470_v17 }
  0x95   : > { %941 = vmatmul.mubr.bf16.gmra.mrb[8].mxu1 %v517_v34  ;;  %851 = vmatprep.mubr.bf16.mxu0 %v520_v35  ;;  %v6803_v34 = vld [vmem:[%s6507_s23 + $0x180] sm:$0xff]  ;;  %v1127_v35 = vadd.f32 %v6660_v23, %v1058_v29  ;;  %v1068_v23 = vmul.f32 %v6683_v31, %v6683_v31 }
  0x96   : > { %948 = vmatprep.mubr.bf16.mxu1 %v522_v41  ;;  %v1122_v41 = vadd.f32 %v6658_v22, %v6664_v24  ;;  %v6814_v7 = vmul.f32 %v6803_v34, %v6803_v34  ;;  %v1132_v22 = vadd.f32 %v6696_v36, %v1062_v50  ;;  %v6827_v24 = vld [vmem:[%s6507_s23 + $0x1a0] sm:$0xff]  ;;  %v1147_v50 = vadd.f32 %v1075_v59, %v1074_v2  ;;  %v6860_v59 = vld [vmem:[%s6507_s23 + $0x1c8] sm:$0xff] }
  0x97   : > { %v1128_v29 = vadd.f32 %v1127_v35, %v1060_v21  ;;  %v1138_v51 = vadd.f32 %v1137_v11, %v1068_v23  ;;  %v1090_v25 = vmul.f32 %v6827_v24, %v6827_v24  ;;  %v6844_v21 = vld [vmem:[%s6507_s23 + $0x170] sm:$0xff]  ;;  %v6863_v2 = vld [vmem:[%s6507_s23 + $0x1e8] sm:$0xff]  ;;  %v1095_v48 = vmul.f32 %v6860_v59, %v6860_v59  ;;  %v6876_v35 = vld [vmem:[%s6507_s23 + $0x1e0] sm:$0xff] }
  0x98   : > { %v1123_v49 = vadd.f32 %v1122_v41, %v1056_v39  ;;  %v1133_v36 = vadd.f32 %v1132_v22, %v1064_v61  ;;  %v1099_v32 = vmul.f32 %v6863_v2, %v6863_v2  ;;  %v1152_v39 = vadd.f32 %v6766_v13, %v6777_v16  ;;  %v478_v22 = vld [vmem:[%s6507_s23 + $0x198] sm:$0xff] }
  0x99   : > { %v1129_v3 = vadd.f32 %v1128_v29, %v1061_v33  ;;  %v1139_v31 = vadd.f32 %v1138_v51, %v1069_v62  ;;  %v6873_v33 = vld [vmem:[%s6507_s23 + $0x1c0] sm:$0xff]  ;;  %v1098_v18 = vmul.f32 %v6876_v35, %v6876_v35  ;;  %v1085_v41 = vmul.f32 %v474_v43, %v474_v43 }
  0x9a   : > { %v1124_v38 = vadd.f32 %v1123_v49, %v1057_v12  ;;  %v6881_v12 = vld [vmem:[%s6507_s23 + $0x1b0] sm:$0xff]  ;;  %v1094_v58 = vmul.f32 %v6873_v33, %v6873_v33  ;;  %v1167_v16 = vadd.f32 %v6797_v28, %v1090_v25  ;;  %v1088_v61 = vmul.f32 %v477_v63, %v477_v63 }
  0x9b   : > { %1130 = vadd.xlane.f32.xlu1 %v1129_v3  ;;  %v1092_v13 = vmul.f32 %v6881_v12, %v6881_v12  ;;  %v1162_v62 = vadd.f32 %v6791_v20, %v6814_v7  ;;  %v489_v3 = vld [vmem:[%s6507_s23 + $0x1f0] sm:$0xff]  ;;  %v529_v56 = vpack.c.bf16 %v6844_v21, %v6855_v30 }
  0x9c   : > { %852 = vmatmul.mubr.bf16.gmra.mrb[12].mxu0 %v519_v42  ;;  %v1142_v42 = vadd.f32 %v6730_v53, %v1070_v1  ;;  %1125 = vadd.xlane.f32.xlu0 %v1124_v38  ;;  %v1134_v53 = vadd.f32 %v1133_v36, %v1065_v9  ;;  %v530_v1 = vpack.c.bf16 %v474_v43, %v470_v17  ;;  %v485_v20 = vld [vmem:[%s6507_s23 + $0x1d0] sm:$0xff]  ;;  %v486_v36 = vld [vmem:[%s6507_s23 + $0x1d8] sm:$0xff] }
  0x9d   : > { %949 = vmatmul.mubr.bf16.gmra.mrb[12].mxu1 %v521_v52  ;;  %859 = vmatprep.mubr.bf16.mxu0 %v524_v57  ;;  %v1148_v52 = vadd.f32 %v1147_v50, %v1076_v8  ;;  %v1084_v57 = vmul.f32 %v6844_v21, %v6844_v21  ;;  %v482_v8 = vld [vmem:[%s6507_s23 + $0x1b8] sm:$0xff]  ;;  %v1089_v38 = vmul.f32 %v478_v22, %v478_v22 }
  0x9e   : > { %956 = vmatprep.mubr.bf16.mxu1 %v526_v60  ;;  %v1143_v37 = vadd.f32 %v1142_v42, %v1072_v10  ;;  %v1080_v60 = vmul.f32 %v6855_v30, %v6855_v30  ;;  %v1093_v28 = vmul.f32 %v482_v8, %v482_v8  ;;  %v1100_v51 = vmul.f32 %v489_v3, %v489_v3 }
  0x9f   : > { %1140 = vadd.xlane.f32.xlu1 %v1139_v31  ;;  %v1149_v23 = vadd.f32 %v1148_v52, %v1077_v26  ;;  %v1158_v29 = vadd.f32 %v1157_v40, %v1084_v57  ;;  %v1168_v45 = vadd.f32 %v1167_v16, %v1092_v13  ;;  %v1163_v9 = vadd.f32 %v1162_v62, %v1088_v61  ;;  %v1024_v52 = vld [vmem:[#allocation3 + $0x10] sm:$0xff]  ;;  %v1031_v13 = vld [vmem:[#allocation3 + $0x48] sm:$0xff]  ;;  %v1030_v16 = vld [vmem:[#allocation3 + $0x40] sm:$0xff] }
  0xa0   : > { %1135 = vadd.xlane.f32.xlu0 %v1134_v53  ;;  %v1144_v49 = vadd.f32 %v1143_v37, %v1073_v27  ;;  %v1153_v11 = vadd.f32 %v1152_v39, %v1080_v60  ;;  %v1096_v46 = vmul.f32 %v485_v20, %v485_v20  ;;  %v1172_v54 = vadd.f32 %v1095_v48, %v1094_v58  ;;  %v1023_v37 = vld [vmem:[#allocation3 + $0x8] sm:$0xff] }
  0xa1   : > { %v1159_v44 = vadd.f32 %v1158_v29, %v1085_v41  ;;  %v534_v25 = vpack.c.bf16 %v482_v8, %v478_v22  ;;  %v1169_v50 = vadd.f32 %v1168_v45, %v1093_v28  ;;  %v1164_v43 = vadd.f32 %v1163_v9, %v1089_v38  ;;  %v1028_v41 = vld [vmem:[#allocation3 + $0x30] sm:$0xff]  ;;  %v1033_v22 = vld [vmem:[#allocation3 + $0x58] sm:$0xff] }
  0xa2   : > { %v1154_v7 = vadd.f32 %v1153_v11, %v1081_v47  ;;  %v1097_v26 = vmul.f32 %v486_v36, %v486_v36  ;;  %v1173_v27 = vadd.f32 %v1172_v54, %v1096_v46  ;;  %v536_v21 = vpack.c.bf16 %v6863_v2, %v6860_v59  ;;  %v1025_v2 = vld [vmem:[#allocation3 + $0x18] sm:$0xff]  ;;  %v1032_v8 = vld [vmem:[#allocation3 + $0x50] sm:$0xff] }
  0xa3   : > { %1150 = vadd.xlane.f32.xlu1 %v1149_v23  ;;  %v535_v30 = vpack.c.bf16 %v6876_v35, %v6873_v33  ;;  %v537_v31 = vpack.c.bf16 %v489_v3, %v485_v20  ;;  %v1026_v33 = vld [vmem:[#allocation3 + $0x20] sm:$0xff]  ;;  %v1035_v20 = vld [vmem:[#allocation3 + $0x68] sm:$0xff]  ;;  %v1037_v46 = vld [vmem:[#allocation3 + $0x78] sm:$0xff] }
  0xa4   : > { %860 = vmatmul.mubr.bf16.gmra.mrb[16].mxu0 %v523_v0  ;;  %v1177_v0 = vadd.f32 %v1099_v32, %v1098_v18  ;;  %1145 = vadd.xlane.f32.xlu0 %v1144_v49  ;;  %v1174_v15 = vadd.f32 %v1173_v27, %v1097_v26  ;;  %v1027_v32 = vld [vmem:[#allocation3 + $0x28] sm:$0xff]  ;;  %v1029_v18 = vld [vmem:[#allocation3 + $0x38] sm:$0xff]  ;;  %v1036_v54 = vld [vmem:[#allocation3 + $0x70] sm:$0xff] }
  0xa5   : > { %957 = vmatmul.mubr.bf16.gmra.mrb[16].mxu1 %v525_v4  ;;  %867 = vmatprep.mubr.bf16.mxu0 %v528_v5  ;;  %v532_v4 = vpack.c.bf16 %v6787_v19, %v6780_v14  ;;  %v490_v5 = vld [vmem:[%s6507_s23 + $0x1f8] sm:$0xff]  ;;  %v531_v14 = vpack.c.bf16 %v6827_v24, %v6803_v34  ;;  %v533_v19 = vpack.c.bf16 %v6881_v12, %v477_v63  ;;  %v1022_v24 = vld [vmem:[#allocation3] sm:$0xff] }
  0xa6   : > { %964 = vmatprep.mubr.bf16.mxu1 %v530_v1  ;;  %v1101_v10 = vmul.f32 %v490_v5, %v490_v5  ;;  %v1178_v17 = vadd.f32 %v1177_v0, %v1100_v51  ;;  %v538_v42 = vpack.c.bf16 %v490_v5, %v486_v36 }
  0xa7   : > { %1160 = vadd.xlane.f32.xlu1 %v1159_v44  ;;  %v1034_v44 = vld [vmem:[#allocation3 + $0x60] sm:$0xff] }
  0xa8   : > { %1155 = vadd.xlane.f32.xlu0 %v1154_v7  ;;  %v1179_v6 = vadd.f32 %v1178_v17, %v1101_v10 }
  0xab   : > { %1170 = vadd.xlane.f32.xlu1 %v1169_v50 }
  0xac   : > { %868 = vmatmul.mubr.bf16.gmra.mrb[20].mxu0 %v527_v55  ;;  %1165 = vadd.xlane.f32.xlu0 %v1164_v43 }
  0xad   : > { %965 = vmatmul.mubr.bf16.gmra.mrb[20].mxu1 %v529_v56  ;;  %875 = vmatprep.mubr.bf16.mxu0 %v532_v4 }
  0xae   : > { %972 = vmatprep.mubr.bf16.mxu1 %v534_v25 }
  0xaf   : > { %1180 = vadd.xlane.f32.xlu1 %v1179_v6 }
  0xb0   : > { %1175 = vadd.xlane.f32.xlu0 %v1174_v15  ;;  %v491_v15 = vld [vmem:[#allocation2] sm:$0xff] }
  0xb4   : > { %876 = vmatmul.mubr.bf16.gmra.mrb[24].mxu0 %v531_v14 }
  0xb5   : > { %973 = vmatmul.mubr.bf16.gmra.mrb[24].mxu1 %v533_v19  ;;  %883 = vmatprep.mubr.bf16.mxu0 %v536_v21 }
  0xb6   : > { %980 = vmatprep.mubr.bf16.mxu1 %v538_v42 }
  0xbc   : > { %884 = vmatmul.mubr.bf16.gmra.mrb[28].mxu0 %v535_v30  ;;  %v492_v30 = vld [vmem:[#allocation2 + $0x8] sm:$0xff] }
  0xbd   : > { %981 = vmatmul.mubr.bf16.gmra.mrb[28].mxu1 %v537_v31 }
 0x106   : > { %v1116_v34 = vpop.xlane.xlu1 %1115 }
 0x107   : > { %v1184_v57 = vadd.f32 %v1116_v34, %v1024_v52 }
 0x109   : > { %1201 = vst.msk [vmem:[#allocation3 + $0x10] sm:$0xff] %vm1198_vm2, %v1184_v57 }
 0x116   : > { %v1106_v53 = vpop.xlane.xlu0 %1105 }
 0x117   : > { %v1182_v59 = vadd.f32 %v1106_v53, %v1022_v24 }
 0x119   : > { %1199 = vst.msk [vmem:[#allocation3] sm:$0xff] %vm1198_vm2, %v1182_v59 }
 0x11b   : > { %v1111_v60 = vpop.xlane.xlu0 %1110 }
 0x11c   : > { %v1183_v48 = vadd.f32 %v1111_v60, %v1023_v37 }
 0x11e   : > { %1200 = vst.msk [vmem:[#allocation3 + $0x8] sm:$0xff] %vm1198_vm2, %v1183_v48  ;;  %v493_v48 = vld [vmem:[#allocation2 + $0x10] sm:$0xff] }
 0x121   : > { %v1121_v40 = vpop.xlane.xlu1 %1120 }
 0x122   : > { %v1185_v1 = vadd.f32 %v1121_v40, %v1025_v2 }
 0x124   : > { %1202 = vst.msk [vmem:[#allocation3 + $0x18] sm:$0xff] %vm1198_vm2, %v1185_v1 }
 0x128   : > { %v1131_v35 = vpop.xlane.xlu1 %1130 }
 0x129   : > { %v1187_v39 = vadd.f32 %v1131_v35, %v1027_v32  ;;  %v1126_v12 = vpop.xlane.xlu0 %1125 }
 0x12a   : > { %v1186_v58 = vadd.f32 %v1126_v12, %v1026_v33  ;;  %v494_v12 = vld [vmem:[#allocation2 + $0x18] sm:$0xff] }
 0x12b   : > { %1204 = vst.msk [vmem:[#allocation3 + $0x28] sm:$0xff] %vm1198_vm2, %v1187_v39 }
 0x12c   : > { %1203 = vst.msk [vmem:[#allocation3 + $0x20] sm:$0xff] %vm1198_vm2, %v1186_v58  ;;  %v1141_v47 = vpop.xlane.xlu1 %1140 }
 0x12d   : > { %v1189_v63 = vadd.f32 %v1141_v47, %v1029_v18  ;;  %v1136_v23 = vpop.xlane.xlu0 %1135 }
 0x12e   : > { %v1188_v29 = vadd.f32 %v1136_v23, %v1028_v41 }
 0x12f   : > { %1206 = vst.msk [vmem:[#allocation3 + $0x38] sm:$0xff] %vm1198_vm2, %v1189_v63 }
 0x130   : > { %1205 = vst.msk [vmem:[#allocation3 + $0x30] sm:$0xff] %vm1198_vm2, %v1188_v29  ;;  %v1151_v49 = vpop.xlane.xlu1 %1150 }
 0x131   : > { %v1191_v11 = vadd.f32 %v1151_v49, %v1031_v13  ;;  %v1146_v61 = vpop.xlane.xlu0 %1145 }
 0x132   : > { %v1190_v62 = vadd.f32 %v1146_v61, %v1030_v16 }
 0x133   : > { %1208 = vst.msk [vmem:[#allocation3 + $0x48] sm:$0xff] %vm1198_vm2, %v1191_v11 }
 0x134   : > { %1207 = vst.msk [vmem:[#allocation3 + $0x40] sm:$0xff] %vm1198_vm2, %v1190_v62  ;;  %v1161_v3 = vpop.xlane.xlu1 %1160  ;;  %v495_v62 = vld [vmem:[#allocation2 + $0x20] sm:$0xff] }
 0x135   : > { %v1193_v28 = vadd.f32 %v1161_v3, %v1033_v22  ;;  %v1156_v38 = vpop.xlane.xlu0 %1155 }
 0x136   : > { %v1192_v51 = vadd.f32 %v1156_v38, %v1032_v8  ;;  %v496_v38 = vld [vmem:[#allocation2 + $0x28] sm:$0xff] }
 0x137   : > { %1210 = vst.msk [vmem:[#allocation3 + $0x58] sm:$0xff] %vm1198_vm2, %v1193_v28 }
 0x138   : > { %1209 = vst.msk [vmem:[#allocation3 + $0x50] sm:$0xff] %vm1198_vm2, %v1192_v51  ;;  %v1171_v45 = vpop.xlane.xlu1 %1170 }
 0x139   : > { %v1195_v0 = vadd.f32 %v1171_v45, %v1035_v20  ;;  %v1166_v7 = vpop.xlane.xlu0 %1165 }
 0x13a   : > { %v1194_v9 = vadd.f32 %v1166_v7, %v1034_v44 }
 0x13b   : > { %1212 = vst.msk [vmem:[#allocation3 + $0x68] sm:$0xff] %vm1198_vm2, %v1195_v0 }
 0x13c   : > { %1211 = vst.msk [vmem:[#allocation3 + $0x60] sm:$0xff] %vm1198_vm2, %v1194_v9  ;;  %v1181_v55 = vpop.xlane.xlu1 %1180 }
 0x13d   : > { %v1197_v56 = vadd.f32 %v1181_v55, %v1037_v46  ;;  %v1176_v4 = vpop.xlane.xlu0 %1175 }
 0x13e   : > { %v1196_v5 = vadd.f32 %v1176_v4, %v1036_v54 }
 0x13f   : > { %1214 = vst.msk [vmem:[#allocation3 + $0x78] sm:$0xff] %vm1198_vm2, %v1197_v56 }
 0x140   : > { %1213 = vst.msk [vmem:[#allocation3 + $0x70] sm:$0xff] %vm1198_vm2, %v1196_v5  ;;  %v497_v5 = vld [vmem:[#allocation2 + $0x30] sm:$0xff] }
 0x157   : > { %v5086_v25 = vpop.f32.mrb[0].mxu0 }
 0x158   : > { %v5150_v36 = vpop.f32.mrb[0].mxu1  ;;  %v5087_v50 = vpop.f32.mrb[1].mxu0 }
 0x159   : > { %v5088_v10 = vadd.f32 %v5087_v50, %v5086_v25  ;;  %v5151_v17 = vpop.f32.mrb[1].mxu1  ;;  %v5089_v43 = vpop.f32.mrb[2].mxu0 }
 0x15a   : > { %v5152_v26 = vadd.f32 %v5151_v17, %v5150_v36  ;;  %v5153_v27 = vpop.f32.mrb[2].mxu1  ;;  %v5090_v6 = vpop.f32.mrb[3].mxu0  ;;  %v498_v17 = vld [vmem:[#allocation2 + $0x38] sm:$0xff] }
 0x15b   : > { %v5091_v14 = vadd.f32 %v5090_v6, %v5089_v43  ;;  %v5154_v19 = vpop.f32.mrb[3].mxu1 }
 0x15c   : > { %v927_v21 = vadd.f32 %v5152_v26, %v5088_v10  ;;  %v5155_v42 = vadd.f32 %v5154_v19, %v5153_v27 }
 0x15e   : > { %v989_v31 = vadd.f32 %v927_v21, %v491_v15  ;;  %v930_v52 = vadd.f32 %v5155_v42, %v5091_v14 }
 0x15f   : > { %v5092_v34 = vpop.f32.mrb[4].mxu0 }
 0x160   : > { %1006 = vst.msk [vmem:[#allocation2] sm:$0xff] %vm1005_vm3, %v989_v31  ;;  %v990_v24 = vadd.f32 %v930_v52, %v492_v30  ;;  %v5156_v57 = vpop.f32.mrb[4].mxu1  ;;  %v5093_v53 = vpop.f32.mrb[5].mxu0 }
 0x161   : > { %v5094_v59 = vadd.f32 %v5093_v53, %v5092_v34  ;;  %v5157_v2 = vpop.f32.mrb[5].mxu1  ;;  %v5095_v37 = vpop.f32.mrb[6].mxu0  ;;  %v499_v34 = vld [vmem:[#allocation2 + $0x40] sm:$0xff] }
 0x162   : > { %1007 = vst.msk [vmem:[#allocation2 + $0x8] sm:$0xff] %vm1005_vm3, %v990_v24  ;;  %v5158_v40 = vadd.f32 %v5157_v2, %v5156_v57  ;;  %v5159_v60 = vpop.f32.mrb[6].mxu1  ;;  %v5096_v1 = vpop.f32.mrb[7].mxu0  ;;  %v500_v2 = vld [vmem:[#allocation2 + $0x48] sm:$0xff] }
 0x163   : > { %v5097_v32 = vadd.f32 %v5096_v1, %v5095_v37  ;;  %v5160_v33 = vpop.f32.mrb[7].mxu1 }
 0x164   : > { %v935_v35 = vadd.f32 %v5158_v40, %v5094_v59  ;;  %v5161_v39 = vadd.f32 %v5160_v33, %v5159_v60 }
 0x166   : > { %v991_v58 = vadd.f32 %v935_v35, %v493_v48  ;;  %v938_v18 = vadd.f32 %v5161_v39, %v5097_v32 }
 0x167   : > { %v5098_v41 = vpop.f32.mrb[8].mxu0 }
 0x168   : > { %1008 = vst.msk [vmem:[#allocation2 + $0x10] sm:$0xff] %vm1005_vm3, %v991_v58  ;;  %v992_v47 = vadd.f32 %v938_v18, %v494_v12  ;;  %v5162_v63 = vpop.f32.mrb[8].mxu1  ;;  %v5099_v23 = vpop.f32.mrb[9].mxu0 }
 0x169   : > { %v5100_v29 = vadd.f32 %v5099_v23, %v5098_v41  ;;  %v5163_v13 = vpop.f32.mrb[9].mxu1  ;;  %v5101_v16 = vpop.f32.mrb[10].mxu0  ;;  %v501_v41 = vld [vmem:[#allocation2 + $0x50] sm:$0xff] }
 0x16a   : > { %1009 = vst.msk [vmem:[#allocation2 + $0x18] sm:$0xff] %vm1005_vm3, %v992_v47  ;;  %v5164_v49 = vadd.f32 %v5163_v13, %v5162_v63  ;;  %v5165_v11 = vpop.f32.mrb[10].mxu1  ;;  %v5102_v61 = vpop.f32.mrb[11].mxu0  ;;  %v502_v13 = vld [vmem:[#allocation2 + $0x58] sm:$0xff] }
 0x16b   : > { %v5103_v22 = vadd.f32 %v5102_v61, %v5101_v16  ;;  %v5166_v8 = vpop.f32.mrb[11].mxu1 }
 0x16c   : > { %v943_v3 = vadd.f32 %v5164_v49, %v5100_v29  ;;  %v5167_v28 = vadd.f32 %v5166_v8, %v5165_v11 }
 0x16e   : > { %v993_v51 = vadd.f32 %v943_v3, %v495_v62  ;;  %v946_v20 = vadd.f32 %v5167_v28, %v5103_v22 }
 0x16f   : > { %v5104_v44 = vpop.f32.mrb[12].mxu0 }
 0x170   : > { %1010 = vst.msk [vmem:[#allocation2 + $0x20] sm:$0xff] %vm1005_vm3, %v993_v51  ;;  %v994_v45 = vadd.f32 %v946_v20, %v496_v38  ;;  %v5168_v0 = vpop.f32.mrb[12].mxu1  ;;  %v5105_v7 = vpop.f32.mrb[13].mxu0 }
 0x171   : > { %v5106_v9 = vadd.f32 %v5105_v7, %v5104_v44  ;;  %v5169_v46 = vpop.f32.mrb[13].mxu1  ;;  %v5107_v54 = vpop.f32.mrb[14].mxu0  ;;  %v503_v44 = vld [vmem:[#allocation2 + $0x60] sm:$0xff] }
 0x172   : > { %1011 = vst.msk [vmem:[#allocation2 + $0x28] sm:$0xff] %vm1005_vm3, %v994_v45  ;;  %v5170_v55 = vadd.f32 %v5169_v46, %v5168_v0  ;;  %v5171_v56 = vpop.f32.mrb[14].mxu1  ;;  %v5108_v4 = vpop.f32.mrb[15].mxu0  ;;  %v504_v46 = vld [vmem:[#allocation2 + $0x68] sm:$0xff] }
 0x173   : > { %v5109_v25 = vadd.f32 %v5108_v4, %v5107_v54  ;;  %v5172_v36 = vpop.f32.mrb[15].mxu1 }
 0x174   : > { %v951_v50 = vadd.f32 %v5170_v55, %v5106_v9  ;;  %v5173_v10 = vadd.f32 %v5172_v36, %v5171_v56 }
 0x176   : > { %v995_v43 = vadd.f32 %v951_v50, %v497_v5  ;;  %v954_v26 = vadd.f32 %v5173_v10, %v5109_v25 }
 0x177   : > { %v5110_v27 = vpop.f32.mrb[16].mxu0 }
 0x178   : > { %1012 = vst.msk [vmem:[#allocation2 + $0x30] sm:$0xff] %vm1005_vm3, %v995_v43  ;;  %v996_v6 = vadd.f32 %v954_v26, %v498_v17  ;;  %v5174_v15 = vpop.f32.mrb[16].mxu1  ;;  %v5111_v14 = vpop.f32.mrb[17].mxu0 }
 0x179   : > { %v5112_v19 = vadd.f32 %v5111_v14, %v5110_v27  ;;  %v5175_v21 = vpop.f32.mrb[17].mxu1  ;;  %v5113_v42 = vpop.f32.mrb[18].mxu0  ;;  %v505_v27 = vld [vmem:[#allocation2 + $0x70] sm:$0xff] }
 0x17a   : > { %1013 = vst.msk [vmem:[#allocation2 + $0x38] sm:$0xff] %vm1005_vm3, %v996_v6  ;;  %v5176_v30 = vadd.f32 %v5175_v21, %v5174_v15  ;;  %v5177_v31 = vpop.f32.mrb[18].mxu1  ;;  %v5114_v52 = vpop.f32.mrb[19].mxu0  ;;  %v506_v21 = vld [vmem:[#allocation2 + $0x78] sm:$0xff] }
 0x17b   : > { %v5178_v24 = vpop.f32.mrb[19].mxu1  ;;  %v5115_v57 = vadd.f32 %v5114_v52, %v5113_v42 }
 0x17c   : > { %v959_v53 = vadd.f32 %v5176_v30, %v5112_v19  ;;  %v5179_v59 = vadd.f32 %v5178_v24, %v5177_v31 }
 0x17e   : > { %v997_v37 = vadd.f32 %v959_v53, %v499_v34  ;;  %v962_v40 = vadd.f32 %v5179_v59, %v5115_v57 }
 0x17f   : > { %v5116_v60 = vpop.f32.mrb[20].mxu0 }
 0x180   : > { %1014 = vst.msk [vmem:[#allocation2 + $0x40] sm:$0xff] %vm1005_vm3, %v997_v37  ;;  %v998_v1 = vadd.f32 %v962_v40, %v500_v2  ;;  %v5180_v48 = vpop.f32.mrb[20].mxu1  ;;  %v5117_v32 = vpop.f32.mrb[21].mxu0 }
 0x181   : > { %v5118_v33 = vadd.f32 %v5117_v32, %v5116_v60  ;;  %v5181_v35 = vpop.f32.mrb[21].mxu1  ;;  %v5119_v39 = vpop.f32.mrb[22].mxu0 }
 0x182   : > { %1015 = vst.msk [vmem:[#allocation2 + $0x48] sm:$0xff] %vm1005_vm3, %v998_v1  ;;  %v5182_v12 = vadd.f32 %v5181_v35, %v5180_v48  ;;  %v5183_v58 = vpop.f32.mrb[22].mxu1  ;;  %v5120_v18 = vpop.f32.mrb[23].mxu0 }
 0x183   : > { %v5184_v47 = vpop.f32.mrb[23].mxu1  ;;  %v5121_v63 = vadd.f32 %v5120_v18, %v5119_v39 }
 0x184   : > { %v967_v23 = vadd.f32 %v5182_v12, %v5118_v33  ;;  %v5185_v29 = vadd.f32 %v5184_v47, %v5183_v58 }
 0x186   : > { %v999_v16 = vadd.f32 %v967_v23, %v501_v41  ;;  %v970_v49 = vadd.f32 %v5185_v29, %v5121_v63 }
 0x187   : > { %v5122_v11 = vpop.f32.mrb[24].mxu0 }
 0x188   : > { %1016 = vst.msk [vmem:[#allocation2 + $0x50] sm:$0xff] %vm1005_vm3, %v999_v16  ;;  %v1000_v61 = vadd.f32 %v970_v49, %v502_v13  ;;  %v5186_v62 = vpop.f32.mrb[24].mxu1  ;;  %v5123_v22 = vpop.f32.mrb[25].mxu0 }
 0x189   : > { %v5124_v8 = vadd.f32 %v5123_v22, %v5122_v11  ;;  %v5187_v3 = vpop.f32.mrb[25].mxu1  ;;  %v5125_v28 = vpop.f32.mrb[26].mxu0 }
 0x18a   : > { %1017 = vst.msk [vmem:[#allocation2 + $0x58] sm:$0xff] %vm1005_vm3, %v1000_v61  ;;  %v5188_v38 = vadd.f32 %v5187_v3, %v5186_v62  ;;  %v5189_v51 = vpop.f32.mrb[26].mxu1  ;;  %v5126_v20 = vpop.f32.mrb[27].mxu0 }
 0x18b   : > { %v5190_v45 = vpop.f32.mrb[27].mxu1  ;;  %v5127_v0 = vadd.f32 %v5126_v20, %v5125_v28 }
 0x18c   : > { %v975_v7 = vadd.f32 %v5188_v38, %v5124_v8  ;;  %v5191_v9 = vadd.f32 %v5190_v45, %v5189_v51 }
 0x18e   : > { %v1001_v54 = vadd.f32 %v975_v7, %v503_v44  ;;  %v978_v55 = vadd.f32 %v5191_v9, %v5127_v0 }
 0x18f   : > { %v5128_v56 = vpop.f32.mrb[28].mxu0 }
 0x190   : > { %1018 = vst.msk [vmem:[#allocation2 + $0x60] sm:$0xff] %vm1005_vm3, %v1001_v54  ;;  %v1002_v4 = vadd.f32 %v978_v55, %v504_v46  ;;  %v5192_v5 = vpop.f32.mrb[28].mxu1  ;;  %v5129_v25 = vpop.f32.mrb[29].mxu0 }
 0x191   : > { %v5130_v36 = vadd.f32 %v5129_v25, %v5128_v56  ;;  %v5193_v50 = vpop.f32.mrb[29].mxu1  ;;  %v5131_v10 = vpop.f32.mrb[30].mxu0 }
 0x192   : > { %1019 = vst.msk [vmem:[#allocation2 + $0x68] sm:$0xff] %vm1005_vm3, %v1002_v4  ;;  %v5194_v17 = vadd.f32 %v5193_v50, %v5192_v5  ;;  %v5195_v43 = vpop.f32.mrb[30].mxu1  ;;  %v5132_v26 = vpop.f32.mrb[31].mxu0 }
 0x193   : > { %v5196_v6 = vpop.f32.mrb[31].mxu1  ;;  %v5133_v15 = vadd.f32 %v5132_v26, %v5131_v10 }
 0x194   : > { %v983_v14 = vadd.f32 %v5194_v17, %v5130_v36  ;;  %v5197_v19 = vadd.f32 %v5196_v6, %v5195_v43  ;;  %1218 = sbr.rel (%p4902_p4) target bundleno = 3536 (0xdd0), region = 64 }
 0x196   : > { %v1003_v42 = vadd.f32 %v983_v14, %v505_v27  ;;  %v986_v30 = vadd.f32 %v5197_v19, %v5133_v15 }
 0x198   : > { %1020 = vst.msk [vmem:[#allocation2 + $0x70] sm:$0xff] %vm1005_vm3, %v1003_v42  ;;  %v1004_v31 = vadd.f32 %v986_v30, %v506_v21 }
 0x19a   : > { %1021 = vst.msk [vmem:[#allocation2 + $0x78] sm:$0xff] %vm1005_vm3, %v1004_v31 }
 0x19b   : > { %v1221_v52 = vld [vmem:[#allocation3 + $0x10] sm:$0xff]  ;;  %v1219_v34 = vld [vmem:[#allocation3] sm:$0xff]  ;;  %v1222_v24 = vld [vmem:[#allocation3 + $0x18] sm:$0xff]  ;;  %v6310_v57 = vmov 0   ;;  %s9647_s24 = sld [smem:[#allocation29_spill]]  ;;  %s9648_s20 = sld [smem:[#allocation28_spill]] }
 0x19c   : > { %5460 = vset.pattern.permute.xlu1 %v6310_v57  ;;  %5459 = vset.pattern.permute.xlu0 %v6310_v57  ;;  %v1237_v53 = vmax.f32 %v1221_v52, 1e-24  ;;  %v1235_v59 = vmax.f32 %v1219_v34, 1e-24  ;;  %v1238_v2 = vmax.f32 %v1222_v24, 1e-24 }
 0x19d   : > { %v1220_v37 = vld [vmem:[#allocation3 + $0x8] sm:$0xff]  ;;  %v1223_v1 = vld [vmem:[#allocation3 + $0x20] sm:$0xff]  ;;  %v1226_v33 = vld [vmem:[#allocation3 + $0x38] sm:$0xff] }
 0x19e   : > { %v1224_v40 = vld [vmem:[#allocation3 + $0x28] sm:$0xff]  ;;  %5475 = vrsqrt.f32 %v1237_v53  ;;  %v1236_v60 = vmax.f32 %v1220_v37, 1e-24  ;;  %v1239_v32 = vmax.f32 %v1223_v1, 1e-24  ;;  %v1225_v35 = vld [vmem:[#allocation3 + $0x30] sm:$0xff] }
 0x19f   : > { %5477 = vrsqrt.f32 %v1235_v59  ;;  %v1240_v48 = vmax.f32 %v1224_v40, 1e-24  ;;  %v1228_v39 = vld [vmem:[#allocation3 + $0x48] sm:$0xff]  ;;  %v1242_v12 = vmax.f32 %v1226_v33, 1e-24  ;;  %v1227_v41 = vld [vmem:[#allocation3 + $0x40] sm:$0xff] }
 0x1a0   : > { %5479 = vrsqrt.f32 %v1238_v2  ;;  %v1241_v58 = vmax.f32 %v1225_v35, 1e-24  ;;  %v1244_v18 = vmax.f32 %v1228_v39, 1e-24  ;;  %v1230_v47 = vld [vmem:[#allocation3 + $0x58] sm:$0xff]  ;;  %v1229_v23 = vld [vmem:[#allocation3 + $0x50] sm:$0xff] }
 0x1a1   : > { %5481 = vrsqrt.f32 %v1236_v60  ;;  %v1243_v13 = vmax.f32 %v1227_v41, 1e-24  ;;  %v1246_v11 = vmax.f32 %v1230_v47, 1e-24  ;;  %v1245_v61 = vmax.f32 %v1229_v23, 1e-24 }
 0x1a2   : > { %5483 = vrsqrt.f32 %v1240_v48  ;;  %v1232_v62 = vld [vmem:[#allocation3 + $0x68] sm:$0xff]  ;;  %v1231_v8 = vld [vmem:[#allocation3 + $0x60] sm:$0xff]  ;;  %v1234_v51 = vld [vmem:[#allocation3 + $0x78] sm:$0xff] }
 0x1a3   : > { %5485 = vrsqrt.f32 %v1239_v32  ;;  %v1248_v28 = vmax.f32 %v1232_v62, 1e-24  ;;  %v1247_v38 = vmax.f32 %v1231_v8, 1e-24  ;;  %v1233_v44 = vld [vmem:[#allocation3 + $0x70] sm:$0xff]  ;;  %v1267_v50 = vld [vmem:[#allocation2] sm:$0xff] }
 0x1a4   : > { %5487 = vrsqrt.f32 %v1242_v12  ;;  %v1250_v0 = vmax.f32 %v1234_v51, 1e-24  ;;  %v1249_v7 = vmax.f32 %v1233_v44, 1e-24  ;;  %v1269_v36 = vld [vmem:[#allocation2 + $0x10] sm:$0xff]  ;;  %v1270_v6 = vld [vmem:[#allocation2 + $0x18] sm:$0xff] }
 0x1a5   : > { %5489 = vrsqrt.f32 %v1241_v58  ;;  %v6959_v10 = vld [vmem:[%s9607_s4] ss:$0 sm:$0xff]  ;;  %v1268_v14 = vld [vmem:[#allocation2 + $0x8] sm:$0xff]  ;;  %v1274_v33 = vld [vmem:[#allocation2 + $0x38] sm:$0xff] }
 0x1a6   : > { %5491 = vrsqrt.f32 %v1244_v18  ;;  %v1272_v24 = vld [vmem:[#allocation2 + $0x28] sm:$0xff]  ;;  %v1271_v59 = vld [vmem:[#allocation2 + $0x20] sm:$0xff]  ;;  %v1273_v39 = vld [vmem:[#allocation2 + $0x30] sm:$0xff] }
 0x1a7   : > { %5493 = vrsqrt.f32 %v1243_v13 }
 0x1a8   : > { %v5476_v63 = vpop.eup %5475  ;;  %5495 = vrsqrt.f32 %v1246_v11 }
 0x1a9   : > { %v5478_v29 = vpop.eup %5477  ;;  %1295 = vperm.xlu1 %5460, %v5476_v63   ;;  %5497 = vrsqrt.f32 %v1245_v61 }
 0x1aa   : > { %v5480_v16 = vpop.eup %5479  ;;  %1285 = vperm.xlu0 %5459, %v5478_v29   ;;  %5499 = vrsqrt.f32 %v1248_v28  ;;  %v1276_v29 = vld [vmem:[#allocation2 + $0x48] sm:$0xff] }
 0x1ab   : > { %v5482_v49 = vpop.eup %5481  ;;  %5501 = vrsqrt.f32 %v1247_v38 }
 0x1ac   : > { %v5484_v22 = vpop.eup %5483  ;;  %5503 = vrsqrt.f32 %v1250_v0  ;;  %v1277_v0 = vld [vmem:[#allocation2 + $0x50] sm:$0xff] }
 0x1ad   : > { %1300 = vperm.xlu1 %5460, %v5480_v16   ;;  %v5486_v3 = vpop.eup %5485  ;;  %5505 = vrsqrt.f32 %v1249_v7  ;;  %v1275_v16 = vld [vmem:[#allocation2 + $0x40] sm:$0xff] }
 0x1ae   : > { %1290 = vperm.xlu0 %5459, %v5482_v49   ;;  %v5488_v20 = vpop.eup %5487 }
 0x1af   : > { %v5490_v45 = vpop.eup %5489 }
 0x1b0   : > { %v5492_v9 = vpop.eup %5491 }
 0x1b1   : > { %1310 = vperm.xlu1 %5460, %v5484_v22   ;;  %v5494_v46 = vpop.eup %5493 }
 0x1b2   : > { %1305 = vperm.xlu0 %5459, %v5486_v3   ;;  %v5496_v54 = vpop.eup %5495 }
 0x1b3   : > { %v5498_v55 = vpop.eup %5497 }
 0x1b4   : > { %v5500_v56 = vpop.eup %5499 }
 0x1b5   : > { %1320 = vperm.xlu1 %5460, %v5488_v20   ;;  %v5502_v4 = vpop.eup %5501  ;;  %v1278_v20 = vld [vmem:[#allocation2 + $0x58] sm:$0xff] }
 0x1b6   : > { %1315 = vperm.xlu0 %5459, %v5490_v45   ;;  %v5504_v5 = vpop.eup %5503 }
 0x1b7   : > { %v5506_v25 = vpop.eup %5505 }
 0x1b9   : > { %1330 = vperm.xlu1 %5460, %v5492_v9  }
 0x1ba   : > { %1325 = vperm.xlu0 %5459, %v5494_v46  }
 0x1bd   : > { %1340 = vperm.xlu1 %5460, %v5496_v54  }
 0x1be   : > { %1335 = vperm.xlu0 %5459, %v5498_v55  }
 0x1c1   : > { %1350 = vperm.xlu1 %5460, %v5500_v56  }
 0x1c2   : > { %1345 = vperm.xlu0 %5459, %v5502_v4  }
 0x1c5   : > { %1360 = vperm.xlu1 %5460, %v5504_v5  }
 0x1c6   : > { %1355 = vperm.xlu0 %5459, %v5506_v25  }
 0x228   : > { %v1296_v17 = vpop.permute.xlu1 %1295 }
 0x229   : > { %v1365_v43 = vmul.f32 %v1296_v17, %v1269_v36  ;;  %v1286_v26 = vpop.permute.xlu0 %1285 }
 0x22a   : > { %v1363_v27 = vmul.f32 %v1286_v26, %v1267_v50  ;;  %v1280_v50 = vld [vmem:[#allocation2 + $0x68] sm:$0xff]  ;;  %v1279_v26 = vld [vmem:[#allocation2 + $0x60] sm:$0xff] }
 0x22b   : > { %v6962_v15 = vadd.f32 %v6959_v10, %v1365_v43 }
 0x22c   : > { %v6965_v19 = vadd.f32 %v6959_v10, %v1363_v27  ;;  %v1301_v21 = vpop.permute.xlu1 %1300 }
 0x22d   : > { %v4906_v42 = vmul.f32 -1.442695, %v6962_v15  ;;  %v1366_v30 = vmul.f32 %v1301_v21, %v1270_v6  ;;  %v1291_v31 = vpop.permute.xlu0 %1290 }
 0x22e   : > { %v4904_v52 = vmul.f32 -1.442695, %v6965_v19  ;;  %v1364_v34 = vmul.f32 %v1291_v31, %v1268_v14 }
 0x22f   : > { %5507 = vpow2.f32 %v4906_v42  ;;  %v6970_v53 = vadd.f32 %v6959_v10, %v1366_v30 }
 0x230   : > { %5509 = vpow2.f32 %v4904_v52  ;;  %v6973_v2 = vadd.f32 %v6959_v10, %v1364_v34  ;;  %v1311_v37 = vpop.permute.xlu1 %1310 }
 0x231   : > { %v4907_v40 = vmul.f32 -1.442695, %v6970_v53  ;;  %v1368_v60 = vmul.f32 %v1311_v37, %v1272_v24  ;;  %v1306_v1 = vpop.permute.xlu0 %1305 }
 0x232   : > { %v4905_v48 = vmul.f32 -1.442695, %v6973_v2  ;;  %v1367_v32 = vmul.f32 %v1306_v1, %v1271_v59  ;;  %v1282_v59 = vld [vmem:[#allocation2 + $0x78] sm:$0xff] }
 0x233   : > { %5511 = vpow2.f32 %v4907_v40  ;;  %v6978_v35 = vadd.f32 %v6959_v10, %v1368_v60  ;;  %v1281_v60 = vld [vmem:[#allocation2 + $0x70] sm:$0xff] }
 0x234   : > { %5513 = vpow2.f32 %v4905_v48  ;;  %v6981_v12 = vadd.f32 %v6959_v10, %v1367_v32  ;;  %v1321_v58 = vpop.permute.xlu1 %1320 }
 0x235   : > { %v4909_v18 = vmul.f32 -1.442695, %v6978_v35  ;;  %v1370_v41 = vmul.f32 %v1321_v58, %v1274_v33  ;;  %v1316_v47 = vpop.permute.xlu0 %1315 }
 0x236   : > { %v4908_v63 = vmul.f32 -1.442695, %v6981_v12  ;;  %v1369_v23 = vmul.f32 %v1316_v47, %v1273_v39 }
 0x237   : > { %5515 = vpow2.f32 %v4909_v18  ;;  %v6986_v13 = vadd.f32 %v6959_v10, %v1370_v41 }
 0x238   : > { %5517 = vpow2.f32 %v4908_v63  ;;  %v6989_v49 = vadd.f32 %v6959_v10, %v1369_v23  ;;  %v1331_v11 = vpop.permute.xlu1 %1330 }
 0x239   : > { %v5508_v61 = vpop.eup %5507  ;;  %v4911_v62 = vmul.f32 -1.442695, %v6986_v13  ;;  %v1372_v22 = vmul.f32 %v1331_v11, %v1276_v29  ;;  %v1326_v8 = vpop.permute.xlu0 %1325 }
 0x23a   : > { %v5510_v3 = vpop.eup %5509  ;;  %v1450_v28 = vadd.f32 1.0, %v5508_v61  ;;  %v4910_v38 = vmul.f32 -1.442695, %v6989_v49  ;;  %v1371_v51 = vmul.f32 %v1326_v8, %v1275_v16 }
 0x23b   : > { %v1448_v44 = vadd.f32 1.0, %v5510_v3  ;;  %5519 = vpow2.f32 %v4911_v62  ;;  %v6994_v45 = vadd.f32 %v6959_v10, %v1372_v22 }
 0x23c   : > { %5521 = vrcp.f32 %v1450_v28  ;;  %v6997_v7 = vadd.f32 %v6959_v10, %v1371_v51  ;;  %v1341_v9 = vpop.permute.xlu1 %1340 }
 0x23d   : > { %v5512_v46 = vpop.eup %5511  ;;  %5523 = vrcp.f32 %v1448_v44  ;;  %v4913_v54 = vmul.f32 -1.442695, %v6994_v45  ;;  %v1374_v55 = vmul.f32 %v1341_v9, %v1278_v20  ;;  %v1336_v56 = vpop.permute.xlu0 %1335 }
 0x23e   : > { %v5514_v4 = vpop.eup %5513  ;;  %v1451_v5 = vadd.f32 1.0, %v5512_v46  ;;  %5525 = vpow2.f32 %v4910_v38  ;;  %v4912_v25 = vmul.f32 -1.442695, %v6997_v7  ;;  %v1373_v36 = vmul.f32 %v1336_v56, %v1277_v0 }
 0x23f   : > { %v1449_v17 = vadd.f32 1.0, %v5514_v4  ;;  %5527 = vpow2.f32 %v4913_v54  ;;  %v7002_v43 = vadd.f32 %v6959_v10, %v1374_v55 }
 0x240   : > { %5529 = vrcp.f32 %v1451_v5  ;;  %v7005_v27 = vadd.f32 %v6959_v10, %v1373_v36  ;;  %v1351_v6 = vpop.permute.xlu1 %1350 }
 0x241   : > { %v5516_v14 = vpop.eup %5515  ;;  %5531 = vrcp.f32 %v1449_v17  ;;  %v4915_v21 = vmul.f32 -1.442695, %v7002_v43  ;;  %v1376_v42 = vmul.f32 %v1351_v6, %v1280_v50  ;;  %v1346_v30 = vpop.permute.xlu0 %1345 }
 0x242   : > { %v5518_v31 = vpop.eup %5517  ;;  %v1453_v52 = vadd.f32 1.0, %v5516_v14  ;;  %5533 = vpow2.f32 %v4912_v25  ;;  %v4914_v34 = vmul.f32 -1.442695, %v7005_v27  ;;  %v1375_v24 = vmul.f32 %v1346_v30, %v1279_v26 }
 0x243   : > { %v1452_v37 = vadd.f32 1.0, %v5518_v31  ;;  %5535 = vpow2.f32 %v4915_v21  ;;  %v7010_v40 = vadd.f32 %v6959_v10, %v1376_v42 }
 0x244   : > { %5537 = vrcp.f32 %v1453_v52  ;;  %v7013_v1 = vadd.f32 %v6959_v10, %v1375_v24  ;;  %v1361_v48 = vpop.permute.xlu1 %1360 }
 0x245   : > { %v5520_v32 = vpop.eup %5519  ;;  %5539 = vrcp.f32 %v1452_v37  ;;  %v4917_v33 = vmul.f32 -1.442695, %v7010_v40  ;;  %v1378_v39 = vmul.f32 %v1361_v48, %v1282_v59  ;;  %v1356_v58 = vpop.permute.xlu0 %1355 }
 0x246   : > { %v5522_v18 = vpop.eup %5521  ;;  %v1455_v41 = vadd.f32 1.0, %v5520_v32  ;;  %5541 = vpow2.f32 %v4914_v34  ;;  %v4916_v47 = vmul.f32 -1.442695, %v7013_v1  ;;  %v1377_v63 = vmul.f32 %v1356_v58, %v1281_v60 }
 0x247   : > { %v5524_v23 = vpop.eup %5523  ;;  %5543 = vpow2.f32 %v4917_v33  ;;  %v7018_v29 = vadd.f32 %v6959_v10, %v1378_v39  ;;  %v7028_v3 = vmul.f32 %v5522_v18, %v6962_v15 }
 0x248   : > { %v5526_v16 = vpop.eup %5525  ;;  %5545 = vrcp.f32 %v1455_v41  ;;  %v7021_v11 = vadd.f32 %v6959_v10, %v1377_v63  ;;  %v7024_v61 = vmul.f32 %v5524_v23, %v6965_v19 }
 0x249   : > { %v5528_v62 = vpop.eup %5527  ;;  %v1454_v22 = vadd.f32 1.0, %v5526_v16  ;;  %5547 = vpow2.f32 %v4916_v47  ;;  %v4919_v8 = vmul.f32 -1.442695, %v7018_v29  ;;  %v1520_v15 = vsel %vm1005_vm3, %v7028_v3, 0.0 }
 0x24a   : > { %v5530_v28 = vpop.eup %5529  ;;  %v1457_v38 = vadd.f32 1.0, %v5528_v62  ;;  %v4918_v51 = vmul.f32 -1.442695, %v7021_v11  ;;  %v1514_v20 = vsel %vm1005_vm3, %v7024_v61, 0.0 }
 0x24b   : > { %v5532_v10 = vpop.eup %5531  ;;  %5549 = vrcp.f32 %v1454_v22  ;;  %1515 = vadd.xlane.f32.xlu0 %v1514_v20  ;;  %v7041_v56 = vmul.f32 %v5530_v28, %v6970_v53 }
 0x24c   : > { %v5534_v19 = vpop.eup %5533  ;;  %5551 = vrcp.f32 %v1457_v38  ;;  %v7034_v44 = vmul.f32 %v5532_v10, %v6973_v2 }
 0x24d   : > { %v5536_v0 = vpop.eup %5535  ;;  %v1456_v9 = vadd.f32 1.0, %v5534_v19  ;;  %5553 = vpow2.f32 %v4919_v8  ;;  %v1523_v26 = vsel %vm1005_vm3, %v7041_v56, 0.0 }
 0x24e   : > { %v5538_v46 = vpop.eup %5537  ;;  %v1459_v54 = vadd.f32 1.0, %v5536_v0  ;;  %5555 = vpow2.f32 %v4918_v51  ;;  %v1517_v55 = vsel %vm1005_vm3, %v7034_v44, 0.0 }
 0x24f   : > { %v5540_v4 = vpop.eup %5539  ;;  %5557 = vrcp.f32 %v1456_v9  ;;  %1521 = vadd.xlane.f32.xlu0 %v1520_v15  ;;  %1518 = vadd.xlane.f32.xlu1 %v1517_v55  ;;  %v7051_v6 = vmul.f32 %v5538_v46, %v6978_v35 }
 0x250   : > { %v5542_v2 = vpop.eup %5541  ;;  %v7044_v5 = vmul.f32 %v5540_v4, %v6981_v12  ;;  %5559 = vrcp.f32 %v1459_v54 }
 0x251   : > { %v5544_v25 = vpop.eup %5543  ;;  %v1458_v36 = vadd.f32 1.0, %v5542_v2  ;;  %v1529_v30 = vsel %vm1005_vm3, %v7051_v6, 0.0 }
 0x252   : > { %v5546_v50 = vpop.eup %5545  ;;  %v1461_v17 = vadd.f32 1.0, %v5544_v25  ;;  %v1526_v53 = vsel %vm1005_vm3, %v7044_v5, 0.0 }
 0x253   : > { %v5548_v14 = vpop.eup %5547  ;;  %5561 = vrcp.f32 %v1458_v36  ;;  %1524 = vadd.xlane.f32.xlu0 %v1523_v26  ;;  %1527 = vadd.xlane.f32.xlu1 %v1526_v53  ;;  %v7059_v52 = vmul.f32 %v5546_v50, %v6986_v13 }
 0x254   : > { %v1460_v12 = vadd.f32 1.0, %v5548_v14  ;;  %5563 = vrcp.f32 %v1461_v17 }
 0x255   : > { %v5550_v21 = vpop.eup %5549  ;;  %v1535_v48 = vsel %vm1005_vm3, %v7059_v52, 0.0 }
 0x256   : > { %v5552_v42 = vpop.eup %5551  ;;  %5565 = vrcp.f32 %v1460_v12  ;;  %v7056_v31 = vmul.f32 %v5550_v21, %v6989_v49 }
 0x257   : > { %v5554_v35 = vpop.eup %5553  ;;  %1530 = vadd.xlane.f32.xlu0 %v1529_v30  ;;  %v7069_v13 = vmul.f32 %v5552_v42, %v6994_v45 }
 0x258   : > { %v5556_v34 = vpop.eup %5555  ;;  %v1463_v24 = vadd.f32 1.0, %v5554_v35  ;;  %v1532_v59 = vsel %vm1005_vm3, %v7056_v31, 0.0 }
 0x259   : > { %v5558_v37 = vpop.eup %5557  ;;  %v1462_v60 = vadd.f32 1.0, %v5556_v34  ;;  %1533 = vadd.xlane.f32.xlu1 %v1532_v59  ;;  %v1541_v58 = vsel %vm1005_vm3, %v7069_v13, 0.0 }
 0x25a   : > { %5567 = vrcp.f32 %v1463_v24  ;;  %v7066_v49 = vmul.f32 %v5558_v37, %v6997_v7  ;;  %v5560_v32 = vpop.eup %5559 }
 0x25b   : > { %5569 = vrcp.f32 %v1462_v60  ;;  %1536 = vadd.xlane.f32.xlu0 %v1535_v48  ;;  %v7079_v7 = vmul.f32 %v5560_v32, %v7002_v43 }
 0x25c   : > { %v1538_v33 = vsel %vm1005_vm3, %v7066_v49, 0.0 }
 0x25d   : > { %v5562_v39 = vpop.eup %5561  ;;  %1539 = vadd.xlane.f32.xlu1 %v1538_v33  ;;  %v1547_v23 = vsel %vm1005_vm3, %v7079_v7, 0.0 }
 0x25e   : > { %v7076_v18 = vmul.f32 %v5562_v39, %v7005_v27  ;;  %v5564_v41 = vpop.eup %5563 }
 0x25f   : > { %1542 = vadd.xlane.f32.xlu0 %v1541_v58  ;;  %v7089_v16 = vmul.f32 %v5564_v41, %v7010_v40 }
 0x260   : > { %v5566_v45 = vpop.eup %5565  ;;  %v1544_v47 = vsel %vm1005_vm3, %v7076_v18, 0.0 }
 0x261   : > { %1545 = vadd.xlane.f32.xlu1 %v1544_v47  ;;  %v7084_v63 = vmul.f32 %v5566_v45, %v7013_v1  ;;  %v1553_v22 = vsel %vm1005_vm3, %v7089_v16, 0.0 }
 0x263   : > { %1548 = vadd.xlane.f32.xlu0 %v1547_v23  ;;  %v1550_v43 = vsel %vm1005_vm3, %v7084_v63, 0.0 }
 0x264   : > { %v5568_v27 = vpop.eup %5567 }
 0x265   : > { %v5570_v62 = vpop.eup %5569  ;;  %1551 = vadd.xlane.f32.xlu1 %v1550_v43  ;;  %v7099_v1 = vmul.f32 %v5568_v27, %v7018_v29 }
 0x266   : > { %v7096_v8 = vmul.f32 %v5570_v62, %v7021_v11 }
 0x267   : > { %1554 = vadd.xlane.f32.xlu0 %v1553_v22  ;;  %v1559_v28 = vsel %vm1005_vm3, %v7099_v1, 0.0 }
 0x268   : > { %v1556_v40 = vsel %vm1005_vm3, %v7096_v8, 0.0 }
 0x269   : > { %1557 = vadd.xlane.f32.xlu1 %v1556_v40 }
 0x26b   : > { %1560 = vadd.xlane.f32.xlu0 %v1559_v28 }
 0x2d8   : > { %v1516_v38 = vpop.xlane.xlu0 %1515 }
 0x2d9   : > { %v1563_v51 = vmul.f32 0.03125, %v1516_v38 }
 0x2db   : > { %v7106_v20 = vsub.f32 %v7024_v61, %v1563_v51 }
 0x2dc   : > { %v1519_v10 = vpop.xlane.xlu1 %1518  ;;  %v1522_v11 = vpop.xlane.xlu0 %1521 }
 0x2dd   : > { %v1564_v19 = vmul.f32 0.03125, %v1519_v10  ;;  %v1565_v0 = vmul.f32 0.03125, %v1522_v11  ;;  %v1595_v29 = vmul.f32 %v7106_v20, %v7106_v20 }
 0x2df   : > { %v1611_v9 = vsel %vm1005_vm3, %v1595_v29, 0.0  ;;  %v7112_v15 = vsub.f32 %v7034_v44, %v1564_v19  ;;  %v7115_v46 = vsub.f32 %v7028_v3, %v1565_v0 }
 0x2e0   : > { %v1528_v54 = vpop.xlane.xlu1 %1527  ;;  %1612 = vadd.xlane.f32.xlu1 %v1611_v9  ;;  %v1525_v55 = vpop.xlane.xlu0 %1524 }
 0x2e1   : > { %v1567_v61 = vmul.f32 0.03125, %v1528_v54  ;;  %v1566_v4 = vmul.f32 0.03125, %v1525_v55  ;;  %v1596_v2 = vmul.f32 %v7112_v15, %v7112_v15  ;;  %v1597_v25 = vmul.f32 %v7115_v46, %v7115_v46 }
 0x2e3   : > { %v1614_v36 = vsel %vm1005_vm3, %v1596_v2, 0.0  ;;  %v1617_v50 = vsel %vm1005_vm3, %v1597_v25, 0.0  ;;  %v7124_v44 = vsub.f32 %v7044_v5, %v1567_v61  ;;  %v7127_v3 = vsub.f32 %v7041_v56, %v1566_v4 }
 0x2e4   : > { %1615 = vadd.xlane.f32.xlu0 %v1614_v36  ;;  %1618 = vadd.xlane.f32.xlu1 %v1617_v50  ;;  %v1531_v17 = vpop.xlane.xlu0 %1530 }
 0x2e5   : > { %v1568_v26 = vmul.f32 0.03125, %v1531_v17  ;;  %v1599_v53 = vmul.f32 %v7124_v44, %v7124_v44  ;;  %v1598_v14 = vmul.f32 %v7127_v3, %v7127_v3 }
 0x2e6   : > { %v1534_v12 = vpop.xlane.xlu1 %1533 }
 0x2e7   : > { %v1569_v21 = vmul.f32 0.03125, %v1534_v12  ;;  %v1623_v42 = vsel %vm1005_vm3, %v1599_v53, 0.0  ;;  %v1620_v5 = vsel %vm1005_vm3, %v1598_v14, 0.0  ;;  %v7136_v30 = vsub.f32 %v7051_v6, %v1568_v26  ;;  %v5461_v53 = vld [vmem:[%s9606_s3] sm:$0xff]  }
 0x2e8   : > { %1624 = vadd.xlane.f32.xlu1 %v1623_v42  ;;  %1621 = vadd.xlane.f32.xlu0 %v1620_v5  ;;  %v1537_v56 = vpop.xlane.xlu0 %1536 }
 0x2e9   : > { %v1570_v35 = vmul.f32 0.03125, %v1537_v56  ;;  %v7139_v34 = vsub.f32 %v7056_v31, %v1569_v21  ;;  %v1600_v24 = vmul.f32 %v7136_v30, %v7136_v30  ;;  %5238 = vmatprep.subr.bf16.mxu1 %v5461_v53 }
 0x2ea   : > { %v1540_v59 = vpop.xlane.xlu1 %1539  ;;  %5239 = vmatpush3.bf16.msra.mxu1 %v5461_v53 }
 0x2eb   : > { %v1571_v37 = vmul.f32 0.03125, %v1540_v59  ;;  %v1601_v60 = vmul.f32 %v7139_v34, %v7139_v34  ;;  %v1626_v48 = vsel %vm1005_vm3, %v1600_v24, 0.0  ;;  %v7147_v6 = vsub.f32 %v7059_v52, %v1570_v35 }
 0x2ec   : > { %1627 = vadd.xlane.f32.xlu0 %v1626_v48  ;;  %v1543_v32 = vpop.xlane.xlu0 %1542 }
 0x2ed   : > { %v1629_v33 = vsel %vm1005_vm3, %v1601_v60, 0.0  ;;  %v1572_v39 = vmul.f32 0.03125, %v1543_v32  ;;  %v7151_v31 = vsub.f32 %v7066_v49, %v1571_v37  ;;  %v1602_v58 = vmul.f32 %v7147_v6, %v7147_v6 }
 0x2ee   : > { %v1546_v41 = vpop.xlane.xlu1 %1545  ;;  %1630 = vadd.xlane.f32.xlu1 %v1629_v33 }
 0x2ef   : > { %v1573_v45 = vmul.f32 0.03125, %v1546_v41  ;;  %v1603_v47 = vmul.f32 %v7151_v31, %v7151_v31  ;;  %v1632_v52 = vsel %vm1005_vm3, %v1602_v58, 0.0  ;;  %v7159_v23 = vsub.f32 %v7069_v13, %v1572_v39 }
 0x2f0   : > { %1633 = vadd.xlane.f32.xlu0 %v1632_v52  ;;  %v1549_v43 = vpop.xlane.xlu0 %1548 }
 0x2f1   : > { %v1635_v27 = vsel %vm1005_vm3, %v1603_v47, 0.0  ;;  %v1574_v49 = vmul.f32 0.03125, %v1549_v43  ;;  %v7163_v62 = vsub.f32 %v7076_v18, %v1573_v45  ;;  %v1604_v22 = vmul.f32 %v7159_v23, %v7159_v23 }
 0x2f2   : > { %v1552_v40 = vpop.xlane.xlu1 %1551  ;;  %1636 = vadd.xlane.f32.xlu1 %v1635_v27 }
 0x2f3   : > { %v1575_v28 = vmul.f32 0.03125, %v1552_v40  ;;  %v1605_v38 = vmul.f32 %v7163_v62, %v7163_v62  ;;  %v1638_v13 = vsel %vm1005_vm3, %v1604_v22, 0.0  ;;  %v7171_v51 = vsub.f32 %v7079_v7, %v1574_v49 }
 0x2f4   : > { %1639 = vadd.xlane.f32.xlu0 %v1638_v13  ;;  %v1555_v10 = vpop.xlane.xlu0 %1554 }
 0x2f5   : > { %v1641_v11 = vsel %vm1005_vm3, %v1605_v38, 0.0  ;;  %v1576_v18 = vmul.f32 0.03125, %v1555_v10  ;;  %v7175_v19 = vsub.f32 %v7084_v63, %v1575_v28  ;;  %v1606_v0 = vmul.f32 %v7171_v51, %v7171_v51  ;;  %v7211_v28 = vld [vmem:[%s9607_s4 + $0x5] ss:$0 sm:$0xff] }
 0x2f6   : > { %v1558_v29 = vpop.xlane.xlu1 %1557  ;;  %1642 = vadd.xlane.f32.xlu1 %v1641_v11 }
 0x2f7   : > { %v1577_v9 = vmul.f32 0.03125, %v1558_v29  ;;  %v1607_v54 = vmul.f32 %v7175_v19, %v7175_v19  ;;  %v1644_v7 = vsel %vm1005_vm3, %v1606_v0, 0.0  ;;  %v7183_v55 = vsub.f32 %v7089_v16, %v1576_v18 }
 0x2f8   : > { %1645 = vadd.xlane.f32.xlu0 %v1644_v7  ;;  %v1561_v61 = vpop.xlane.xlu0 %1560 }
 0x2f9   : > { %v1647_v4 = vsel %vm1005_vm3, %v1607_v54, 0.0  ;;  %v1578_v63 = vmul.f32 0.03125, %v1561_v61  ;;  %v7187_v2 = vsub.f32 %v7096_v8, %v1577_v9  ;;  %v1608_v25 = vmul.f32 %v7183_v55, %v7183_v55  ;;  %v7217_v54 = vld [vmem:[%s9607_s4 + $0xa] ss:$0 sm:$0xff] }
 0x2fa   : > { %1648 = vadd.xlane.f32.xlu1 %v1647_v4 }
 0x2fb   : > { %v1609_v36 = vmul.f32 %v7187_v2, %v7187_v2  ;;  %v1650_v50 = vsel %vm1005_vm3, %v1608_v25, 0.0  ;;  %v7195_v16 = vsub.f32 %v7099_v1, %v1578_v63  ;;  %v5462_v1 = vld [vmem:[%s9606_s3 + $0x8] sm:$0xff]  }
 0x2fc   : > { %1651 = vadd.xlane.f32.xlu0 %v1650_v50  ;;  %5240 = vmatprep.subr.bf16.mxu1 %v5462_v1 }
 0x2fd   : > { %v1653_v17 = vsel %vm1005_vm3, %v1609_v36, 0.0  ;;  %v1610_v26 = vmul.f32 %v7195_v16, %v7195_v16  ;;  %5241 = vmatpush3.bf16.msra.mxu1 %v5462_v1 }
 0x2fe   : > { %1654 = vadd.xlane.f32.xlu1 %v1653_v17 }
 0x2ff   : > { %v1656_v8 = vsel %vm1005_vm3, %v1610_v26, 0.0 }
 0x300   : > { %1657 = vadd.xlane.f32.xlu0 %v1656_v8 }
 0x36d   : > { %v1613_v14 = vpop.xlane.xlu1 %1612 }
 0x36e   : > { %v1659_v12 = vmul.f32 0.03125, %v1613_v14 }
 0x370   : > { %v1675_v21 = vadd.f32 0.1, %v1659_v12 }
 0x371   : > { %v1619_v42 = vpop.xlane.xlu1 %1618  ;;  %v1616_v5 = vpop.xlane.xlu0 %1615 }
 0x372   : > { %5571 = vrsqrt.f32 %v1675_v21  ;;  %v1661_v56 = vmul.f32 0.03125, %v1619_v42  ;;  %v1660_v35 = vmul.f32 0.03125, %v1616_v5 }
 0x374   : > { %v1677_v24 = vadd.f32 0.1, %v1661_v56  ;;  %v1676_v59 = vadd.f32 0.1, %v1660_v35 }
 0x375   : > { %v1625_v37 = vpop.xlane.xlu1 %1624  ;;  %v1622_v60 = vpop.xlane.xlu0 %1621 }
 0x376   : > { %5573 = vrsqrt.f32 %v1677_v24  ;;  %v1663_v48 = vmul.f32 0.03125, %v1625_v37  ;;  %v1662_v32 = vmul.f32 0.03125, %v1622_v60 }
 0x377   : > { %5575 = vrsqrt.f32 %v1676_v59 }
 0x378   : > { %v1679_v33 = vadd.f32 0.1, %v1663_v48  ;;  %v1678_v39 = vadd.f32 0.1, %v1662_v32 }
 0x379   : > { %v1628_v58 = vpop.xlane.xlu0 %1627 }
 0x37a   : > { %5577 = vrsqrt.f32 %v1679_v33  ;;  %v1664_v41 = vmul.f32 0.03125, %v1628_v58 }
 0x37b   : > { %5579 = vrsqrt.f32 %v1678_v39  ;;  %v1631_v45 = vpop.xlane.xlu1 %1630 }
 0x37c   : > { %v5572_v47 = vpop.eup %5571  ;;  %v1665_v52 = vmul.f32 0.03125, %v1631_v45  ;;  %v1680_v43 = vadd.f32 0.1, %v1664_v41 }
 0x37d   : > { %v1634_v27 = vpop.xlane.xlu0 %1633  ;;  %v1707_v49 = vmul.f32 %v5572_v47, %v7106_v20 }
 0x37e   : > { %v1681_v22 = vadd.f32 0.1, %v1665_v52  ;;  %5581 = vrsqrt.f32 %v1680_v43  ;;  %v1666_v40 = vmul.f32 0.03125, %v1634_v27 }
 0x37f   : > { %v1637_v38 = vpop.xlane.xlu1 %1636  ;;  %v1727_v29 = vmul.f32 %v7211_v28, %v1707_v49 }
 0x380   : > { %v5574_v13 = vpop.eup %5573  ;;  %5583 = vrsqrt.f32 %v1681_v22  ;;  %v1667_v10 = vmul.f32 0.03125, %v1637_v38  ;;  %v1682_v11 = vadd.f32 0.1, %v1666_v40 }
 0x381   : > { %v5576_v18 = vpop.eup %5575  ;;  %v1640_v0 = vpop.xlane.xlu0 %1639  ;;  %v1709_v4 = vmul.f32 %v5574_v13, %v7115_v46  ;;  %v7223_v8 = vadd.f32 %v7217_v54, %v1727_v29 }
 0x382   : > { %v1683_v9 = vadd.f32 0.1, %v1667_v10  ;;  %5585 = vrsqrt.f32 %v1682_v11  ;;  %v1668_v20 = vmul.f32 0.03125, %v1640_v0  ;;  %v1708_v7 = vmul.f32 %v5576_v18, %v7112_v15 }
 0x383   : > { %v1643_v61 = vpop.xlane.xlu1 %1642  ;;  %v1729_v21 = vmul.f32 %v7211_v28, %v1709_v4 }
 0x384   : > { %v5578_v63 = vpop.eup %5577  ;;  %5587 = vrsqrt.f32 %v1683_v9  ;;  %v1669_v25 = vmul.f32 0.03125, %v1643_v61  ;;  %v1684_v36 = vadd.f32 0.1, %v1668_v20  ;;  %v1728_v50 = vmul.f32 %v7211_v28, %v1708_v7 }
 0x385   : > { %v5580_v17 = vpop.eup %5579  ;;  %v1646_v26 = vpop.xlane.xlu0 %1645  ;;  %v1711_v53 = vmul.f32 %v5578_v63, %v7124_v44  ;;  %v7238_v33 = vadd.f32 %v7217_v54, %v1729_v21 }
 0x386   : > { %v1685_v1 = vadd.f32 0.1, %v1669_v25  ;;  %5589 = vrsqrt.f32 %v1684_v36  ;;  %v1670_v14 = vmul.f32 0.03125, %v1646_v26  ;;  %v7227_v15 = vadd.f32 %v7217_v54, %v1728_v50 }
 0x387   : > { %v1649_v46 = vpop.xlane.xlu1 %1648  ;;  %v1710_v12 = vmul.f32 %v5580_v17, %v7127_v3  ;;  %v1731_v42 = vmul.f32 %v7211_v28, %v1711_v53 }
 0x388   : > { %v5582_v5 = vpop.eup %5581  ;;  %5591 = vrsqrt.f32 %v1685_v1  ;;  %v1671_v56 = vmul.f32 0.03125, %v1649_v46  ;;  %v1686_v35 = vadd.f32 0.1, %v1670_v14  ;;  %v1763_v44 = vpack.c.bf16 %v7227_v15, %v7223_v8 }
 0x389   : > { %v1652_v24 = vpop.xlane.xlu0 %1651  ;;  %v1730_v59 = vmul.f32 %v7211_v28, %v1710_v12  ;;  %v1712_v37 = vmul.f32 %v5582_v5, %v7136_v30  ;;  %v7246_v52 = vadd.f32 %v7217_v54, %v1731_v42 }
 0x38a   : > { %v5584_v60 = vpop.eup %5583  ;;  %v1687_v48 = vadd.f32 0.1, %v1671_v56  ;;  %5593 = vrsqrt.f32 %v1686_v35  ;;  %5242 = vmatprep.mubr.msk.bf16.mxu1 %vm1005_vm3, %v1763_v44  ;;  %v1672_v3 = vmul.f32 0.03125, %v1652_v24 }
 0x38b   : > { %v1655_v32 = vpop.xlane.xlu1 %1654  ;;  %v7241_v39 = vadd.f32 %v7217_v54, %v1730_v59  ;;  %v1732_v58 = vmul.f32 %v7211_v28, %v1712_v37  ;;  %v1713_v41 = vmul.f32 %v5584_v60, %v7139_v34 }
 0x38c   : > { %v5586_v45 = vpop.eup %5585  ;;  %5595 = vrsqrt.f32 %v1687_v48  ;;  %v1673_v30 = vmul.f32 0.03125, %v1655_v32  ;;  %v1688_v47 = vadd.f32 0.1, %v1672_v3  ;;  %v7324_v3 = vld [vmem:[%s9607_s4 + $0x1] ss:$0 sm:$0xff] }
 0x38d   : > { %v1764_v43 = vpack.c.bf16 %v7241_v39, %v7238_v33  ;;  %v1658_v27 = vpop.xlane.xlu0 %1657  ;;  %v7251_v49 = vadd.f32 %v7217_v54, %v1732_v58  ;;  %v1714_v22 = vmul.f32 %v5586_v45, %v7147_v6  ;;  %v1733_v40 = vmul.f32 %v7211_v28, %v1713_v41 }
 0x38e   : > { %v5588_v38 = vpop.eup %5587  ;;  %v1689_v34 = vadd.f32 0.1, %v1673_v30  ;;  %5597 = vrsqrt.f32 %v1688_v47  ;;  %v1674_v13 = vmul.f32 0.03125, %v1658_v27 }
 0x38f   : > { %5243 = vmatmul.mubr.msk.bf16.vlgmr.msra.gmra.mrb[0].mxu1 %vm1005_vm3, %v1764_v43  ;;  %v1765_v10 = vpack.c.bf16 %v7251_v49, %v7246_v52  ;;  %v1734_v11 = vmul.f32 %v7211_v28, %v1714_v22  ;;  %v1715_v18 = vmul.f32 %v5588_v38, %v7151_v31  ;;  %v7262_v6 = vadd.f32 %v7217_v54, %v1733_v40 }
 0x390   : > { %v5590_v0 = vpop.eup %5589  ;;  %5599 = vrsqrt.f32 %v1689_v34  ;;  %v1690_v29 = vadd.f32 0.1, %v1674_v13 }
 0x391   : > { %5246 = vmatprep.mubr.msk.bf16.mxu1 %vm1005_vm3, %v1765_v10  ;;  %v7265_v9 = vadd.f32 %v7217_v54, %v1734_v11  ;;  %v1716_v20 = vmul.f32 %v5590_v0, %v7159_v23  ;;  %v1735_v7 = vmul.f32 %v7211_v28, %v1715_v18 }
 0x392   : > { %v5592_v61 = vpop.eup %5591  ;;  %5601 = vrsqrt.f32 %v1690_v29 }
 0x393   : > { %v1766_v31 = vpack.c.bf16 %v7265_v9, %v7262_v6  ;;  %v1736_v4 = vmul.f32 %v7211_v28, %v1716_v20  ;;  %v1717_v63 = vmul.f32 %v5592_v61, %v7163_v62  ;;  %v7274_v36 = vadd.f32 %v7217_v54, %v1735_v7 }
 0x394   : > { %v5594_v25 = vpop.eup %5593 }
 0x395   : > { %v7277_v50 = vadd.f32 %v7217_v54, %v1736_v4  ;;  %v1718_v23 = vmul.f32 %v5594_v25, %v7171_v51  ;;  %v1737_v17 = vmul.f32 %v7211_v28, %v1717_v63 }
 0x396   : > { %v5596_v26 = vpop.eup %5595 }
 0x397   : > { %5247 = vmatmul.mubr.msk.bf16.gmra.mrb[4].mxu1 %vm1005_vm3, %v1766_v31  ;;  %v1767_v53 = vpack.c.bf16 %v7277_v50, %v7274_v36  ;;  %v1738_v1 = vmul.f32 %v7211_v28, %v1718_v23  ;;  %v1719_v62 = vmul.f32 %v5596_v26, %v7175_v19  ;;  %v7288_v46 = vadd.f32 %v7217_v54, %v1737_v17 }
 0x398   : > { %v5598_v14 = vpop.eup %5597 }
 0x399   : > { %5250 = vmatprep.mubr.msk.bf16.mxu1 %vm1005_vm3, %v1767_v53  ;;  %v7291_v51 = vadd.f32 %v7217_v54, %v1738_v1  ;;  %v1720_v12 = vmul.f32 %v5598_v14, %v7183_v55  ;;  %v1739_v21 = vmul.f32 %v7211_v28, %v1719_v62 }
 0x39a   : > { %v5600_v42 = vpop.eup %5599 }
 0x39b   : > { %v1768_v5 = vpack.c.bf16 %v7291_v51, %v7288_v46  ;;  %v1740_v56 = vmul.f32 %v7211_v28, %v1720_v12  ;;  %v1721_v19 = vmul.f32 %v5600_v42, %v7187_v2  ;;  %v7300_v44 = vadd.f32 %v7217_v54, %v1739_v21 }
 0x39c   : > { %v5602_v35 = vpop.eup %5601 }
 0x39d   : > { %v7303_v24 = vadd.f32 %v7217_v54, %v1740_v56  ;;  %v1722_v59 = vmul.f32 %v5602_v35, %v7195_v16  ;;  %v1741_v55 = vmul.f32 %v7211_v28, %v1721_v19 }
 0x39f   : > { %5251 = vmatmul.mubr.msk.bf16.gmra.mrb[8].mxu1 %vm1005_vm3, %v1768_v5  ;;  %v1769_v37 = vpack.c.bf16 %v7303_v24, %v7300_v44  ;;  %v1742_v60 = vmul.f32 %v7211_v28, %v1722_v59  ;;  %v7313_v2 = vadd.f32 %v7217_v54, %v1741_v55 }
 0x3a1   : > { %5254 = vmatprep.mubr.msk.bf16.mxu1 %vm1005_vm3, %v1769_v37  ;;  %v7316_v48 = vadd.f32 %v7217_v54, %v1742_v60 }
 0x3a3   : > { %v1770_v16 = vpack.c.bf16 %v7316_v48, %v7313_v2 }
 0x3a7   : > { %5255 = vmatmul.mubr.msk.bf16.gmra.mrb[12].mxu1 %vm1005_vm3, %v1770_v16 }
 0x462   : > { %v5244_v32 = vpop.f32.mrb[0].mxu1 }
 0x463   : > { %v1859_v28 = vadd.f32 %v5244_v32, %v7324_v3  ;;  %v1850_v58 = vpop.f32.mrb[1].mxu1 }
 0x464   : > { %v1851_v41 = vadd.f32 %v7324_v3, %v1850_v58  ;;  %v5245_v45 = vpop.f32.mrb[2].mxu1 }
 0x465   : > { %v7329_v54 = vadd.f32 %v1859_v28, %v7238_v33  ;;  %v1862_v30 = vadd.f32 %v5245_v45, %v7324_v3  ;;  %v1853_v47 = vpop.f32.mrb[3].mxu1 }
 0x466   : > { %v7333_v43 = vadd.f32 %v1851_v41, %v7223_v8  ;;  %v1854_v27 = vadd.f32 %v7324_v3, %v1853_v47 }
 0x467   : > { %v4935_v22 = vmul.f32 -1.442695, %v7329_v54  ;;  %v7338_v40 = vadd.f32 %v1862_v30, %v7241_v39 }
 0x468   : > { %v4933_v38 = vmul.f32 -1.442695, %v7333_v43  ;;  %v7342_v34 = vadd.f32 %v1854_v27, %v7227_v15 }
 0x469   : > { %5603 = vpow2.f32 %v4935_v22  ;;  %v4936_v13 = vmul.f32 -1.442695, %v7338_v40 }
 0x46a   : > { %5605 = vpow2.f32 %v4933_v38  ;;  %v4934_v10 = vmul.f32 -1.442695, %v7342_v34  ;;  %v5248_v11 = vpop.f32.mrb[4].mxu1 }
 0x46b   : > { %5607 = vpow2.f32 %v4936_v13  ;;  %v1875_v18 = vadd.f32 %v5248_v11, %v7324_v3  ;;  %v1866_v0 = vpop.f32.mrb[5].mxu1 }
 0x46c   : > { %5609 = vpow2.f32 %v4934_v10  ;;  %v1867_v29 = vadd.f32 %v7324_v3, %v1866_v0  ;;  %v5249_v20 = vpop.f32.mrb[6].mxu1 }
 0x46d   : > { %v7349_v7 = vadd.f32 %v1875_v18, %v7262_v6  ;;  %v1878_v61 = vadd.f32 %v5249_v20, %v7324_v3  ;;  %v1869_v31 = vpop.f32.mrb[7].mxu1 }
 0x46e   : > { %v7353_v4 = vadd.f32 %v1867_v29, %v7246_v52  ;;  %v1870_v63 = vadd.f32 %v7324_v3, %v1869_v31 }
 0x46f   : > { %v4939_v25 = vmul.f32 -1.442695, %v7349_v7  ;;  %v7358_v23 = vadd.f32 %v1878_v61, %v7265_v9 }
 0x470   : > { %v4937_v17 = vmul.f32 -1.442695, %v7353_v4  ;;  %v7362_v26 = vadd.f32 %v1870_v63, %v7251_v49 }
 0x471   : > { %5611 = vpow2.f32 %v4939_v25  ;;  %v4940_v53 = vmul.f32 -1.442695, %v7358_v23 }
 0x472   : > { %5613 = vpow2.f32 %v4937_v17  ;;  %v4938_v1 = vmul.f32 -1.442695, %v7362_v26  ;;  %v5252_v62 = vpop.f32.mrb[8].mxu1 }
 0x473   : > { %v5604_v14 = vpop.eup %5603  ;;  %5615 = vpow2.f32 %v4940_v53  ;;  %v1891_v12 = vadd.f32 %v5252_v62, %v7324_v3  ;;  %v1882_v21 = vpop.f32.mrb[9].mxu1 }
 0x474   : > { %v5606_v42 = vpop.eup %5605  ;;  %v1979_v5 = vadd.f32 1.0, %v5604_v14  ;;  %5617 = vpow2.f32 %v4938_v1  ;;  %v1883_v56 = vadd.f32 %v7324_v3, %v1882_v21  ;;  %v5253_v19 = vpop.f32.mrb[10].mxu1 }
 0x475   : > { %v5608_v35 = vpop.eup %5607  ;;  %v1977_v59 = vadd.f32 1.0, %v5606_v42  ;;  %v7369_v55 = vadd.f32 %v1891_v12, %v7288_v46  ;;  %v1894_v37 = vadd.f32 %v5253_v19, %v7324_v3  ;;  %v1885_v60 = vpop.f32.mrb[11].mxu1 }
 0x476   : > { %v5610_v16 = vpop.eup %5609  ;;  %5619 = vrcp.f32 %v1979_v5  ;;  %v1980_v32 = vadd.f32 1.0, %v5608_v35  ;;  %v7373_v28 = vadd.f32 %v1883_v56, %v7274_v36  ;;  %v1886_v58 = vadd.f32 %v7324_v3, %v1885_v60 }
 0x477   : > { %5621 = vrcp.f32 %v1977_v59  ;;  %v1978_v41 = vadd.f32 1.0, %v5610_v16  ;;  %v4943_v45 = vmul.f32 -1.442695, %v7369_v55  ;;  %v7378_v30 = vadd.f32 %v1894_v37, %v7291_v51 }
 0x478   : > { %5623 = vrcp.f32 %v1980_v32  ;;  %v4941_v47 = vmul.f32 -1.442695, %v7373_v28  ;;  %v7382_v27 = vadd.f32 %v1886_v58, %v7277_v50 }
 0x479   : > { %5625 = vrcp.f32 %v1978_v41  ;;  %v4944_v22 = vmul.f32 -1.442695, %v7378_v30 }
 0x47a   : > { %5627 = vpow2.f32 %v4943_v45  ;;  %v4942_v38 = vmul.f32 -1.442695, %v7382_v27  ;;  %v5256_v13 = vpop.f32.mrb[12].mxu1 }
 0x47b   : > { %v5612_v10 = vpop.eup %5611  ;;  %5629 = vpow2.f32 %v4941_v47  ;;  %v1907_v11 = vadd.f32 %v5256_v13, %v7324_v3  ;;  %v1898_v18 = vpop.f32.mrb[13].mxu1 }
 0x47c   : > { %v5614_v0 = vpop.eup %5613  ;;  %v1983_v29 = vadd.f32 1.0, %v5612_v10  ;;  %5631 = vpow2.f32 %v4944_v22  ;;  %v1899_v20 = vadd.f32 %v7324_v3, %v1898_v18  ;;  %v5257_v61 = vpop.f32.mrb[14].mxu1 }
 0x47d   : > { %v5616_v31 = vpop.eup %5615  ;;  %v1981_v63 = vadd.f32 1.0, %v5614_v0  ;;  %5633 = vpow2.f32 %v4942_v38  ;;  %v7389_v25 = vadd.f32 %v1907_v11, %v7313_v2  ;;  %v1910_v17 = vadd.f32 %v5257_v61, %v7324_v3  ;;  %v1901_v53 = vpop.f32.mrb[15].mxu1 }
 0x47e   : > { %v5618_v1 = vpop.eup %5617  ;;  %5635 = vrcp.f32 %v1983_v29  ;;  %v1984_v62 = vadd.f32 1.0, %v5616_v31  ;;  %v7393_v14 = vadd.f32 %v1899_v20, %v7300_v44  ;;  %v1902_v12 = vadd.f32 %v7324_v3, %v1901_v53 }
 0x47f   : > { %5637 = vrcp.f32 %v1981_v63  ;;  %v1982_v21 = vadd.f32 1.0, %v5618_v1  ;;  %v4947_v42 = vmul.f32 -1.442695, %v7389_v25  ;;  %v7398_v5 = vadd.f32 %v1910_v17, %v7316_v48 }
 0x480   : > { %v5620_v56 = vpop.eup %5619  ;;  %5639 = vrcp.f32 %v1984_v62  ;;  %v4945_v19 = vmul.f32 -1.442695, %v7393_v14  ;;  %v7402_v35 = vadd.f32 %v1902_v12, %v7303_v24 }
 0x481   : > { %v5622_v59 = vpop.eup %5621  ;;  %5641 = vrcp.f32 %v1982_v21  ;;  %v4948_v37 = vmul.f32 -1.442695, %v7398_v5  ;;  %v7415_v47 = vmul.f32 %v5620_v56, %v7329_v54 }
 0x482   : > { %v5624_v60 = vpop.eup %5623  ;;  %5643 = vpow2.f32 %v4947_v42  ;;  %v4946_v3 = vmul.f32 -1.442695, %v7402_v35  ;;  %v7407_v16 = vmul.f32 %v5622_v59, %v7333_v43 }
 0x483   : > { %v5626_v32 = vpop.eup %5625  ;;  %5645 = vpow2.f32 %v4945_v19  ;;  %v7420_v11 = vmul.f32 %v5624_v60, %v7338_v40  ;;  %v2049_v29 = vsel %vm1005_vm3, %v7415_v47, 0.0 }
 0x484   : > { %v5628_v58 = vpop.eup %5627  ;;  %5647 = vpow2.f32 %v4948_v37  ;;  %v2043_v41 = vsel %vm1005_vm3, %v7407_v16, 0.0  ;;  %v7412_v45 = vmul.f32 %v5626_v32, %v7342_v34 }
 0x485   : > { %v5630_v22 = vpop.eup %5629  ;;  %v1987_v38 = vadd.f32 1.0, %v5628_v58  ;;  %5649 = vpow2.f32 %v4946_v3  ;;  %2044 = vadd.xlane.f32.xlu1 %v2043_v41  ;;  %v2052_v31 = vsel %vm1005_vm3, %v7420_v11, 0.0 }
 0x486   : > { %v5632_v13 = vpop.eup %5631  ;;  %v1985_v43 = vadd.f32 1.0, %v5630_v22  ;;  %v2046_v10 = vsel %vm1005_vm3, %v7412_v45, 0.0 }
 0x487   : > { %v5634_v18 = vpop.eup %5633  ;;  %5651 = vrcp.f32 %v1987_v38  ;;  %v1988_v0 = vadd.f32 1.0, %v5632_v13  ;;  %2047 = vadd.xlane.f32.xlu0 %v2046_v10 }
 0x488   : > { %v5636_v34 = vpop.eup %5635  ;;  %5653 = vrcp.f32 %v1985_v43  ;;  %v1986_v54 = vadd.f32 1.0, %v5634_v18 }
 0x489   : > { %v5638_v20 = vpop.eup %5637  ;;  %5655 = vrcp.f32 %v1988_v0  ;;  %2050 = vadd.xlane.f32.xlu1 %v2049_v29  ;;  %v7435_v62 = vmul.f32 %v5636_v34, %v7349_v7 }
 0x48a   : > { %v5640_v61 = vpop.eup %5639  ;;  %5657 = vrcp.f32 %v1986_v54  ;;  %v7427_v40 = vmul.f32 %v5638_v20, %v7353_v4 }
 0x48b   : > { %v5642_v63 = vpop.eup %5641  ;;  %2053 = vadd.xlane.f32.xlu0 %v2052_v31  ;;  %v7440_v19 = vmul.f32 %v5640_v61, %v7358_v23  ;;  %v2061_v7 = vsel %vm1005_vm3, %v7435_v62, 0.0 }
 0x48c   : > { %v5644_v17 = vpop.eup %5643  ;;  %v2055_v53 = vsel %vm1005_vm3, %v7427_v40, 0.0  ;;  %v7432_v1 = vmul.f32 %v5642_v63, %v7362_v26 }
 0x48d   : > { %v5646_v12 = vpop.eup %5645  ;;  %v1991_v21 = vadd.f32 1.0, %v5644_v17  ;;  %2056 = vadd.xlane.f32.xlu1 %v2055_v53  ;;  %v2064_v32 = vsel %vm1005_vm3, %v7440_v19, 0.0 }
 0x48e   : > { %v5648_v42 = vpop.eup %5647  ;;  %v1989_v56 = vadd.f32 1.0, %v5646_v12  ;;  %v2058_v4 = vsel %vm1005_vm3, %v7432_v1, 0.0 }
 0x48f   : > { %v5650_v59 = vpop.eup %5649  ;;  %5659 = vrcp.f32 %v1991_v21  ;;  %v1992_v37 = vadd.f32 1.0, %v5648_v42  ;;  %2059 = vadd.xlane.f32.xlu0 %v2058_v4 }
 0x490   : > { %5661 = vrcp.f32 %v1989_v56  ;;  %v1990_v26 = vadd.f32 1.0, %v5650_v59 }
 0x491   : > { %v5652_v60 = vpop.eup %5651  ;;  %5663 = vrcp.f32 %v1992_v37  ;;  %2062 = vadd.xlane.f32.xlu1 %v2061_v7 }
 0x492   : > { %v5654_v3 = vpop.eup %5653  ;;  %5665 = vrcp.f32 %v1990_v26  ;;  %v7455_v13 = vmul.f32 %v5652_v60, %v7369_v55 }
 0x493   : > { %v5656_v58 = vpop.eup %5655  ;;  %2065 = vadd.xlane.f32.xlu0 %v2064_v32  ;;  %v7447_v23 = vmul.f32 %v5654_v3, %v7373_v28 }
 0x494   : > { %v5658_v41 = vpop.eup %5657  ;;  %v7460_v10 = vmul.f32 %v5656_v58, %v7378_v30  ;;  %v2073_v18 = vsel %vm1005_vm3, %v7455_v13, 0.0 }
 0x495   : > { %v2067_v22 = vsel %vm1005_vm3, %v7447_v23, 0.0  ;;  %v7452_v38 = vmul.f32 %v5658_v41, %v7382_v27 }
 0x496   : > { %2068 = vadd.xlane.f32.xlu1 %v2067_v22  ;;  %v2076_v27 = vsel %vm1005_vm3, %v7460_v10, 0.0 }
 0x497   : > { %v2070_v43 = vsel %vm1005_vm3, %v7452_v38, 0.0 }
 0x498   : > { %2071 = vadd.xlane.f32.xlu0 %v2070_v43 }
 0x499   : > { %v5660_v28 = vpop.eup %5659 }
 0x49a   : > { %v5662_v0 = vpop.eup %5661  ;;  %2074 = vadd.xlane.f32.xlu1 %v2073_v18  ;;  %v7475_v20 = vmul.f32 %v5660_v28, %v7389_v25  ;;  %v5463_v25 = vld [vmem:[%s9606_s3 + $0x10] sm:$0xff]  }
 0x49b   : > { %v5664_v34 = vpop.eup %5663  ;;  %v7467_v55 = vmul.f32 %v5662_v0, %v7393_v14  ;;  %5258 = vmatprep.subr.bf16.mxu1 %v5463_v25 }
 0x49c   : > { %v5666_v54 = vpop.eup %5665  ;;  %2077 = vadd.xlane.f32.xlu0 %v2076_v27  ;;  %v7480_v31 = vmul.f32 %v5664_v34, %v7398_v5  ;;  %v2085_v14 = vsel %vm1005_vm3, %v7475_v20, 0.0  ;;  %5259 = vmatpush3.bf16.msra.mxu1 %v5463_v25 }
 0x49d   : > { %v2079_v30 = vsel %vm1005_vm3, %v7467_v55, 0.0  ;;  %v7472_v29 = vmul.f32 %v5666_v54, %v7402_v35 }
 0x49e   : > { %2080 = vadd.xlane.f32.xlu1 %v2079_v30  ;;  %v2088_v63 = vsel %vm1005_vm3, %v7480_v31, 0.0 }
 0x49f   : > { %v2082_v61 = vsel %vm1005_vm3, %v7472_v29, 0.0 }
 0x4a0   : > { %2083 = vadd.xlane.f32.xlu0 %v2082_v61 }
 0x4a2   : > { %2086 = vadd.xlane.f32.xlu1 %v2085_v14 }
 0x4a4   : > { %2089 = vadd.xlane.f32.xlu0 %v2088_v63 }
 0x512   : > { %v2045_v35 = vpop.xlane.xlu1 %2044 }
 0x513   : > { %v2091_v17 = vmul.f32 0.03125, %v2045_v35 }
 0x514   : > { %v2048_v53 = vpop.xlane.xlu0 %2047 }
 0x515   : > { %v2092_v5 = vmul.f32 0.03125, %v2048_v53  ;;  %v7490_v12 = vsub.f32 %v7407_v16, %v2091_v17 }
 0x516   : > { %v2051_v21 = vpop.xlane.xlu1 %2050 }
 0x517   : > { %v2093_v42 = vmul.f32 0.03125, %v2051_v21  ;;  %v2123_v56 = vmul.f32 %v7490_v12, %v7490_v12  ;;  %v7495_v4 = vsub.f32 %v7412_v45, %v2092_v5 }
 0x518   : > { %v2054_v59 = vpop.xlane.xlu0 %2053 }
 0x519   : > { %v2094_v37 = vmul.f32 0.03125, %v2054_v59  ;;  %v2139_v26 = vsel %vm1005_vm3, %v2123_v56, 0.0  ;;  %v2124_v7 = vmul.f32 %v7495_v4, %v7495_v4  ;;  %v7501_v60 = vsub.f32 %v7415_v47, %v2093_v42 }
 0x51a   : > { %v2057_v16 = vpop.xlane.xlu1 %2056  ;;  %2140 = vadd.xlane.f32.xlu1 %v2139_v26 }
 0x51b   : > { %v2095_v3 = vmul.f32 0.03125, %v2057_v16  ;;  %v2142_v32 = vsel %vm1005_vm3, %v2124_v7, 0.0  ;;  %v2125_v58 = vmul.f32 %v7501_v60, %v7501_v60  ;;  %v7507_v45 = vsub.f32 %v7420_v11, %v2094_v37 }
 0x51c   : > { %2143 = vadd.xlane.f32.xlu0 %v2142_v32  ;;  %v2060_v41 = vpop.xlane.xlu0 %2059 }
 0x51d   : > { %v2096_v22 = vmul.f32 0.03125, %v2060_v41  ;;  %v2145_v43 = vsel %vm1005_vm3, %v2125_v58, 0.0  ;;  %v2126_v47 = vmul.f32 %v7507_v45, %v7507_v45  ;;  %v7513_v28 = vsub.f32 %v7427_v40, %v2095_v3 }
 0x51e   : > { %v2063_v18 = vpop.xlane.xlu1 %2062  ;;  %2146 = vadd.xlane.f32.xlu1 %v2145_v43 }
 0x51f   : > { %v2097_v0 = vmul.f32 0.03125, %v2063_v18  ;;  %v2148_v34 = vsel %vm1005_vm3, %v2126_v47, 0.0  ;;  %v2127_v11 = vmul.f32 %v7513_v28, %v7513_v28  ;;  %v7519_v27 = vsub.f32 %v7432_v1, %v2096_v22 }
 0x520   : > { %2149 = vadd.xlane.f32.xlu0 %v2148_v34  ;;  %v2066_v54 = vpop.xlane.xlu0 %2065 }
 0x521   : > { %v2098_v30 = vmul.f32 0.03125, %v2066_v54  ;;  %v2151_v61 = vsel %vm1005_vm3, %v2127_v11, 0.0  ;;  %v2128_v40 = vmul.f32 %v7519_v27, %v7519_v27  ;;  %v7525_v14 = vsub.f32 %v7435_v62, %v2097_v0 }
 0x522   : > { %2152 = vadd.xlane.f32.xlu1 %v2151_v61 }
 0x523   : > { %v2069_v63 = vpop.xlane.xlu1 %2068  ;;  %v2154_v25 = vsel %vm1005_vm3, %v2128_v40, 0.0  ;;  %v2129_v35 = vmul.f32 %v7525_v14, %v7525_v14  ;;  %v7531_v1 = vsub.f32 %v7440_v19, %v2098_v30 }
 0x524   : > { %v2099_v17 = vmul.f32 0.03125, %v2069_v63  ;;  %2155 = vadd.xlane.f32.xlu0 %v2154_v25 }
 0x525   : > { %v2072_v53 = vpop.xlane.xlu0 %2071  ;;  %v2157_v5 = vsel %vm1005_vm3, %v2129_v35, 0.0  ;;  %v2130_v21 = vmul.f32 %v7531_v1, %v7531_v1 }
 0x526   : > { %v2100_v62 = vmul.f32 0.03125, %v2072_v53  ;;  %2158 = vadd.xlane.f32.xlu1 %v2157_v5  ;;  %v7537_v42 = vsub.f32 %v7447_v23, %v2099_v17 }
 0x527   : > { %v2075_v56 = vpop.xlane.xlu1 %2074  ;;  %v2160_v59 = vsel %vm1005_vm3, %v2130_v21, 0.0 }
 0x528   : > { %v2101_v37 = vmul.f32 0.03125, %v2075_v56  ;;  %2161 = vadd.xlane.f32.xlu0 %v2160_v59  ;;  %v2131_v19 = vmul.f32 %v7537_v42, %v7537_v42  ;;  %v7543_v26 = vsub.f32 %v7452_v38, %v2100_v62 }
 0x529   : > { %v2078_v7 = vpop.xlane.xlu0 %2077 }
 0x52a   : > { %v2102_v16 = vmul.f32 0.03125, %v2078_v7  ;;  %v2163_v3 = vsel %vm1005_vm3, %v2131_v19, 0.0  ;;  %v2132_v32 = vmul.f32 %v7543_v26, %v7543_v26  ;;  %v7549_v23 = vsub.f32 %v7455_v13, %v2101_v37 }
 0x52b   : > { %2164 = vadd.xlane.f32.xlu1 %v2163_v3  ;;  %v2081_v58 = vpop.xlane.xlu1 %2080 }
 0x52c   : > { %v2103_v41 = vmul.f32 0.03125, %v2081_v58  ;;  %v2166_v22 = vsel %vm1005_vm3, %v2132_v32, 0.0  ;;  %v2133_v43 = vmul.f32 %v7549_v23, %v7549_v23  ;;  %v7555_v38 = vsub.f32 %v7460_v10, %v2102_v16 }
 0x52d   : > { %2167 = vadd.xlane.f32.xlu0 %v2166_v22  ;;  %v2084_v47 = vpop.xlane.xlu0 %2083 }
 0x52e   : > { %v2104_v18 = vmul.f32 0.03125, %v2084_v47  ;;  %v2169_v0 = vsel %vm1005_vm3, %v2133_v43, 0.0  ;;  %v2134_v13 = vmul.f32 %v7555_v38, %v7555_v38  ;;  %v7561_v34 = vsub.f32 %v7467_v55, %v2103_v41 }
 0x52f   : > { %2170 = vadd.xlane.f32.xlu1 %v2169_v0  ;;  %v2087_v11 = vpop.xlane.xlu1 %2086 }
 0x530   : > { %v2105_v54 = vmul.f32 0.03125, %v2087_v11  ;;  %v2172_v30 = vsel %vm1005_vm3, %v2134_v13, 0.0  ;;  %v2135_v10 = vmul.f32 %v7561_v34, %v7561_v34  ;;  %v7567_v61 = vsub.f32 %v7472_v29, %v2104_v18 }
 0x531   : > { %2173 = vadd.xlane.f32.xlu0 %v2172_v30  ;;  %v2090_v40 = vpop.xlane.xlu0 %2089 }
 0x532   : > { %v2106_v63 = vmul.f32 0.03125, %v2090_v40  ;;  %v2175_v25 = vsel %vm1005_vm3, %v2135_v10, 0.0  ;;  %v2136_v55 = vmul.f32 %v7567_v61, %v7567_v61  ;;  %v7573_v35 = vsub.f32 %v7475_v20, %v2105_v54  ;;  %v5464_v20 = vld [vmem:[%s9606_s3 + $0x18] sm:$0xff]  }
 0x533   : > { %2176 = vadd.xlane.f32.xlu1 %v2175_v25  ;;  %5260 = vmatprep.subr.bf16.mxu1 %v5464_v20 }
 0x534   : > { %v2178_v17 = vsel %vm1005_vm3, %v2136_v55, 0.0  ;;  %v2137_v53 = vmul.f32 %v7573_v35, %v7573_v35  ;;  %v7579_v29 = vsub.f32 %v7480_v31, %v2106_v63  ;;  %5261 = vmatpush3.bf16.msra.mxu1 %v5464_v20  ;;  %v7591_v55 = vld [vmem:[%s9607_s4 + $0x6] ss:$0 sm:$0xff] }
 0x535   : > { %2179 = vadd.xlane.f32.xlu0 %v2178_v17 }
 0x536   : > { %v2181_v5 = vsel %vm1005_vm3, %v2137_v53, 0.0  ;;  %v2138_v21 = vmul.f32 %v7579_v29, %v7579_v29 }
 0x537   : > { %2182 = vadd.xlane.f32.xlu1 %v2181_v5 }
 0x538   : > { %v2184_v62 = vsel %vm1005_vm3, %v2138_v21, 0.0 }
 0x539   : > { %2185 = vadd.xlane.f32.xlu0 %v2184_v62 }
 0x5a7   : > { %v2141_v56 = vpop.xlane.xlu1 %2140 }
 0x5a8   : > { %v2187_v59 = vmul.f32 0.03125, %v2141_v56 }
 0x5a9   : > { %v2144_v31 = vpop.xlane.xlu0 %2143 }
 0x5aa   : > { %v2203_v37 = vadd.f32 0.1, %v2187_v59  ;;  %v2188_v19 = vmul.f32 0.03125, %v2144_v31 }
 0x5ab   : > { %v2147_v7 = vpop.xlane.xlu1 %2146 }
 0x5ac   : > { %5667 = vrsqrt.f32 %v2203_v37  ;;  %v2204_v16 = vadd.f32 0.1, %v2188_v19  ;;  %v2189_v3 = vmul.f32 0.03125, %v2147_v7 }
 0x5ad   : > { %v2150_v32 = vpop.xlane.xlu0 %2149 }
 0x5ae   : > { %5669 = vrsqrt.f32 %v2204_v16  ;;  %v2205_v58 = vadd.f32 0.1, %v2189_v3  ;;  %v2190_v41 = vmul.f32 0.03125, %v2150_v32 }
 0x5af   : > { %v2153_v22 = vpop.xlane.xlu1 %2152 }
 0x5b0   : > { %5671 = vrsqrt.f32 %v2205_v58  ;;  %v2206_v43 = vadd.f32 0.1, %v2190_v41  ;;  %v2191_v47 = vmul.f32 0.03125, %v2153_v22 }
 0x5b1   : > { %v2156_v18 = vpop.xlane.xlu0 %2155 }
 0x5b2   : > { %5673 = vrsqrt.f32 %v2206_v43  ;;  %v2207_v0 = vadd.f32 0.1, %v2191_v47  ;;  %v2192_v13 = vmul.f32 0.03125, %v2156_v18 }
 0x5b3   : > { %v2159_v11 = vpop.xlane.xlu1 %2158 }
 0x5b4   : > { %5675 = vrsqrt.f32 %v2207_v0  ;;  %v2208_v54 = vadd.f32 0.1, %v2192_v13  ;;  %v2193_v30 = vmul.f32 0.03125, %v2159_v11 }
 0x5b5   : > { %v2162_v10 = vpop.xlane.xlu0 %2161 }
 0x5b6   : > { %v5668_v40 = vpop.eup %5667  ;;  %5677 = vrsqrt.f32 %v2208_v54  ;;  %v2209_v63 = vadd.f32 0.1, %v2193_v30  ;;  %v2194_v25 = vmul.f32 0.03125, %v2162_v10 }
 0x5b7   : > { %v2235_v17 = vmul.f32 %v5668_v40, %v7490_v12  ;;  %v7600_v12 = vld [vmem:[%s9607_s4 + $0xb] ss:$0 sm:$0xff] }
 0x5b8   : > { %v5670_v53 = vpop.eup %5669  ;;  %5679 = vrsqrt.f32 %v2209_v63  ;;  %v2210_v5 = vadd.f32 0.1, %v2194_v25  ;;  %v2165_v21 = vpop.xlane.xlu1 %2164 }
 0x5b9   : > { %v2195_v62 = vmul.f32 0.03125, %v2165_v21  ;;  %v2236_v20 = vmul.f32 %v5670_v53, %v7495_v4  ;;  %v2255_v31 = vmul.f32 %v7591_v55, %v2235_v17 }
 0x5ba   : > { %v5672_v56 = vpop.eup %5671  ;;  %5681 = vrsqrt.f32 %v2210_v5  ;;  %v2168_v59 = vpop.xlane.xlu0 %2167 }
 0x5bb   : > { %v2237_v37 = vmul.f32 %v5672_v56, %v7501_v60  ;;  %v2211_v19 = vadd.f32 0.1, %v2195_v62  ;;  %v2196_v7 = vmul.f32 0.03125, %v2168_v59  ;;  %v2256_v16 = vmul.f32 %v7591_v55, %v2236_v20 }
 0x5bc   : > { %v5674_v3 = vpop.eup %5673  ;;  %v2171_v32 = vpop.xlane.xlu1 %2170  ;;  %v7606_v47 = vadd.f32 %v7600_v12, %v2255_v31 }
 0x5bd   : > { %v2257_v4 = vmul.f32 %v7591_v55, %v2237_v37  ;;  %v2238_v58 = vmul.f32 %v5674_v3, %v7507_v45  ;;  %5683 = vrsqrt.f32 %v2211_v19  ;;  %v2212_v41 = vadd.f32 0.1, %v2196_v7 }
 0x5be   : > { %v5676_v22 = vpop.eup %5675  ;;  %v2197_v43 = vmul.f32 0.03125, %v2171_v32  ;;  %v2174_v60 = vpop.xlane.xlu0 %2173  ;;  %v7609_v18 = vadd.f32 %v7600_v12, %v2256_v16 }
 0x5bf   : > { %v2258_v0 = vmul.f32 %v7591_v55, %v2238_v58  ;;  %5685 = vrsqrt.f32 %v2212_v41  ;;  %v2198_v13 = vmul.f32 0.03125, %v2174_v60  ;;  %v7615_v10 = vadd.f32 %v7600_v12, %v2257_v4 }
 0x5c0   : > { %v5678_v11 = vpop.eup %5677  ;;  %v2213_v54 = vadd.f32 0.1, %v2197_v43  ;;  %v2177_v30 = vpop.xlane.xlu1 %2176  ;;  %v2307_v45 = vpack.c.bf16 %v7609_v18, %v7606_v47  ;;  %v2239_v40 = vmul.f32 %v5676_v22, %v7513_v28 }
 0x5c1   : > { %v2214_v63 = vadd.f32 0.1, %v2198_v13  ;;  %v2199_v25 = vmul.f32 0.03125, %v2177_v30  ;;  %v7619_v17 = vadd.f32 %v7600_v12, %v2258_v0  ;;  %v2240_v53 = vmul.f32 %v5678_v11, %v7519_v27 }
 0x5c2   : > { %v5680_v5 = vpop.eup %5679  ;;  %5687 = vrsqrt.f32 %v2213_v54  ;;  %5262 = vmatprep.mubr.msk.bf16.mxu1 %vm1005_vm3, %v2307_v45  ;;  %v2180_v21 = vpop.xlane.xlu0 %2179  ;;  %v2259_v62 = vmul.f32 %v7591_v55, %v2239_v40 }
 0x5c3   : > { %5689 = vrsqrt.f32 %v2214_v63  ;;  %v2215_v20 = vadd.f32 0.1, %v2199_v25  ;;  %v2200_v56 = vmul.f32 0.03125, %v2180_v21  ;;  %v2308_v28 = vpack.c.bf16 %v7619_v17, %v7615_v10 }
 0x5c4   : > { %v5682_v59 = vpop.eup %5681  ;;  %v2183_v31 = vpop.xlane.xlu1 %2182  ;;  %v2260_v37 = vmul.f32 %v7591_v55, %v2240_v53  ;;  %v2241_v19 = vmul.f32 %v5680_v5, %v7525_v14  ;;  %v7631_v32 = vadd.f32 %v7600_v12, %v2259_v62 }
 0x5c5   : > { %5691 = vrsqrt.f32 %v2215_v20  ;;  %v2216_v27 = vadd.f32 0.1, %v2200_v56  ;;  %v2201_v7 = vmul.f32 0.03125, %v2183_v31  ;;  %5263 = vmatmul.mubr.msk.bf16.vlgmr.msra.gmra.mrb[16].mxu1 %vm1005_vm3, %v2308_v28  ;;  %v2242_v16 = vmul.f32 %v5682_v59, %v7531_v1 }
 0x5c6   : > { %v2186_v3 = vpop.xlane.xlu0 %2185  ;;  %v7634_v4 = vadd.f32 %v7600_v12, %v2260_v37  ;;  %v2261_v58 = vmul.f32 %v7591_v55, %v2241_v19 }
 0x5c7   : > { %v5684_v41 = vpop.eup %5683  ;;  %5693 = vrsqrt.f32 %v2216_v27  ;;  %v2217_v22 = vadd.f32 0.1, %v2201_v7  ;;  %v2202_v14 = vmul.f32 0.03125, %v2186_v3  ;;  %v2262_v43 = vmul.f32 %v7591_v55, %v2242_v16 }
 0x5c8   : > { %v2309_v60 = vpack.c.bf16 %v7634_v4, %v7631_v32  ;;  %v2243_v1 = vmul.f32 %v5684_v41, %v7537_v42  ;;  %v7642_v11 = vadd.f32 %v7600_v12, %v2261_v58 }
 0x5c9   : > { %v5686_v0 = vpop.eup %5685  ;;  %5695 = vrsqrt.f32 %v2217_v22  ;;  %v2218_v13 = vadd.f32 0.1, %v2202_v14  ;;  %v7645_v54 = vadd.f32 %v7600_v12, %v2262_v43 }
 0x5ca   : > { %5266 = vmatprep.mubr.msk.bf16.mxu1 %vm1005_vm3, %v2309_v60  ;;  %v2244_v30 = vmul.f32 %v5686_v0, %v7543_v26  ;;  %v2263_v45 = vmul.f32 %v7591_v55, %v2243_v1 }
 0x5cb   : > { %5697 = vrsqrt.f32 %v2218_v13  ;;  %v2310_v40 = vpack.c.bf16 %v7645_v54, %v7642_v11 }
 0x5cc   : > { %v5688_v42 = vpop.eup %5687  ;;  %v2264_v63 = vmul.f32 %v7591_v55, %v2244_v30  ;;  %v7656_v5 = vadd.f32 %v7600_v12, %v2263_v45 }
 0x5cd   : > { %v5690_v25 = vpop.eup %5689  ;;  %5267 = vmatmul.mubr.msk.bf16.gmra.mrb[20].mxu1 %vm1005_vm3, %v2310_v40  ;;  %v2245_v53 = vmul.f32 %v5688_v42, %v7549_v23 }
 0x5ce   : > { %v7659_v21 = vadd.f32 %v7600_v12, %v2264_v63  ;;  %v2246_v26 = vmul.f32 %v5690_v25, %v7555_v38  ;;  %v7722_v63 = vadd.f32 %v7619_v17, %v7241_v39 }
 0x5cf   : > { %v5692_v62 = vpop.eup %5691  ;;  %v2265_v20 = vmul.f32 %v7591_v55, %v2245_v53 }
 0x5d0   : > { %v2311_v56 = vpack.c.bf16 %v7659_v21, %v7656_v5  ;;  %v2266_v28 = vmul.f32 %v7591_v55, %v2246_v26  ;;  %v2247_v59 = vmul.f32 %v5692_v62, %v7561_v34 }
 0x5d1   : > { %v5694_v31 = vpop.eup %5693  ;;  %v7669_v23 = vadd.f32 %v7600_v12, %v2265_v20 }
 0x5d2   : > { %5270 = vmatprep.mubr.msk.bf16.mxu1 %vm1005_vm3, %v2311_v56  ;;  %v7672_v37 = vadd.f32 %v7600_v12, %v2266_v28  ;;  %v2248_v38 = vmul.f32 %v5694_v31, %v7567_v61  ;;  %v2267_v19 = vmul.f32 %v7591_v55, %v2247_v59  ;;  %v7750_v59 = vadd.f32 %v7631_v32, %v7246_v52 }
 0x5d3   : > { %v5696_v27 = vpop.eup %5695  ;;  %v7766_v52 = vadd.f32 %v7634_v4, %v7251_v49 }
 0x5d4   : > { %v2312_v7 = vpack.c.bf16 %v7672_v37, %v7669_v23  ;;  %v2268_v16 = vmul.f32 %v7591_v55, %v2248_v38  ;;  %v2249_v34 = vmul.f32 %v5696_v27, %v7573_v35  ;;  %v7682_v58 = vadd.f32 %v7600_v12, %v2267_v19 }
 0x5d5   : > { %v5698_v3 = vpop.eup %5697  ;;  %v7758_v27 = vadd.f32 %v7645_v54, %v7265_v9 }
 0x5d6   : > { %5271 = vmatmul.mubr.msk.bf16.gmra.mrb[24].mxu1 %vm1005_vm3, %v2312_v7  ;;  %v7685_v41 = vadd.f32 %v7600_v12, %v2268_v16  ;;  %v2250_v61 = vmul.f32 %v5698_v3, %v7579_v29  ;;  %v2269_v22 = vmul.f32 %v7591_v55, %v2249_v34  ;;  %v7705_v29 = vld [vmem:[%s9607_s4 + $0x2] ss:$0 sm:$0xff] }
 0x5d8   : > { %v2313_v14 = vpack.c.bf16 %v7685_v41, %v7682_v58  ;;  %v2270_v43 = vmul.f32 %v7591_v55, %v2250_v61  ;;  %v7694_v35 = vadd.f32 %v7600_v12, %v2269_v22  ;;  %v7709_v55 = vadd.f32 %v7615_v10, %v7238_v33 }
 0x5d9   : > { %v7781_v22 = vadd.f32 %v7656_v5, %v7274_v36  ;;  %v7795_v5 = vadd.f32 %v7659_v21, %v7277_v50 }
 0x5da   : > { %5274 = vmatprep.mubr.msk.bf16.mxu1 %vm1005_vm3, %v2313_v14  ;;  %v7697_v60 = vadd.f32 %v7600_v12, %v2270_v43  ;;  %v7714_v12 = vadd.f32 %v7606_v47, %v7223_v8  ;;  %v7730_v8 = vadd.f32 %v7609_v18, %v7227_v15  ;;  %v7745_v18 = vadd.f32 %v7642_v11, %v7262_v6 }
 0x5dc   : > { %v2314_v1 = vpack.c.bf16 %v7697_v60, %v7694_v35 }
 0x5de   : > { %5275 = vmatmul.mubr.msk.bf16.gmra.mrb[28].mxu1 %vm1005_vm3, %v2314_v1  ;;  %v7785_v1 = vadd.f32 %v7669_v23, %v7288_v46 }
 0x698   : > { %v5264_v0 = vpop.f32.mrb[16].mxu1 }
 0x699   : > { %v2404_v13 = vadd.f32 %v5264_v0, %v7705_v29  ;;  %v2395_v30 = vpop.f32.mrb[17].mxu1 }
 0x69a   : > { %v2396_v45 = vadd.f32 %v7705_v29, %v2395_v30  ;;  %v5265_v40 = vpop.f32.mrb[18].mxu1 }
 0x69b   : > { %v7718_v42 = vadd.f32 %v2404_v13, %v7709_v55  ;;  %v2407_v33 = vadd.f32 %v5265_v40, %v7705_v29  ;;  %v2398_v10 = vpop.f32.mrb[19].mxu1 }
 0x69c   : > { %v7726_v25 = vadd.f32 %v2396_v45, %v7714_v12  ;;  %v2399_v47 = vadd.f32 %v7705_v29, %v2398_v10 }
 0x69d   : > { %v4968_v53 = vmul.f32 -1.442695, %v7718_v42  ;;  %v7735_v26 = vadd.f32 %v2407_v33, %v7722_v63  ;;  %v7791_v33 = vadd.f32 %v7672_v37, %v7291_v51 }
 0x69e   : > { %v4966_v39 = vmul.f32 -1.442695, %v7726_v25  ;;  %v7739_v17 = vadd.f32 %v2399_v47, %v7730_v8 }
 0x69f   : > { %5699 = vpow2.f32 %v4968_v53  ;;  %v4969_v62 = vmul.f32 -1.442695, %v7735_v26 }
 0x6a0   : > { %5701 = vpow2.f32 %v4966_v39  ;;  %v4967_v20 = vmul.f32 -1.442695, %v7739_v17  ;;  %v5268_v15 = vpop.f32.mrb[20].mxu1 }
 0x6a1   : > { %5703 = vpow2.f32 %v4969_v62  ;;  %v2420_v56 = vadd.f32 %v5268_v15, %v7705_v29  ;;  %v2411_v28 = vpop.f32.mrb[21].mxu1 }
 0x6a2   : > { %5705 = vpow2.f32 %v4967_v20  ;;  %v2412_v31 = vadd.f32 %v7705_v29, %v2411_v28  ;;  %v5269_v38 = vpop.f32.mrb[22].mxu1 }
 0x6a3   : > { %v7754_v19 = vadd.f32 %v2420_v56, %v7745_v18  ;;  %v2423_v6 = vadd.f32 %v5269_v38, %v7705_v29  ;;  %v2414_v11 = vpop.f32.mrb[23].mxu1  ;;  %v7817_v38 = vadd.f32 %v7682_v58, %v7300_v44  ;;  %v7831_v58 = vadd.f32 %v7697_v60, %v7316_v48 }
 0x6a4   : > { %v7762_v7 = vadd.f32 %v2412_v31, %v7750_v59  ;;  %v2415_v32 = vadd.f32 %v7705_v29, %v2414_v11 }
 0x6a5   : > { %v4972_v16 = vmul.f32 -1.442695, %v7754_v19  ;;  %v7771_v34 = vadd.f32 %v2423_v6, %v7758_v27  ;;  %v7821_v6 = vadd.f32 %v7685_v41, %v7303_v24 }
 0x6a6   : > { %v4970_v9 = vmul.f32 -1.442695, %v7762_v7  ;;  %v7775_v54 = vadd.f32 %v2415_v32, %v7766_v52 }
 0x6a7   : > { %5707 = vpow2.f32 %v4972_v16  ;;  %v4973_v3 = vmul.f32 -1.442695, %v7771_v34  ;;  %v7825_v16 = vadd.f32 %v7694_v35, %v7313_v2 }
 0x6a8   : > { %5709 = vpow2.f32 %v4970_v9  ;;  %v4971_v61 = vmul.f32 -1.442695, %v7775_v54 }
 0x6a9   : > { %v5700_v49 = vpop.eup %5699  ;;  %5711 = vpow2.f32 %v4973_v3  ;;  %v5272_v4 = vpop.f32.mrb[24].mxu1 }
 0x6aa   : > { %v5702_v14 = vpop.eup %5701  ;;  %v2524_v43 = vadd.f32 1.0, %v5700_v49  ;;  %5713 = vpow2.f32 %v4971_v61  ;;  %v2436_v0 = vadd.f32 %v5272_v4, %v7705_v29  ;;  %v2427_v13 = vpop.f32.mrb[25].mxu1 }
 0x6ab   : > { %v5704_v30 = vpop.eup %5703  ;;  %v2522_v45 = vadd.f32 1.0, %v5702_v14  ;;  %v2428_v40 = vadd.f32 %v7705_v29, %v2427_v13  ;;  %v5273_v36 = vpop.f32.mrb[26].mxu1 }
 0x6ac   : > { %v5706_v10 = vpop.eup %5705  ;;  %5715 = vrcp.f32 %v2524_v43  ;;  %v2525_v46 = vadd.f32 1.0, %v5704_v30  ;;  %v7798_v23 = vadd.f32 %v2436_v0, %v7785_v1  ;;  %v2439_v47 = vadd.f32 %v5273_v36, %v7705_v29  ;;  %v2430_v53 = vpop.f32.mrb[27].mxu1 }
 0x6ad   : > { %5717 = vrcp.f32 %v2522_v45  ;;  %v2523_v39 = vadd.f32 1.0, %v5706_v10  ;;  %v7802_v62 = vadd.f32 %v2428_v40, %v7781_v22  ;;  %v2431_v51 = vadd.f32 %v7705_v29, %v2430_v53 }
 0x6ae   : > { %5719 = vrcp.f32 %v2525_v46  ;;  %v4976_v50 = vmul.f32 -1.442695, %v7798_v23  ;;  %v7807_v21 = vadd.f32 %v2439_v47, %v7791_v33 }
 0x6af   : > { %5721 = vrcp.f32 %v2523_v39  ;;  %v4974_v37 = vmul.f32 -1.442695, %v7802_v62  ;;  %v7811_v20 = vadd.f32 %v2431_v51, %v7795_v5 }
 0x6b0   : > { %5723 = vpow2.f32 %v4976_v50  ;;  %v4977_v15 = vmul.f32 -1.442695, %v7807_v21 }
 0x6b1   : > { %v5708_v56 = vpop.eup %5707  ;;  %5725 = vpow2.f32 %v4974_v37  ;;  %v4975_v28 = vmul.f32 -1.442695, %v7811_v20  ;;  %v5276_v31 = vpop.f32.mrb[28].mxu1 }
 0x6b2   : > { %v5710_v11 = vpop.eup %5709  ;;  %v2528_v32 = vadd.f32 1.0, %v5708_v56  ;;  %5727 = vpow2.f32 %v4977_v15  ;;  %v2452_v9 = vadd.f32 %v5276_v31, %v7705_v29  ;;  %v2443_v3 = vpop.f32.mrb[29].mxu1 }
 0x6b3   : > { %v5712_v61 = vpop.eup %5711  ;;  %v2526_v49 = vadd.f32 1.0, %v5710_v11  ;;  %5729 = vpow2.f32 %v4975_v28  ;;  %v2444_v44 = vadd.f32 %v7705_v29, %v2443_v3  ;;  %v5277_v24 = vpop.f32.mrb[30].mxu1 }
 0x6b4   : > { %v5714_v41 = vpop.eup %5713  ;;  %5731 = vrcp.f32 %v2528_v32  ;;  %v2529_v4 = vadd.f32 1.0, %v5712_v61  ;;  %v7834_v14 = vadd.f32 %v2452_v9, %v7825_v16  ;;  %v2455_v2 = vadd.f32 %v5277_v24, %v7705_v29  ;;  %v2446_v35 = vpop.f32.mrb[31].mxu1 }
 0x6b5   : > { %5733 = vrcp.f32 %v2526_v49  ;;  %v2527_v43 = vadd.f32 1.0, %v5714_v41  ;;  %v7838_v0 = vadd.f32 %v2444_v44, %v7817_v38  ;;  %v2447_v13 = vadd.f32 %v7705_v29, %v2446_v35 }
 0x6b6   : > { %v5716_v30 = vpop.eup %5715  ;;  %5735 = vrcp.f32 %v2529_v4  ;;  %v4980_v48 = vmul.f32 -1.442695, %v7834_v14  ;;  %v7843_v60 = vadd.f32 %v2455_v2, %v7831_v58 }
 0x6b7   : > { %v5718_v45 = vpop.eup %5717  ;;  %5737 = vrcp.f32 %v2527_v43  ;;  %v4978_v40 = vmul.f32 -1.442695, %v7838_v0  ;;  %v7847_v36 = vadd.f32 %v2447_v13, %v7821_v6  ;;  %v7860_v37 = vmul.f32 %v5716_v30, %v7718_v42 }
 0x6b8   : > { %v5720_v10 = vpop.eup %5719  ;;  %5739 = vpow2.f32 %v4980_v48  ;;  %v4981_v46 = vmul.f32 -1.442695, %v7843_v60  ;;  %v7851_v29 = vmul.f32 %v5718_v45, %v7726_v25 }
 0x6b9   : > { %v5722_v47 = vpop.eup %5721  ;;  %5741 = vpow2.f32 %v4978_v40  ;;  %v4979_v53 = vmul.f32 -1.442695, %v7847_v36  ;;  %v7865_v11 = vmul.f32 %v5720_v10, %v7735_v26  ;;  %v2594_v3 = vsel %vm1005_vm3, %v7860_v37, 0.0 }
 0x6ba   : > { %v5724_v39 = vpop.eup %5723  ;;  %5743 = vpow2.f32 %v4981_v46  ;;  %v2588_v51 = vsel %vm1005_vm3, %v7851_v29, 0.0  ;;  %v7857_v50 = vmul.f32 %v5722_v47, %v7739_v17 }
 0x6bb   : > { %v5726_v15 = vpop.eup %5725  ;;  %v2532_v56 = vadd.f32 1.0, %v5724_v39  ;;  %5745 = vpow2.f32 %v4979_v53  ;;  %2589 = vadd.xlane.f32.xlu1 %v2588_v51  ;;  %v2597_v44 = vsel %vm1005_vm3, %v7865_v11, 0.0 }
 0x6bc   : > { %v5728_v25 = vpop.eup %5727  ;;  %v2530_v28 = vadd.f32 1.0, %v5726_v15  ;;  %v2591_v31 = vsel %vm1005_vm3, %v7857_v50, 0.0 }
 0x6bd   : > { %v5730_v32 = vpop.eup %5729  ;;  %5747 = vrcp.f32 %v2532_v56  ;;  %v2533_v9 = vadd.f32 1.0, %v5728_v25  ;;  %2592 = vadd.xlane.f32.xlu0 %v2591_v31 }
 0x6be   : > { %v5732_v17 = vpop.eup %5731  ;;  %5749 = vrcp.f32 %v2530_v28  ;;  %v2531_v42 = vadd.f32 1.0, %v5730_v32 }
 0x6bf   : > { %v5734_v61 = vpop.eup %5733  ;;  %5751 = vrcp.f32 %v2533_v9  ;;  %2595 = vadd.xlane.f32.xlu1 %v2594_v3  ;;  %v7880_v35 = vmul.f32 %v5732_v17, %v7754_v19 }
 0x6c0   : > { %v5736_v49 = vpop.eup %5735  ;;  %5753 = vrcp.f32 %v2531_v42  ;;  %v7872_v26 = vmul.f32 %v5734_v61, %v7762_v7 }
 0x6c1   : > { %v5738_v24 = vpop.eup %5737  ;;  %2598 = vadd.xlane.f32.xlu0 %v2597_v44  ;;  %v7885_v45 = vmul.f32 %v5736_v49, %v7771_v34  ;;  %v2606_v19 = vsel %vm1005_vm3, %v7880_v35, 0.0 }
 0x6c2   : > { %v5740_v41 = vpop.eup %5739  ;;  %v2600_v4 = vsel %vm1005_vm3, %v7872_v26, 0.0  ;;  %v7877_v2 = vmul.f32 %v5738_v24, %v7775_v54 }
 0x6c3   : > { %v5742_v43 = vpop.eup %5741  ;;  %v2536_v13 = vadd.f32 1.0, %v5740_v41  ;;  %2601 = vadd.xlane.f32.xlu1 %v2600_v4  ;;  %v2609_v53 = vsel %vm1005_vm3, %v7885_v45, 0.0 }
 0x6c4   : > { %v5744_v30 = vpop.eup %5743  ;;  %v2534_v48 = vadd.f32 1.0, %v5742_v43  ;;  %v2603_v7 = vsel %vm1005_vm3, %v7877_v2, 0.0 }
 0x6c5   : > { %v5746_v40 = vpop.eup %5745  ;;  %5755 = vrcp.f32 %v2536_v13  ;;  %v2537_v10 = vadd.f32 1.0, %v5744_v30  ;;  %2604 = vadd.xlane.f32.xlu0 %v2603_v7 }
 0x6c6   : > { %5757 = vrcp.f32 %v2534_v48  ;;  %v2535_v54 = vadd.f32 1.0, %v5746_v40 }
 0x6c7   : > { %v5748_v46 = vpop.eup %5747  ;;  %5759 = vrcp.f32 %v2537_v10  ;;  %2607 = vadd.xlane.f32.xlu1 %v2606_v19 }
 0x6c8   : > { %v5750_v47 = vpop.eup %5749  ;;  %5761 = vrcp.f32 %v2535_v54  ;;  %v7900_v25 = vmul.f32 %v5748_v46, %v7798_v23 }
 0x6c9   : > { %v5752_v39 = vpop.eup %5751  ;;  %2610 = vadd.xlane.f32.xlu0 %v2609_v53  ;;  %v7892_v34 = vmul.f32 %v5750_v47, %v7802_v62 }
 0x6ca   : > { %v5754_v51 = vpop.eup %5753  ;;  %v7905_v31 = vmul.f32 %v5752_v39, %v7807_v21  ;;  %v2618_v32 = vsel %vm1005_vm3, %v7900_v25, 0.0 }
 0x6cb   : > { %v2612_v15 = vsel %vm1005_vm3, %v7892_v34, 0.0  ;;  %v7897_v56 = vmul.f32 %v5754_v51, %v7811_v20 }
 0x6cc   : > { %2613 = vadd.xlane.f32.xlu1 %v2612_v15  ;;  %v2621_v20 = vsel %vm1005_vm3, %v7905_v31, 0.0 }
 0x6cd   : > { %v2615_v28 = vsel %vm1005_vm3, %v7897_v56, 0.0 }
 0x6ce   : > { %2616 = vadd.xlane.f32.xlu0 %v2615_v28 }
 0x6cf   : > { %v5756_v62 = vpop.eup %5755 }
 0x6d0   : > { %v5758_v9 = vpop.eup %5757  ;;  %2619 = vadd.xlane.f32.xlu1 %v2618_v32  ;;  %v7920_v61 = vmul.f32 %v5756_v62, %v7834_v14 }
 0x6d1   : > { %v5760_v17 = vpop.eup %5759  ;;  %v7912_v23 = vmul.f32 %v5758_v9, %v7838_v0 }
 0x6d2   : > { %v5762_v42 = vpop.eup %5761  ;;  %2622 = vadd.xlane.f32.xlu0 %v2621_v20  ;;  %v7925_v44 = vmul.f32 %v5760_v17, %v7843_v60  ;;  %v2630_v0 = vsel %vm1005_vm3, %v7920_v61, 0.0 }
 0x6d3   : > { %v2624_v21 = vsel %vm1005_vm3, %v7912_v23, 0.0  ;;  %v7917_v3 = vmul.f32 %v5762_v42, %v7847_v36 }
 0x6d4   : > { %2625 = vadd.xlane.f32.xlu1 %v2624_v21  ;;  %v2633_v24 = vsel %vm1005_vm3, %v7925_v44, 0.0 }
 0x6d5   : > { %v2627_v49 = vsel %vm1005_vm3, %v7917_v3, 0.0 }
 0x6d6   : > { %2628 = vadd.xlane.f32.xlu0 %v2627_v49 }
 0x6d8   : > { %2631 = vadd.xlane.f32.xlu1 %v2630_v0 }
 0x6da   : > { %2634 = vadd.xlane.f32.xlu0 %v2633_v24 }
 0x748   : > { %v2590_v36 = vpop.xlane.xlu1 %2589 }
 0x749   : > { %v2636_v41 = vmul.f32 0.03125, %v2590_v36 }
 0x74a   : > { %v2593_v14 = vpop.xlane.xlu0 %2592 }
 0x74b   : > { %v7932_v4 = vsub.f32 %v7851_v29, %v2636_v41  ;;  %v2637_v43 = vmul.f32 0.03125, %v2593_v14 }
 0x74c   : > { %v2596_v13 = vpop.xlane.xlu1 %2595 }
 0x74d   : > { %v7935_v60 = vsub.f32 %v7857_v50, %v2637_v43  ;;  %v2638_v30 = vmul.f32 0.03125, %v2596_v13  ;;  %v2668_v48 = vmul.f32 %v7932_v4, %v7932_v4 }
 0x74e   : > { %v2599_v7 = vpop.xlane.xlu0 %2598 }
 0x74f   : > { %v7940_v40 = vsub.f32 %v7860_v37, %v2638_v30  ;;  %v2639_v10 = vmul.f32 0.03125, %v2599_v7  ;;  %v2684_v54 = vsel %vm1005_vm3, %v2668_v48, 0.0  ;;  %v2669_v29 = vmul.f32 %v7935_v60, %v7935_v60 }
 0x750   : > { %v2602_v19 = vpop.xlane.xlu1 %2601  ;;  %2685 = vadd.xlane.f32.xlu1 %v2684_v54 }
 0x751   : > { %v7946_v46 = vsub.f32 %v7865_v11, %v2639_v10  ;;  %v2640_v50 = vmul.f32 0.03125, %v2602_v19  ;;  %v2687_v47 = vsel %vm1005_vm3, %v2669_v29, 0.0  ;;  %v2670_v53 = vmul.f32 %v7940_v40, %v7940_v40 }
 0x752   : > { %2688 = vadd.xlane.f32.xlu0 %v2687_v47  ;;  %v2605_v37 = vpop.xlane.xlu0 %2604 }
 0x753   : > { %v7952_v39 = vsub.f32 %v7872_v26, %v2640_v50  ;;  %v2641_v51 = vmul.f32 0.03125, %v2605_v37  ;;  %v2690_v15 = vsel %vm1005_vm3, %v2670_v53, 0.0  ;;  %v2671_v28 = vmul.f32 %v7946_v46, %v7946_v46 }
 0x754   : > { %v2608_v62 = vpop.xlane.xlu1 %2607  ;;  %2691 = vadd.xlane.f32.xlu1 %v2690_v15 }
 0x755   : > { %v7958_v11 = vsub.f32 %v7877_v2, %v2641_v51  ;;  %v2642_v32 = vmul.f32 0.03125, %v2608_v62  ;;  %v2693_v9 = vsel %vm1005_vm3, %v2671_v28, 0.0  ;;  %v2672_v17 = vmul.f32 %v7952_v39, %v7952_v39 }
 0x756   : > { %2694 = vadd.xlane.f32.xlu0 %v2693_v9  ;;  %v2611_v26 = vpop.xlane.xlu0 %2610 }
 0x757   : > { %v7964_v20 = vsub.f32 %v7880_v35, %v2642_v32  ;;  %v2643_v42 = vmul.f32 0.03125, %v2611_v26  ;;  %v2696_v21 = vsel %vm1005_vm3, %v2672_v17, 0.0  ;;  %v2673_v49 = vmul.f32 %v7958_v11, %v7958_v11 }
 0x758   : > { %2697 = vadd.xlane.f32.xlu1 %v2696_v21 }
 0x759   : > { %v7970_v2 = vsub.f32 %v7885_v45, %v2643_v42  ;;  %v2614_v0 = vpop.xlane.xlu1 %2613  ;;  %v2699_v24 = vsel %vm1005_vm3, %v2673_v49, 0.0  ;;  %v2674_v36 = vmul.f32 %v7964_v20, %v7964_v20 }
 0x75a   : > { %v2644_v41 = vmul.f32 0.03125, %v2614_v0  ;;  %2700 = vadd.xlane.f32.xlu0 %v2699_v24 }
 0x75b   : > { %v2617_v35 = vpop.xlane.xlu0 %2616  ;;  %v2702_v14 = vsel %vm1005_vm3, %v2674_v36, 0.0  ;;  %v2675_v43 = vmul.f32 %v7970_v2, %v7970_v2 }
 0x75c   : > { %v7979_v13 = vsub.f32 %v7892_v34, %v2644_v41  ;;  %v2645_v30 = vmul.f32 0.03125, %v2617_v35  ;;  %2703 = vadd.xlane.f32.xlu1 %v2702_v14 }
 0x75d   : > { %v2620_v45 = vpop.xlane.xlu1 %2619  ;;  %v2705_v48 = vsel %vm1005_vm3, %v2675_v43, 0.0 }
 0x75e   : > { %v7983_v7 = vsub.f32 %v7897_v56, %v2645_v30  ;;  %v2646_v10 = vmul.f32 0.03125, %v2620_v45  ;;  %2706 = vadd.xlane.f32.xlu0 %v2705_v48  ;;  %v2676_v54 = vmul.f32 %v7979_v13, %v7979_v13  ;;  %v5466_v30 = vld [vmem:[%s9606_s3 + $0x28] sm:$0xff]  }
 0x75f   : > { %v2623_v29 = vpop.xlane.xlu0 %2622 }
 0x760   : > { %v7988_v19 = vsub.f32 %v7900_v25, %v2646_v10  ;;  %v2647_v50 = vmul.f32 0.03125, %v2623_v29  ;;  %v2708_v34 = vsel %vm1005_vm3, %v2676_v54, 0.0  ;;  %v2677_v47 = vmul.f32 %v7983_v7, %v7983_v7 }
 0x761   : > { %2709 = vadd.xlane.f32.xlu1 %v2708_v34  ;;  %v2626_v53 = vpop.xlane.xlu1 %2625 }
 0x762   : > { %v7994_v56 = vsub.f32 %v7905_v31, %v2647_v50  ;;  %v2648_v37 = vmul.f32 0.03125, %v2626_v53  ;;  %v2711_v51 = vsel %vm1005_vm3, %v2677_v47, 0.0  ;;  %v2678_v15 = vmul.f32 %v7988_v19, %v7988_v19 }
 0x763   : > { %2712 = vadd.xlane.f32.xlu0 %v2711_v51  ;;  %v2629_v25 = vpop.xlane.xlu0 %2628 }
 0x764   : > { %v8000_v28 = vsub.f32 %v7912_v23, %v2648_v37  ;;  %v2649_v62 = vmul.f32 0.03125, %v2629_v25  ;;  %v2714_v32 = vsel %vm1005_vm3, %v2678_v15, 0.0  ;;  %v2679_v9 = vmul.f32 %v7994_v56, %v7994_v56 }
 0x765   : > { %2715 = vadd.xlane.f32.xlu1 %v2714_v32  ;;  %v2632_v31 = vpop.xlane.xlu1 %2631 }
 0x766   : > { %v8006_v17 = vsub.f32 %v7917_v3, %v2649_v62  ;;  %v2650_v26 = vmul.f32 0.03125, %v2632_v31  ;;  %v2717_v42 = vsel %vm1005_vm3, %v2679_v9, 0.0  ;;  %v2680_v21 = vmul.f32 %v8000_v28, %v8000_v28 }
 0x767   : > { %2718 = vadd.xlane.f32.xlu0 %v2717_v42  ;;  %v2635_v23 = vpop.xlane.xlu0 %2634 }
 0x768   : > { %v8012_v49 = vsub.f32 %v7920_v61, %v2650_v26  ;;  %v2651_v0 = vmul.f32 0.03125, %v2635_v23  ;;  %v2720_v24 = vsel %vm1005_vm3, %v2680_v21, 0.0  ;;  %v2681_v36 = vmul.f32 %v8006_v17, %v8006_v17 }
 0x769   : > { %2721 = vadd.xlane.f32.xlu1 %v2720_v24 }
 0x76a   : > { %v8018_v3 = vsub.f32 %v7925_v44, %v2651_v0  ;;  %v2723_v41 = vsel %vm1005_vm3, %v2681_v36, 0.0  ;;  %v2682_v35 = vmul.f32 %v8012_v49, %v8012_v49  ;;  %v5465_v44 = vld [vmem:[%s9606_s3 + $0x20] sm:$0xff]  }
 0x76b   : > { %2724 = vadd.xlane.f32.xlu0 %v2723_v41  ;;  %5278 = vmatprep.subr.bf16.mxu0 %v5465_v44  ;;  %v8036_v41 = vld [vmem:[%s9607_s4 + $0x7] ss:$0 sm:$0xff] }
 0x76c   : > { %v2726_v14 = vsel %vm1005_vm3, %v2682_v35, 0.0  ;;  %v2683_v61 = vmul.f32 %v8018_v3, %v8018_v3  ;;  %5279 = vmatpush3.bf16.msra.mxu0 %v5465_v44 }
 0x76d   : > { %2727 = vadd.xlane.f32.xlu1 %v2726_v14  ;;  %5280 = vmatprep.subr.bf16.mxu0 %v5466_v30 }
 0x76e   : > { %v2729_v43 = vsel %vm1005_vm3, %v2683_v61, 0.0 }
 0x76f   : > { %2730 = vadd.xlane.f32.xlu0 %v2729_v43 }
 0x770   : > { %5281 = vmatpush3.bf16.msra.mxu0 %v5466_v30 }
 0x7dd   : > { %v2686_v45 = vpop.xlane.xlu1 %2685 }
 0x7de   : > { %v2732_v48 = vmul.f32 0.03125, %v2686_v45 }
 0x7df   : > { %v2689_v10 = vpop.xlane.xlu0 %2688 }
 0x7e0   : > { %v2748_v54 = vadd.f32 0.1, %v2732_v48  ;;  %v2733_v29 = vmul.f32 0.03125, %v2689_v10 }
 0x7e1   : > { %v2692_v50 = vpop.xlane.xlu1 %2691 }
 0x7e2   : > { %5763 = vrsqrt.f32 %v2748_v54  ;;  %v2749_v34 = vadd.f32 0.1, %v2733_v29  ;;  %v2734_v47 = vmul.f32 0.03125, %v2692_v50  ;;  %v8044_v50 = vld [vmem:[%s9607_s4 + $0xc] ss:$0 sm:$0xff] }
 0x7e3   : > { %v2695_v53 = vpop.xlane.xlu0 %2694 }
 0x7e4   : > { %5765 = vrsqrt.f32 %v2749_v34  ;;  %v2750_v37 = vadd.f32 0.1, %v2734_v47  ;;  %v2735_v51 = vmul.f32 0.03125, %v2695_v53 }
 0x7e5   : > { %v2698_v15 = vpop.xlane.xlu1 %2697 }
 0x7e6   : > { %5767 = vrsqrt.f32 %v2750_v37  ;;  %v2751_v25 = vadd.f32 0.1, %v2735_v51  ;;  %v2736_v62 = vmul.f32 0.03125, %v2698_v15 }
 0x7e7   : > { %v2701_v32 = vpop.xlane.xlu0 %2700 }
 0x7e8   : > { %5769 = vrsqrt.f32 %v2751_v25  ;;  %v2752_v9 = vadd.f32 0.1, %v2736_v62  ;;  %v2737_v31 = vmul.f32 0.03125, %v2701_v32 }
 0x7e9   : > { %v2704_v26 = vpop.xlane.xlu1 %2703 }
 0x7ea   : > { %5771 = vrsqrt.f32 %v2752_v9  ;;  %v2753_v42 = vadd.f32 0.1, %v2737_v31  ;;  %v2738_v21 = vmul.f32 0.03125, %v2704_v26 }
 0x7eb   : > { %v2707_v23 = vpop.xlane.xlu0 %2706 }
 0x7ec   : > { %v5764_v0 = vpop.eup %5763  ;;  %5773 = vrsqrt.f32 %v2753_v42  ;;  %v2754_v24 = vadd.f32 0.1, %v2738_v21  ;;  %v2739_v36 = vmul.f32 0.03125, %v2707_v23 }
 0x7ed   : > { %v2780_v35 = vmul.f32 %v5764_v0, %v7932_v4 }
 0x7ee   : > { %v5766_v14 = vpop.eup %5765  ;;  %5775 = vrsqrt.f32 %v2754_v24  ;;  %v2755_v61 = vadd.f32 0.1, %v2739_v36  ;;  %v2710_v43 = vpop.xlane.xlu1 %2709 }
 0x7ef   : > { %v2740_v44 = vmul.f32 0.03125, %v2710_v43  ;;  %v2781_v30 = vmul.f32 %v5766_v14, %v7935_v60  ;;  %v2800_v10 = vmul.f32 %v8036_v41, %v2780_v35 }
 0x7f0   : > { %v5768_v45 = vpop.eup %5767  ;;  %5777 = vrsqrt.f32 %v2755_v61  ;;  %v2713_v48 = vpop.xlane.xlu0 %2712 }
 0x7f1   : > { %v2756_v54 = vadd.f32 0.1, %v2740_v44  ;;  %v2741_v29 = vmul.f32 0.03125, %v2713_v48  ;;  %v2801_v4 = vmul.f32 %v8036_v41, %v2781_v30  ;;  %v2782_v53 = vmul.f32 %v5768_v45, %v7940_v40 }
 0x7f2   : > { %v5770_v34 = vpop.eup %5769  ;;  %v2716_v47 = vpop.xlane.xlu1 %2715  ;;  %v8052_v62 = vadd.f32 %v8044_v50, %v2800_v10 }
 0x7f3   : > { %5779 = vrsqrt.f32 %v2756_v54  ;;  %v2757_v60 = vadd.f32 0.1, %v2741_v29  ;;  %v2742_v37 = vmul.f32 0.03125, %v2716_v47  ;;  %v8049_v51 = vadd.f32 %v8044_v50, %v2801_v4 }
 0x7f4   : > { %v5772_v15 = vpop.eup %5771  ;;  %v2719_v25 = vpop.xlane.xlu0 %2718  ;;  %v2783_v32 = vmul.f32 %v5770_v34, %v7946_v46  ;;  %v2802_v9 = vmul.f32 %v8036_v41, %v2782_v53 }
 0x7f5   : > { %5781 = vrsqrt.f32 %v2757_v60  ;;  %v2758_v31 = vadd.f32 0.1, %v2742_v37  ;;  %v2743_v26 = vmul.f32 0.03125, %v2719_v25  ;;  %v2852_v21 = vpack.c.bf16 %v8049_v51, %v8052_v62 }
 0x7f6   : > { %v5774_v42 = vpop.eup %5773  ;;  %v2722_v40 = vpop.xlane.xlu1 %2721  ;;  %v2803_v23 = vmul.f32 %v8036_v41, %v2783_v32  ;;  %v2784_v0 = vmul.f32 %v5772_v15, %v7952_v39  ;;  %v8063_v61 = vadd.f32 %v8044_v50, %v2802_v9 }
 0x7f7   : > { %5783 = vrsqrt.f32 %v2758_v31  ;;  %v2759_v24 = vadd.f32 0.1, %v2743_v26  ;;  %v2744_v36 = vmul.f32 0.03125, %v2722_v40  ;;  %v2785_v35 = vmul.f32 %v5774_v42, %v7958_v11  ;;  %5282 = vmatprep.mubr.msk.bf16.mxu0 %vm1005_vm3, %v2852_v21 }
 0x7f8   : > { %v5776_v46 = vpop.eup %5775  ;;  %v2725_v14 = vpop.xlane.xlu0 %2724  ;;  %v8066_v43 = vadd.f32 %v8044_v50, %v2803_v23  ;;  %v2804_v44 = vmul.f32 %v8036_v41, %v2784_v0 }
 0x7f9   : > { %5785 = vrsqrt.f32 %v2759_v24  ;;  %v2760_v30 = vadd.f32 0.1, %v2744_v36  ;;  %v2745_v39 = vmul.f32 0.03125, %v2725_v14  ;;  %v2805_v45 = vmul.f32 %v8036_v41, %v2785_v35 }
 0x7fa   : > { %v5778_v48 = vpop.eup %5777  ;;  %v2728_v10 = vpop.xlane.xlu1 %2727  ;;  %v2853_v11 = vpack.c.bf16 %v8066_v43, %v8063_v61  ;;  %v8073_v54 = vadd.f32 %v8044_v50, %v2804_v44  ;;  %v2786_v29 = vmul.f32 %v5776_v46, %v7964_v20 }
 0x7fb   : > { %5787 = vrsqrt.f32 %v2760_v30  ;;  %v2761_v4 = vadd.f32 0.1, %v2745_v39  ;;  %v2746_v34 = vmul.f32 0.03125, %v2728_v10  ;;  %v8077_v47 = vadd.f32 %v8044_v50, %v2805_v45 }
 0x7fc   : > { %5283 = vmatmul.mubr.msk.bf16.vlgmr.msra.gmra.mrb[0].mxu0 %vm1005_vm3, %v2853_v11  ;;  %v2731_v53 = vpop.xlane.xlu0 %2730  ;;  %v2787_v60 = vmul.f32 %v5778_v48, %v7970_v2  ;;  %v2806_v37 = vmul.f32 %v8036_v41, %v2786_v29 }
 0x7fd   : > { %v5780_v15 = vpop.eup %5779  ;;  %5789 = vrsqrt.f32 %v2761_v4  ;;  %v2762_v25 = vadd.f32 0.1, %v2746_v34  ;;  %v2747_v32 = vmul.f32 0.03125, %v2731_v53  ;;  %v2854_v20 = vpack.c.bf16 %v8077_v47, %v8073_v54 }
 0x7fe   : > { %v2807_v9 = vmul.f32 %v8036_v41, %v2787_v60  ;;  %v2788_v31 = vmul.f32 %v5780_v15, %v7979_v13  ;;  %v8088_v2 = vadd.f32 %v8044_v50, %v2806_v37 }
 0x7ff   : > { %v5782_v26 = vpop.eup %5781  ;;  %5791 = vrsqrt.f32 %v2762_v25  ;;  %v2763_v42 = vadd.f32 0.1, %v2747_v32  ;;  %5286 = vmatprep.mubr.msk.bf16.mxu0 %vm1005_vm3, %v2854_v20 }
 0x800   : > { %v8091_v40 = vadd.f32 %v8044_v50, %v2807_v9  ;;  %v2789_v21 = vmul.f32 %v5782_v26, %v7983_v7  ;;  %v2808_v23 = vmul.f32 %v8036_v41, %v2788_v31  ;;  %v8155_v26 = vadd.f32 %v8063_v61, %v7709_v55 }
 0x801   : > { %v5784_v0 = vpop.eup %5783  ;;  %5793 = vrsqrt.f32 %v2763_v42 }
 0x802   : > { %v2855_v13 = vpack.c.bf16 %v8091_v40, %v8088_v2  ;;  %v2809_v24 = vmul.f32 %v8036_v41, %v2789_v21  ;;  %v2790_v36 = vmul.f32 %v5784_v0, %v7988_v19  ;;  %v8101_v46 = vadd.f32 %v8044_v50, %v2808_v23 }
 0x803   : > { %v5786_v35 = vpop.eup %5785  ;;  %v8160_v21 = vadd.f32 %v8052_v62, %v7714_v12 }
 0x804   : > { %5287 = vmatmul.mubr.msk.bf16.gmra.mrb[4].mxu0 %vm1005_vm3, %v2855_v13  ;;  %v8104_v14 = vadd.f32 %v8044_v50, %v2809_v24  ;;  %v2791_v7 = vmul.f32 %v5786_v35, %v7994_v56  ;;  %v2810_v44 = vmul.f32 %v8036_v41, %v2790_v36  ;;  %v8168_v24 = vadd.f32 %v8066_v43, %v7722_v63 }
 0x805   : > { %v5788_v30 = vpop.eup %5787  ;;  %v8173_v36 = vadd.f32 %v8049_v51, %v7730_v8 }
 0x806   : > { %v2856_v39 = vpack.c.bf16 %v8104_v14, %v8101_v46  ;;  %v2811_v45 = vmul.f32 %v8036_v41, %v2791_v7  ;;  %v2792_v19 = vmul.f32 %v5788_v30, %v8000_v28  ;;  %v8114_v10 = vadd.f32 %v8044_v50, %v2810_v44 }
 0x807   : > { %v5790_v48 = vpop.eup %5789  ;;  %v8191_v30 = vadd.f32 %v8088_v2, %v7745_v18 }
 0x808   : > { %5290 = vmatprep.mubr.msk.bf16.mxu0 %vm1005_vm3, %v2856_v39  ;;  %v8117_v11 = vadd.f32 %v8044_v50, %v2811_v45  ;;  %v2793_v56 = vmul.f32 %v5790_v48, %v8006_v17  ;;  %v2812_v29 = vmul.f32 %v8036_v41, %v2792_v19  ;;  %v8196_v19 = vadd.f32 %v8073_v54, %v7750_v59 }
 0x809   : > { %v5792_v4 = vpop.eup %5791  ;;  %v8212_v59 = vadd.f32 %v8077_v47, %v7766_v52 }
 0x80a   : > { %v2857_v34 = vpack.c.bf16 %v8117_v11, %v8114_v10  ;;  %v2813_v53 = vmul.f32 %v8036_v41, %v2793_v56  ;;  %v2794_v28 = vmul.f32 %v5792_v4, %v8012_v49  ;;  %v8127_v37 = vadd.f32 %v8044_v50, %v2812_v29 }
 0x80b   : > { %v5794_v60 = vpop.eup %5793  ;;  %v8204_v4 = vadd.f32 %v8091_v40, %v7758_v27 }
 0x80c   : > { %5291 = vmatmul.mubr.msk.bf16.gmra.mrb[8].mxu0 %vm1005_vm3, %v2857_v34  ;;  %v8130_v15 = vadd.f32 %v8044_v50, %v2813_v53  ;;  %v2795_v17 = vmul.f32 %v5794_v60, %v8018_v3  ;;  %v2814_v25 = vmul.f32 %v8036_v41, %v2794_v28  ;;  %v8151_v3 = vld [vmem:[%s9607_s4 + $0x3] ss:$0 sm:$0xff] }
 0x80e   : > { %v2858_v32 = vpack.c.bf16 %v8130_v15, %v8127_v37  ;;  %v2815_v20 = vmul.f32 %v8036_v41, %v2795_v17  ;;  %v8139_v49 = vadd.f32 %v8044_v50, %v2814_v25  ;;  %v8227_v25 = vadd.f32 %v8114_v10, %v7785_v1 }
 0x810   : > { %5294 = vmatprep.mubr.msk.bf16.mxu0 %vm1005_vm3, %v2858_v32  ;;  %v8142_v9 = vadd.f32 %v8044_v50, %v2815_v20  ;;  %v8232_v20 = vadd.f32 %v8101_v46, %v7781_v22  ;;  %v8244_v22 = vadd.f32 %v8117_v11, %v7791_v33 }
 0x812   : > { %v2859_v31 = vpack.c.bf16 %v8142_v9, %v8139_v49 }
 0x814   : > { %5295 = vmatmul.mubr.msk.bf16.gmra.mrb[12].mxu0 %vm1005_vm3, %v2859_v31 }
 0x815   : > { %4026 = vmatprep.mubr.bf16.mxu0 %v6310_v57 }
 0x8cf   : > { %v5284_v41 = vpop.f32.mrb[0].mxu0 }
 0x8d0   : > { %v2949_v50 = vadd.f32 %v5284_v41, %v8151_v3  ;;  %v2940_v42 = vpop.f32.mrb[1].mxu0 }
 0x8d1   : > { %v2941_v23 = vadd.f32 %v8151_v3, %v2940_v42  ;;  %v5285_v0 = vpop.f32.mrb[2].mxu0 }
 0x8d2   : > { %v8164_v13 = vadd.f32 %v2949_v50, %v8155_v26  ;;  %v2952_v55 = vadd.f32 %v5285_v0, %v8151_v3  ;;  %v2943_v61 = vpop.f32.mrb[3].mxu0  ;;  %v8237_v0 = vadd.f32 %v8104_v14, %v7795_v5 }
 0x8d3   : > { %v8176_v12 = vadd.f32 %v2941_v23, %v8160_v21  ;;  %v2944_v62 = vadd.f32 %v8151_v3, %v2943_v61 }
 0x8d4   : > { %v5001_v35 = vmul.f32 -1.442695, %v8164_v13  ;;  %v8181_v7 = vadd.f32 %v2952_v55, %v8168_v24 }
 0x8d5   : > { %v4999_v63 = vmul.f32 -1.442695, %v8176_v12  ;;  %v8185_v43 = vadd.f32 %v2944_v62, %v8173_v36 }
 0x8d6   : > { %5795 = vpow2.f32 %v5001_v35  ;;  %v5002_v44 = vmul.f32 -1.442695, %v8181_v7 }
 0x8d7   : > { %5797 = vpow2.f32 %v4999_v63  ;;  %v5000_v8 = vmul.f32 -1.442695, %v8185_v43  ;;  %v5288_v51 = vpop.f32.mrb[4].mxu0 }
 0x8d8   : > { %5799 = vpow2.f32 %v5002_v44  ;;  %v2965_v39 = vadd.f32 %v5288_v51, %v8151_v3  ;;  %v2956_v45 = vpop.f32.mrb[5].mxu0 }
 0x8d9   : > { %5801 = vpow2.f32 %v5000_v8  ;;  %v2957_v48 = vadd.f32 %v8151_v3, %v2956_v45  ;;  %v5289_v56 = vpop.f32.mrb[6].mxu0 }
 0x8da   : > { %v8200_v29 = vadd.f32 %v2965_v39, %v8191_v30  ;;  %v2968_v18 = vadd.f32 %v5289_v56, %v8151_v3  ;;  %v2959_v2 = vpop.f32.mrb[7].mxu0 }
 0x8db   : > { %v8208_v34 = vadd.f32 %v2957_v48, %v8196_v19  ;;  %v2960_v54 = vadd.f32 %v8151_v3, %v2959_v2  ;;  %v8263_v48 = vadd.f32 %v8127_v37, %v7817_v38  ;;  %v8277_v38 = vadd.f32 %v8142_v9, %v7831_v58 }
 0x8dc   : > { %v5005_v53 = vmul.f32 -1.442695, %v8200_v29  ;;  %v8217_v28 = vadd.f32 %v2968_v18, %v8204_v4  ;;  %v8267_v18 = vadd.f32 %v8139_v49, %v7825_v16 }
 0x8dd   : > { %v5003_v27 = vmul.f32 -1.442695, %v8208_v34  ;;  %v8221_v40 = vadd.f32 %v2960_v54, %v8212_v59 }
 0x8de   : > { %5803 = vpow2.f32 %v5005_v53  ;;  %v5006_v60 = vmul.f32 -1.442695, %v8217_v28  ;;  %v8272_v53 = vadd.f32 %v8130_v15, %v7821_v6 }
 0x8df   : > { %5805 = vpow2.f32 %v5003_v27  ;;  %v5004_v17 = vmul.f32 -1.442695, %v8221_v40  ;;  %v5292_v52 = vpop.f32.mrb[8].mxu0 }
 0x8e0   : > { %v5796_v47 = vpop.eup %5795  ;;  %5807 = vpow2.f32 %v5006_v60  ;;  %v2981_v32 = vadd.f32 %v5292_v52, %v8151_v3  ;;  %v2972_v31 = vpop.f32.mrb[9].mxu0 }
 0x8e1   : > { %v5798_v41 = vpop.eup %5797  ;;  %v3069_v50 = vadd.f32 1.0, %v5796_v47  ;;  %5809 = vpow2.f32 %v5004_v17  ;;  %v2973_v42 = vadd.f32 %v8151_v3, %v2972_v31  ;;  %v5293_v23 = vpop.f32.mrb[10].mxu0 }
 0x8e2   : > { %v5800_v55 = vpop.eup %5799  ;;  %v3067_v1 = vadd.f32 1.0, %v5798_v41  ;;  %v8240_v10 = vadd.f32 %v2981_v32, %v8227_v25  ;;  %v2984_v46 = vadd.f32 %v5293_v23, %v8151_v3  ;;  %v2975_v61 = vpop.f32.mrb[11].mxu0 }
 0x8e3   : > { %v5802_v62 = vpop.eup %5801  ;;  %5811 = vrcp.f32 %v3069_v50  ;;  %v3070_v35 = vadd.f32 1.0, %v5800_v55  ;;  %v8248_v63 = vadd.f32 %v2973_v42, %v8232_v20  ;;  %v2976_v5 = vadd.f32 %v8151_v3, %v2975_v61 }
 0x8e4   : > { %5813 = vrcp.f32 %v3067_v1  ;;  %v3068_v14 = vadd.f32 1.0, %v5802_v62  ;;  %v5009_v44 = vmul.f32 -1.442695, %v8240_v10  ;;  %v8253_v8 = vadd.f32 %v2984_v46, %v8244_v22 }
 0x8e5   : > { %5815 = vrcp.f32 %v3070_v35  ;;  %v5007_v33 = vmul.f32 -1.442695, %v8248_v63  ;;  %v8257_v11 = vadd.f32 %v2976_v5, %v8237_v0 }
 0x8e6   : > { %5817 = vrcp.f32 %v3068_v14  ;;  %v5010_v51 = vmul.f32 -1.442695, %v8253_v8 }
 0x8e7   : > { %5819 = vpow2.f32 %v5009_v44  ;;  %v5008_v39 = vmul.f32 -1.442695, %v8257_v11  ;;  %v5296_v45 = vpop.f32.mrb[12].mxu0 }
 0x8e8   : > { %v5804_v56 = vpop.eup %5803  ;;  %5821 = vpow2.f32 %v5007_v33  ;;  %v2997_v2 = vadd.f32 %v5296_v45, %v8151_v3  ;;  %v2988_v54 = vpop.f32.mrb[13].mxu0 }
 0x8e9   : > { %v5806_v27 = vpop.eup %5805  ;;  %v3073_v60 = vadd.f32 1.0, %v5804_v56  ;;  %5823 = vpow2.f32 %v5010_v51  ;;  %v2989_v17 = vadd.f32 %v8151_v3, %v2988_v54  ;;  %v5297_v37 = vpop.f32.mrb[14].mxu0 }
 0x8ea   : > { %v5808_v52 = vpop.eup %5807  ;;  %v3071_v16 = vadd.f32 1.0, %v5806_v27  ;;  %5825 = vpow2.f32 %v5008_v39  ;;  %v8280_v49 = vadd.f32 %v2997_v2, %v8267_v18  ;;  %v3000_v47 = vadd.f32 %v5297_v37, %v8151_v3  ;;  %v2991_v6 = vpop.f32.mrb[15].mxu0 }
 0x8eb   : > { %v5810_v15 = vpop.eup %5809  ;;  %5827 = vrcp.f32 %v3073_v60  ;;  %v3074_v32 = vadd.f32 1.0, %v5808_v52  ;;  %v8284_v31 = vadd.f32 %v2989_v17, %v8263_v48  ;;  %v2992_v41 = vadd.f32 %v8151_v3, %v2991_v6 }
 0x8ec   : > { %5829 = vrcp.f32 %v3071_v16  ;;  %v3072_v58 = vadd.f32 1.0, %v5810_v15  ;;  %v5013_v9 = vmul.f32 -1.442695, %v8280_v49  ;;  %v8289_v50 = vadd.f32 %v3000_v47, %v8277_v38 }
 0x8ed   : > { %v5812_v42 = vpop.eup %5811  ;;  %5831 = vrcp.f32 %v3074_v32  ;;  %v5011_v23 = vmul.f32 -1.442695, %v8284_v31  ;;  %v8293_v55 = vadd.f32 %v2992_v41, %v8272_v53 }
 0x8ee   : > { %v5814_v1 = vpop.eup %5813  ;;  %5833 = vrcp.f32 %v3072_v58  ;;  %v5014_v46 = vmul.f32 -1.442695, %v8289_v50  ;;  %v8306_v33 = vmul.f32 %v5812_v42, %v8164_v13 }
 0x8ef   : > { %v5816_v61 = vpop.eup %5815  ;;  %5835 = vpow2.f32 %v5013_v9  ;;  %v5012_v3 = vmul.f32 -1.442695, %v8293_v55  ;;  %v8298_v62 = vmul.f32 %v5814_v1, %v8176_v12 }
 0x8f0   : > { %v5818_v35 = vpop.eup %5817  ;;  %5837 = vpow2.f32 %v5011_v23  ;;  %v8311_v2 = vmul.f32 %v5816_v61, %v8181_v7  ;;  %v3139_v60 = vsel %vm1005_vm3, %v8306_v33, 0.0 }
 0x8f1   : > { %v5820_v5 = vpop.eup %5819  ;;  %5839 = vpow2.f32 %v5014_v46  ;;  %v3133_v14 = vsel %vm1005_vm3, %v8298_v62, 0.0  ;;  %v8303_v44 = vmul.f32 %v5818_v35, %v8185_v43 }
 0x8f2   : > { %v5822_v51 = vpop.eup %5821  ;;  %v3077_v39 = vadd.f32 1.0, %v5820_v5  ;;  %5841 = vpow2.f32 %v5012_v3  ;;  %3134 = vadd.xlane.f32.xlu1 %v3133_v14  ;;  %v3142_v52 = vsel %vm1005_vm3, %v8311_v2, 0.0 }
 0x8f3   : > { %v5824_v45 = vpop.eup %5823  ;;  %v3075_v12 = vadd.f32 1.0, %v5822_v51  ;;  %v3136_v56 = vsel %vm1005_vm3, %v8303_v44, 0.0 }
 0x8f4   : > { %v5826_v54 = vpop.eup %5825  ;;  %5843 = vrcp.f32 %v3077_v39  ;;  %v3078_v27 = vadd.f32 1.0, %v5824_v45  ;;  %3137 = vadd.xlane.f32.xlu0 %v3136_v56 }
 0x8f5   : > { %v5828_v43 = vpop.eup %5827  ;;  %5845 = vrcp.f32 %v3075_v12  ;;  %v3076_v13 = vadd.f32 1.0, %v5826_v54 }
 0x8f6   : > { %v5830_v17 = vpop.eup %5829  ;;  %5847 = vrcp.f32 %v3078_v27  ;;  %3140 = vadd.xlane.f32.xlu1 %v3139_v60  ;;  %v8326_v32 = vmul.f32 %v5828_v43, %v8200_v29 }
 0x8f7   : > { %v5832_v37 = vpop.eup %5831  ;;  %5849 = vrcp.f32 %v3076_v13  ;;  %v8318_v7 = vmul.f32 %v5830_v17, %v8208_v34 }
 0x8f8   : > { %v5834_v16 = vpop.eup %5833  ;;  %3143 = vadd.xlane.f32.xlu0 %v3142_v52  ;;  %v8331_v23 = vmul.f32 %v5832_v37, %v8217_v28  ;;  %v3151_v29 = vsel %vm1005_vm3, %v8326_v32, 0.0 }
 0x8f9   : > { %v5836_v47 = vpop.eup %5835  ;;  %v3145_v6 = vsel %vm1005_vm3, %v8318_v7, 0.0  ;;  %v8323_v15 = vmul.f32 %v5834_v16, %v8221_v40 }
 0x8fa   : > { %v5838_v41 = vpop.eup %5837  ;;  %v3081_v58 = vadd.f32 1.0, %v5836_v47  ;;  %3146 = vadd.xlane.f32.xlu1 %v3145_v6  ;;  %v3154_v35 = vsel %vm1005_vm3, %v8331_v23, 0.0 }
 0x8fb   : > { %v5840_v9 = vpop.eup %5839  ;;  %v3079_v42 = vadd.f32 1.0, %v5838_v41  ;;  %v3148_v34 = vsel %vm1005_vm3, %v8323_v15, 0.0 }
 0x8fc   : > { %v5842_v1 = vpop.eup %5841  ;;  %5851 = vrcp.f32 %v3081_v58  ;;  %v3082_v46 = vadd.f32 1.0, %v5840_v9  ;;  %3149 = vadd.xlane.f32.xlu0 %v3148_v34 }
 0x8fd   : > { %5853 = vrcp.f32 %v3079_v42  ;;  %v3080_v40 = vadd.f32 1.0, %v5842_v1 }
 0x8fe   : > { %v5844_v61 = vpop.eup %5843  ;;  %5855 = vrcp.f32 %v3082_v46  ;;  %3152 = vadd.xlane.f32.xlu1 %v3151_v29 }
 0x8ff   : > { %v5846_v3 = vpop.eup %5845  ;;  %5857 = vrcp.f32 %v3080_v40  ;;  %v8346_v45 = vmul.f32 %v5844_v61, %v8240_v10 }
 0x900   : > { %v5848_v5 = vpop.eup %5847  ;;  %3155 = vadd.xlane.f32.xlu0 %v3154_v35  ;;  %v8338_v28 = vmul.f32 %v5846_v3, %v8248_v63 }
 0x901   : > { %v5850_v14 = vpop.eup %5849  ;;  %v8351_v56 = vmul.f32 %v5848_v5, %v8253_v8  ;;  %v3163_v54 = vsel %vm1005_vm3, %v8346_v45, 0.0 }
 0x902   : > { %v3157_v51 = vsel %vm1005_vm3, %v8338_v28, 0.0  ;;  %v8343_v39 = vmul.f32 %v5850_v14, %v8257_v11 }
 0x903   : > { %3158 = vadd.xlane.f32.xlu1 %v3157_v51  ;;  %v3166_v11 = vsel %vm1005_vm3, %v8351_v56, 0.0 }
 0x904   : > { %v3160_v12 = vsel %vm1005_vm3, %v8343_v39, 0.0 }
 0x905   : > { %3161 = vadd.xlane.f32.xlu0 %v3160_v12 }
 0x906   : > { %v5852_v63 = vpop.eup %5851 }
 0x907   : > { %v5854_v27 = vpop.eup %5853  ;;  %3164 = vadd.xlane.f32.xlu1 %v3163_v54  ;;  %v8366_v17 = vmul.f32 %v5852_v63, %v8280_v49  ;;  %v5467_v49 = vld [vmem:[%s9606_s3 + $0x30] sm:$0xff]  }
 0x908   : > { %v5856_v43 = vpop.eup %5855  ;;  %v8358_v10 = vmul.f32 %v5854_v27, %v8284_v31  ;;  %5298 = vmatprep.subr.bf16.mxu1 %v5467_v49 }
 0x909   : > { %v5858_v13 = vpop.eup %5857  ;;  %3167 = vadd.xlane.f32.xlu0 %v3166_v11  ;;  %v8371_v52 = vmul.f32 %v5856_v43, %v8289_v50  ;;  %v3175_v31 = vsel %vm1005_vm3, %v8366_v17, 0.0  ;;  %5299 = vmatpush3.bf16.msra.mxu1 %v5467_v49 }
 0x90a   : > { %v3169_v8 = vsel %vm1005_vm3, %v8358_v10, 0.0  ;;  %v8363_v60 = vmul.f32 %v5858_v13, %v8293_v55 }
 0x90b   : > { %3170 = vadd.xlane.f32.xlu1 %v3169_v8  ;;  %v3178_v16 = vsel %vm1005_vm3, %v8371_v52, 0.0 }
 0x90c   : > { %v3172_v37 = vsel %vm1005_vm3, %v8363_v60, 0.0 }
 0x90d   : > { %3173 = vadd.xlane.f32.xlu0 %v3172_v37 }
 0x90f   : > { %3176 = vadd.xlane.f32.xlu1 %v3175_v31 }
 0x911   : > { %3179 = vadd.xlane.f32.xlu0 %v3178_v16 }
 0x97f   : > { %v3135_v55 = vpop.xlane.xlu1 %3134 }
 0x980   : > { %v3181_v47 = vmul.f32 0.03125, %v3135_v55 }
 0x981   : > { %v3138_v6 = vpop.xlane.xlu0 %3137 }
 0x982   : > { %v8381_v50 = vsub.f32 %v8298_v62, %v3181_v47  ;;  %v3182_v41 = vmul.f32 0.03125, %v3138_v6 }
 0x983   : > { %v3141_v58 = vpop.xlane.xlu1 %3140 }
 0x984   : > { %v8384_v9 = vsub.f32 %v8303_v44, %v3182_v41  ;;  %v3183_v42 = vmul.f32 0.03125, %v3141_v58  ;;  %v3213_v34 = vmul.f32 %v8381_v50, %v8381_v50 }
 0x985   : > { %v3144_v1 = vpop.xlane.xlu0 %3143 }
 0x986   : > { %v8389_v46 = vsub.f32 %v8306_v33, %v3183_v42  ;;  %v3184_v40 = vmul.f32 0.03125, %v3144_v1  ;;  %v3229_v29 = vsel %vm1005_vm3, %v3213_v34, 0.0  ;;  %v3214_v62 = vmul.f32 %v8384_v9, %v8384_v9 }
 0x987   : > { %v3147_v61 = vpop.xlane.xlu1 %3146  ;;  %3230 = vadd.xlane.f32.xlu1 %v3229_v29 }
 0x988   : > { %v8395_v3 = vsub.f32 %v8311_v2, %v3184_v40  ;;  %v3185_v44 = vmul.f32 0.03125, %v3147_v61  ;;  %v3232_v35 = vsel %vm1005_vm3, %v3214_v62, 0.0  ;;  %v3215_v5 = vmul.f32 %v8389_v46, %v8389_v46 }
 0x989   : > { %3233 = vadd.xlane.f32.xlu0 %v3232_v35  ;;  %v3150_v33 = vpop.xlane.xlu0 %3149 }
 0x98a   : > { %v8401_v14 = vsub.f32 %v8318_v7, %v3185_v44  ;;  %v3186_v51 = vmul.f32 0.03125, %v3150_v33  ;;  %v3235_v12 = vsel %vm1005_vm3, %v3215_v5, 0.0  ;;  %v3216_v63 = vmul.f32 %v8395_v3, %v8395_v3 }
 0x98b   : > { %v3153_v54 = vpop.xlane.xlu1 %3152  ;;  %3236 = vadd.xlane.f32.xlu1 %v3235_v12 }
 0x98c   : > { %v8407_v2 = vsub.f32 %v8323_v15, %v3186_v51  ;;  %v3187_v27 = vmul.f32 0.03125, %v3153_v54  ;;  %v3238_v43 = vsel %vm1005_vm3, %v3216_v63, 0.0  ;;  %v3217_v11 = vmul.f32 %v8401_v14, %v8401_v14 }
 0x98d   : > { %3239 = vadd.xlane.f32.xlu0 %v3238_v43  ;;  %v3156_v7 = vpop.xlane.xlu0 %3155 }
 0x98e   : > { %v8413_v13 = vsub.f32 %v8326_v32, %v3187_v27  ;;  %v3188_v8 = vmul.f32 0.03125, %v3156_v7  ;;  %v3241_v37 = vsel %vm1005_vm3, %v3217_v11, 0.0  ;;  %v3218_v31 = vmul.f32 %v8407_v2, %v8407_v2 }
 0x98f   : > { %3242 = vadd.xlane.f32.xlu1 %v3241_v37 }
 0x990   : > { %v8419_v15 = vsub.f32 %v8331_v23, %v3188_v8  ;;  %v3159_v16 = vpop.xlane.xlu1 %3158  ;;  %v3244_v49 = vsel %vm1005_vm3, %v3218_v31, 0.0  ;;  %v3219_v55 = vmul.f32 %v8413_v13, %v8413_v13 }
 0x991   : > { %v3189_v47 = vmul.f32 0.03125, %v3159_v16  ;;  %3245 = vadd.xlane.f32.xlu0 %v3244_v49 }
 0x992   : > { %v3162_v32 = vpop.xlane.xlu0 %3161  ;;  %v3247_v6 = vsel %vm1005_vm3, %v3219_v55, 0.0  ;;  %v3220_v41 = vmul.f32 %v8419_v15, %v8419_v15 }
 0x993   : > { %v8428_v58 = vsub.f32 %v8338_v28, %v3189_v47  ;;  %v3190_v42 = vmul.f32 0.03125, %v3162_v32  ;;  %3248 = vadd.xlane.f32.xlu1 %v3247_v6 }
 0x994   : > { %v3165_v23 = vpop.xlane.xlu1 %3164  ;;  %v3250_v34 = vsel %vm1005_vm3, %v3220_v41, 0.0 }
 0x995   : > { %v8432_v1 = vsub.f32 %v8343_v39, %v3190_v42  ;;  %v3191_v40 = vmul.f32 0.03125, %v3165_v23  ;;  %3251 = vadd.xlane.f32.xlu0 %v3250_v34  ;;  %v3221_v29 = vmul.f32 %v8428_v58, %v8428_v58 }
 0x996   : > { %v3168_v62 = vpop.xlane.xlu0 %3167 }
 0x997   : > { %v8437_v61 = vsub.f32 %v8346_v45, %v3191_v40  ;;  %v3192_v44 = vmul.f32 0.03125, %v3168_v62  ;;  %v3253_v28 = vsel %vm1005_vm3, %v3221_v29, 0.0  ;;  %v3222_v35 = vmul.f32 %v8432_v1, %v8432_v1 }
 0x998   : > { %3254 = vadd.xlane.f32.xlu1 %v3253_v28  ;;  %v3171_v5 = vpop.xlane.xlu1 %3170 }
 0x999   : > { %v8443_v39 = vsub.f32 %v8351_v56, %v3192_v44  ;;  %v3193_v33 = vmul.f32 0.03125, %v3171_v5  ;;  %v3256_v51 = vsel %vm1005_vm3, %v3222_v35, 0.0  ;;  %v3223_v12 = vmul.f32 %v8437_v61, %v8437_v61 }
 0x99a   : > { %3257 = vadd.xlane.f32.xlu0 %v3256_v51  ;;  %v3174_v45 = vpop.xlane.xlu0 %3173 }
 0x99b   : > { %v8449_v63 = vsub.f32 %v8358_v10, %v3193_v33  ;;  %v3194_v54 = vmul.f32 0.03125, %v3174_v45  ;;  %v3259_v27 = vsel %vm1005_vm3, %v3223_v12, 0.0  ;;  %v3224_v43 = vmul.f32 %v8443_v39, %v8443_v39 }
 0x99c   : > { %3260 = vadd.xlane.f32.xlu1 %v3259_v27  ;;  %v3177_v56 = vpop.xlane.xlu1 %3176 }
 0x99d   : > { %v8455_v11 = vsub.f32 %v8363_v60, %v3194_v54  ;;  %v3195_v7 = vmul.f32 0.03125, %v3177_v56  ;;  %v3262_v8 = vsel %vm1005_vm3, %v3224_v43, 0.0  ;;  %v3225_v37 = vmul.f32 %v8449_v63, %v8449_v63 }
 0x99e   : > { %3263 = vadd.xlane.f32.xlu0 %v3262_v8  ;;  %v3180_v10 = vpop.xlane.xlu0 %3179 }
 0x99f   : > { %v8461_v31 = vsub.f32 %v8366_v17, %v3195_v7  ;;  %v3196_v16 = vmul.f32 0.03125, %v3180_v10  ;;  %v3265_v49 = vsel %vm1005_vm3, %v3225_v37, 0.0  ;;  %v3226_v55 = vmul.f32 %v8455_v11, %v8455_v11 }
 0x9a0   : > { %3266 = vadd.xlane.f32.xlu1 %v3265_v49 }
 0x9a1   : > { %v8467_v60 = vsub.f32 %v8371_v52, %v3196_v16  ;;  %v3268_v47 = vsel %vm1005_vm3, %v3226_v55, 0.0  ;;  %v3227_v32 = vmul.f32 %v8461_v31, %v8461_v31  ;;  %v5468_v52 = vld [vmem:[%s9606_s3 + $0x38] sm:$0xff]   ;;  %v8482_v55 = vld [vmem:[%s9607_s4 + $0x8] ss:$0 sm:$0xff] }
 0x9a2   : > { %3269 = vadd.xlane.f32.xlu0 %v3268_v47  ;;  %5300 = vmatprep.subr.bf16.mxu1 %v5468_v52 }
 0x9a3   : > { %v3271_v6 = vsel %vm1005_vm3, %v3227_v32, 0.0  ;;  %v3228_v17 = vmul.f32 %v8467_v60, %v8467_v60  ;;  %5301 = vmatpush3.bf16.msra.mxu1 %v5468_v52 }
 0x9a4   : > { %3272 = vadd.xlane.f32.xlu1 %v3271_v6 }
 0x9a5   : > { %v3274_v41 = vsel %vm1005_vm3, %v3228_v17, 0.0 }
 0x9a6   : > { %3275 = vadd.xlane.f32.xlu0 %v3274_v41 }
 0xa14   : > { %v3231_v42 = vpop.xlane.xlu1 %3230 }
 0xa15   : > { %v3277_v23 = vmul.f32 0.03125, %v3231_v42 }
 0xa16   : > { %v3234_v34 = vpop.xlane.xlu0 %3233 }
 0xa17   : > { %v3293_v40 = vadd.f32 0.1, %v3277_v23  ;;  %v3278_v29 = vmul.f32 0.03125, %v3234_v34 }
 0xa18   : > { %v3237_v62 = vpop.xlane.xlu1 %3236 }
 0xa19   : > { %5859 = vrsqrt.f32 %v3293_v40  ;;  %v3294_v44 = vadd.f32 0.1, %v3278_v29  ;;  %v3279_v28 = vmul.f32 0.03125, %v3237_v62 }
 0xa1a   : > { %v3240_v35 = vpop.xlane.xlu0 %3239 }
 0xa1b   : > { %5861 = vrsqrt.f32 %v3294_v44  ;;  %v3295_v5 = vadd.f32 0.1, %v3279_v28  ;;  %v3280_v33 = vmul.f32 0.03125, %v3240_v35 }
 0xa1c   : > { %v3243_v51 = vpop.xlane.xlu1 %3242 }
 0xa1d   : > { %5863 = vrsqrt.f32 %v3295_v5  ;;  %v3296_v12 = vadd.f32 0.1, %v3280_v33  ;;  %v3281_v45 = vmul.f32 0.03125, %v3243_v51 }
 0xa1e   : > { %v3246_v54 = vpop.xlane.xlu0 %3245 }
 0xa1f   : > { %5865 = vrsqrt.f32 %v3296_v12  ;;  %v3297_v27 = vadd.f32 0.1, %v3281_v45  ;;  %v3282_v43 = vmul.f32 0.03125, %v3246_v54 }
 0xa20   : > { %v3249_v56 = vpop.xlane.xlu1 %3248 }
 0xa21   : > { %5867 = vrsqrt.f32 %v3297_v27  ;;  %v3298_v7 = vadd.f32 0.1, %v3282_v43  ;;  %v3283_v8 = vmul.f32 0.03125, %v3249_v56 }
 0xa22   : > { %v3252_v37 = vpop.xlane.xlu0 %3251 }
 0xa23   : > { %v5860_v10 = vpop.eup %5859  ;;  %5869 = vrsqrt.f32 %v3298_v7  ;;  %v3299_v16 = vadd.f32 0.1, %v3283_v8  ;;  %v3284_v49 = vmul.f32 0.03125, %v3252_v37 }
 0xa24   : > { %v3325_v47 = vmul.f32 %v5860_v10, %v8381_v50  ;;  %v8491_v50 = vld [vmem:[%s9607_s4 + $0xd] ss:$0 sm:$0xff] }
 0xa25   : > { %v5862_v32 = vpop.eup %5861  ;;  %5871 = vrsqrt.f32 %v3299_v16  ;;  %v3300_v6 = vadd.f32 0.1, %v3284_v49  ;;  %v3255_v17 = vpop.xlane.xlu1 %3254 }
 0xa26   : > { %v3285_v41 = vmul.f32 0.03125, %v3255_v17  ;;  %v3326_v52 = vmul.f32 %v5862_v32, %v8384_v9  ;;  %v3345_v34 = vmul.f32 %v8482_v55, %v3325_v47 }
 0xa27   : > { %v5864_v42 = vpop.eup %5863  ;;  %5873 = vrsqrt.f32 %v3300_v6  ;;  %v3258_v23 = vpop.xlane.xlu0 %3257 }
 0xa28   : > { %v3327_v40 = vmul.f32 %v5864_v42, %v8389_v46  ;;  %v3301_v29 = vadd.f32 0.1, %v3285_v41  ;;  %v3286_v62 = vmul.f32 0.03125, %v3258_v23  ;;  %v3346_v44 = vmul.f32 %v8482_v55, %v3326_v52 }
 0xa29   : > { %v5866_v28 = vpop.eup %5865  ;;  %v3261_v35 = vpop.xlane.xlu1 %3260  ;;  %v8497_v45 = vadd.f32 %v8491_v50, %v3345_v34 }
 0xa2a   : > { %v3347_v9 = vmul.f32 %v8482_v55, %v3327_v40  ;;  %v3328_v5 = vmul.f32 %v5866_v28, %v8395_v3  ;;  %5875 = vrsqrt.f32 %v3301_v29  ;;  %v3302_v33 = vadd.f32 0.1, %v3286_v62 }
 0xa2b   : > { %v5868_v51 = vpop.eup %5867  ;;  %v3287_v12 = vmul.f32 0.03125, %v3261_v35  ;;  %v3264_v46 = vpop.xlane.xlu0 %3263  ;;  %v8500_v54 = vadd.f32 %v8491_v50, %v3346_v44 }
 0xa2c   : > { %v3348_v27 = vmul.f32 %v8482_v55, %v3328_v5  ;;  %5877 = vrsqrt.f32 %v3302_v33  ;;  %v3288_v43 = vmul.f32 0.03125, %v3264_v46  ;;  %v8506_v37 = vadd.f32 %v8491_v50, %v3347_v9 }
 0xa2d   : > { %v5870_v56 = vpop.eup %5869  ;;  %v3303_v7 = vadd.f32 0.1, %v3287_v12  ;;  %v3267_v8 = vpop.xlane.xlu1 %3266  ;;  %v3397_v3 = vpack.c.bf16 %v8500_v54, %v8497_v45  ;;  %v3329_v10 = vmul.f32 %v5868_v51, %v8401_v14 }
 0xa2e   : > { %v3304_v16 = vadd.f32 0.1, %v3288_v43  ;;  %v3289_v49 = vmul.f32 0.03125, %v3267_v8  ;;  %v8510_v47 = vadd.f32 %v8491_v50, %v3348_v27  ;;  %v3330_v32 = vmul.f32 %v5870_v56, %v8407_v2 }
 0xa2f   : > { %v5872_v6 = vpop.eup %5871  ;;  %5879 = vrsqrt.f32 %v3303_v7  ;;  %5302 = vmatprep.mubr.msk.bf16.mxu1 %vm1005_vm3, %v3397_v3  ;;  %v3270_v17 = vpop.xlane.xlu0 %3269  ;;  %v3349_v41 = vmul.f32 %v8482_v55, %v3329_v10 }
 0xa30   : > { %5881 = vrsqrt.f32 %v3304_v16  ;;  %v3305_v52 = vadd.f32 0.1, %v3289_v49  ;;  %v3290_v42 = vmul.f32 0.03125, %v3270_v17  ;;  %v3398_v14 = vpack.c.bf16 %v8510_v47, %v8506_v37 }
 0xa31   : > { %v5874_v23 = vpop.eup %5873  ;;  %v3273_v34 = vpop.xlane.xlu1 %3272  ;;  %v3350_v40 = vmul.f32 %v8482_v55, %v3330_v32  ;;  %v3331_v29 = vmul.f32 %v5872_v6, %v8413_v13  ;;  %v8522_v35 = vadd.f32 %v8491_v50, %v3349_v41 }
 0xa32   : > { %5883 = vrsqrt.f32 %v3305_v52  ;;  %v3306_v2 = vadd.f32 0.1, %v3290_v42  ;;  %v3291_v62 = vmul.f32 0.03125, %v3273_v34  ;;  %5303 = vmatmul.mubr.msk.bf16.vlgmr.msra.gmra.mrb[32].mxu1 %vm1005_vm3, %v3398_v14  ;;  %v3332_v44 = vmul.f32 %v5874_v23, %v8419_v15 }
 0xa33   : > { %v3276_v28 = vpop.xlane.xlu0 %3275  ;;  %v8525_v9 = vadd.f32 %v8491_v50, %v3350_v40  ;;  %v3351_v5 = vmul.f32 %v8482_v55, %v3331_v29 }
 0xa34   : > { %v5876_v33 = vpop.eup %5875  ;;  %5885 = vrsqrt.f32 %v3306_v2  ;;  %v3307_v51 = vadd.f32 0.1, %v3291_v62  ;;  %v3292_v13 = vmul.f32 0.03125, %v3276_v28  ;;  %v3352_v12 = vmul.f32 %v8482_v55, %v3332_v44 }
 0xa35   : > { %v3399_v46 = vpack.c.bf16 %v8525_v9, %v8522_v35  ;;  %v3333_v15 = vmul.f32 %v5876_v33, %v8428_v58  ;;  %v8533_v56 = vadd.f32 %v8491_v50, %v3351_v5 }
 0xa36   : > { %v5878_v27 = vpop.eup %5877  ;;  %5887 = vrsqrt.f32 %v3307_v51  ;;  %v3308_v43 = vadd.f32 0.1, %v3292_v13  ;;  %v8536_v7 = vadd.f32 %v8491_v50, %v3352_v12 }
 0xa37   : > { %5306 = vmatprep.mubr.msk.bf16.mxu1 %vm1005_vm3, %v3399_v46  ;;  %v3334_v8 = vmul.f32 %v5878_v27, %v8432_v1  ;;  %v3353_v3 = vmul.f32 %v8482_v55, %v3333_v15 }
 0xa38   : > { %5889 = vrsqrt.f32 %v3308_v43  ;;  %v3400_v10 = vpack.c.bf16 %v8536_v7, %v8533_v56 }
 0xa39   : > { %v5880_v58 = vpop.eup %5879  ;;  %v3354_v16 = vmul.f32 %v8482_v55, %v3334_v8  ;;  %v8547_v6 = vadd.f32 %v8491_v50, %v3353_v3 }
 0xa3a   : > { %v5882_v49 = vpop.eup %5881  ;;  %5307 = vmatmul.mubr.msk.bf16.gmra.mrb[36].mxu1 %vm1005_vm3, %v3400_v10  ;;  %v3335_v32 = vmul.f32 %v5880_v58, %v8437_v61 }
 0xa3b   : > { %v8550_v17 = vadd.f32 %v8491_v50, %v3354_v16  ;;  %v3336_v1 = vmul.f32 %v5882_v49, %v8443_v39  ;;  %v3384_v16 = vadd.f32 %v8510_v47, %v8168_v24 }
 0xa3c   : > { %v5884_v41 = vpop.eup %5883  ;;  %v3355_v52 = vmul.f32 %v8482_v55, %v3335_v32 }
 0xa3d   : > { %v3401_v42 = vpack.c.bf16 %v8550_v17, %v8547_v6  ;;  %v3356_v14 = vmul.f32 %v8482_v55, %v3336_v1  ;;  %v3337_v23 = vmul.f32 %v5884_v41, %v8449_v63 }
 0xa3e   : > { %v5886_v34 = vpop.eup %5885  ;;  %v8560_v61 = vadd.f32 %v8491_v50, %v3355_v52 }
 0xa3f   : > { %5310 = vmatprep.mubr.msk.bf16.mxu1 %vm1005_vm3, %v3401_v42  ;;  %v8563_v40 = vadd.f32 %v8491_v50, %v3356_v14  ;;  %v3338_v39 = vmul.f32 %v5886_v34, %v8455_v11  ;;  %v3357_v29 = vmul.f32 %v8482_v55, %v3337_v23  ;;  %v3385_v23 = vadd.f32 %v8522_v35, %v8196_v19 }
 0xa40   : > { %v5888_v2 = vpop.eup %5887 }
 0xa41   : > { %v3402_v62 = vpack.c.bf16 %v8563_v40, %v8560_v61  ;;  %v3358_v44 = vmul.f32 %v8482_v55, %v3338_v39  ;;  %v3339_v63 = vmul.f32 %v5888_v2, %v8461_v31  ;;  %v8573_v5 = vadd.f32 %v8491_v50, %v3357_v29 }
 0xa42   : > { %v5890_v28 = vpop.eup %5889  ;;  %v3388_v2 = vadd.f32 %v8536_v7, %v8204_v4 }
 0xa43   : > { %5311 = vmatmul.mubr.msk.bf16.gmra.mrb[40].mxu1 %vm1005_vm3, %v3402_v62  ;;  %v8576_v33 = vadd.f32 %v8491_v50, %v3358_v44  ;;  %v3340_v11 = vmul.f32 %v5890_v28, %v8467_v60  ;;  %v3359_v51 = vmul.f32 %v8482_v55, %v3339_v63  ;;  %v8596_v60 = vld [vmem:[%s9607_s4 + $0x4] ss:$0 sm:$0xff] }
 0xa45   : > { %v3403_v13 = vpack.c.bf16 %v8576_v33, %v8573_v5  ;;  %v3360_v12 = vmul.f32 %v8482_v55, %v3340_v11  ;;  %v8585_v31 = vadd.f32 %v8491_v50, %v3359_v51  ;;  %v3383_v55 = vadd.f32 %v8506_v37, %v8155_v26 }
 0xa46   : > { %v3382_v26 = vadd.f32 %v8500_v54, %v8173_v36  ;;  %v3387_v36 = vadd.f32 %v8533_v56, %v8191_v30  ;;  %v3386_v30 = vadd.f32 %v8525_v9, %v8212_v59  ;;  %v3389_v59 = vadd.f32 %v8547_v6, %v8232_v20 }
 0xa47   : > { %5314 = vmatprep.mubr.msk.bf16.mxu1 %vm1005_vm3, %v3403_v13  ;;  %v8588_v46 = vadd.f32 %v8491_v50, %v3360_v12  ;;  %v3381_v50 = vadd.f32 %v8497_v45, %v8160_v21  ;;  %v3390_v20 = vadd.f32 %v8550_v17, %v8237_v0 }
 0xa49   : > { %v3404_v15 = vpack.c.bf16 %v8588_v46, %v8585_v31 }
 0xa4b   : > { %5315 = vmatmul.mubr.msk.bf16.gmra.mrb[44].mxu1 %vm1005_vm3, %v3404_v15  ;;  %v3391_v15 = vadd.f32 %v8560_v61, %v8227_v25 }
 0xb05   : > { %v5304_v27 = vpop.f32.mrb[32].mxu1 }
 0xb06   : > { %v3494_v43 = vadd.f32 %v5304_v27, %v8596_v60  ;;  %v3485_v8 = vpop.f32.mrb[33].mxu1 }
 0xb07   : > { %v3486_v3 = vadd.f32 %v8596_v60, %v3485_v8  ;;  %v5305_v10 = vpop.f32.mrb[34].mxu1 }
 0xb08   : > { %v8604_v58 = vadd.f32 %v3494_v43, %v3383_v55  ;;  %v3497_v49 = vadd.f32 %v5305_v10, %v8596_v60  ;;  %v3488_v32 = vpop.f32.mrb[35].mxu1 }
 0xb09   : > { %v8609_v1 = vadd.f32 %v3486_v3, %v3381_v50  ;;  %v3489_v37 = vadd.f32 %v8596_v60, %v3488_v32  ;;  %v3392_v3 = vadd.f32 %v8563_v40, %v8244_v22 }
 0xb0a   : > { %v5034_v21 = vmul.f32 -1.442695, %v8604_v58  ;;  %v8615_v45 = vadd.f32 %v3497_v49, %v3384_v16 }
 0xb0b   : > { %v5032_v41 = vmul.f32 -1.442695, %v8609_v1  ;;  %v8618_v52 = vadd.f32 %v3489_v37, %v3382_v26 }
 0xb0c   : > { %5891 = vpow2.f32 %v5034_v21  ;;  %v5035_v24 = vmul.f32 -1.442695, %v8615_v45 }
 0xb0d   : > { %5893 = vpow2.f32 %v5032_v41  ;;  %v5033_v47 = vmul.f32 -1.442695, %v8618_v52  ;;  %v5308_v42 = vpop.f32.mrb[36].mxu1 }
 0xb0e   : > { %5895 = vpow2.f32 %v5035_v24  ;;  %v3510_v54 = vadd.f32 %v5308_v42, %v8596_v60  ;;  %v3501_v14 = vpop.f32.mrb[37].mxu1  ;;  %v3393_v42 = vadd.f32 %v8573_v5, %v8263_v48  ;;  %v3396_v48 = vadd.f32 %v8588_v46, %v8277_v38 }
 0xb0f   : > { %5897 = vpow2.f32 %v5033_v47  ;;  %v3502_v34 = vadd.f32 %v8596_v60, %v3501_v14  ;;  %v5309_v39 = vpop.f32.mrb[38].mxu1 }
 0xb10   : > { %v8628_v29 = vadd.f32 %v3510_v54, %v3387_v36  ;;  %v3513_v62 = vadd.f32 %v5309_v39, %v8596_v60  ;;  %v3504_v44 = vpop.f32.mrb[39].mxu1  ;;  %v3394_v36 = vadd.f32 %v8576_v33, %v8272_v53 }
 0xb11   : > { %v8633_v63 = vadd.f32 %v3502_v34, %v3385_v23  ;;  %v3505_v56 = vadd.f32 %v8596_v60, %v3504_v44  ;;  %v3395_v23 = vadd.f32 %v8585_v31, %v8267_v18 }
 0xb12   : > { %v5038_v19 = vmul.f32 -1.442695, %v8628_v29  ;;  %v8639_v35 = vadd.f32 %v3513_v62, %v3388_v2 }
 0xb13   : > { %v5036_v28 = vmul.f32 -1.442695, %v8633_v63  ;;  %v8642_v11 = vadd.f32 %v3505_v56, %v3386_v30 }
 0xb14   : > { %5899 = vpow2.f32 %v5038_v19  ;;  %v5039_v4 = vmul.f32 -1.442695, %v8639_v35 }
 0xb15   : > { %5901 = vpow2.f32 %v5036_v28  ;;  %v5037_v7 = vmul.f32 -1.442695, %v8642_v11 }
 0xb16   : > { %v5892_v51 = vpop.eup %5891  ;;  %5903 = vpow2.f32 %v5039_v4  ;;  %v5312_v13 = vpop.f32.mrb[40].mxu1 }
 0xb17   : > { %v5894_v9 = vpop.eup %5893  ;;  %v3614_v12 = vadd.f32 1.0, %v5892_v51  ;;  %5905 = vpow2.f32 %v5037_v7  ;;  %v3526_v27 = vadd.f32 %v5312_v13, %v8596_v60  ;;  %v3517_v55 = vpop.f32.mrb[41].mxu1 }
 0xb18   : > { %v5896_v43 = vpop.eup %5895  ;;  %v3612_v8 = vadd.f32 1.0, %v5894_v9  ;;  %v3518_v50 = vadd.f32 %v8596_v60, %v3517_v55  ;;  %v5313_v10 = vpop.f32.mrb[42].mxu1 }
 0xb19   : > { %v5898_v6 = vpop.eup %5897  ;;  %5907 = vrcp.f32 %v3614_v12  ;;  %v3615_v16 = vadd.f32 1.0, %v5896_v43  ;;  %v8656_v49 = vadd.f32 %v3526_v27, %v3391_v15  ;;  %v3529_v25 = vadd.f32 %v5313_v10, %v8596_v60  ;;  %v3520_v61 = vpop.f32.mrb[43].mxu1 }
 0xb1a   : > { %5909 = vrcp.f32 %v3612_v8  ;;  %v3613_v32 = vadd.f32 1.0, %v5898_v6  ;;  %v8659_v26 = vadd.f32 %v3518_v50, %v3389_v59  ;;  %v3521_v37 = vadd.f32 %v8596_v60, %v3520_v61 }
 0xb1b   : > { %5911 = vrcp.f32 %v3615_v16  ;;  %v5042_v22 = vmul.f32 -1.442695, %v8656_v49  ;;  %v8663_v40 = vadd.f32 %v3529_v25, %v3392_v3 }
 0xb1c   : > { %5913 = vrcp.f32 %v3613_v32  ;;  %v5040_v0 = vmul.f32 -1.442695, %v8659_v26  ;;  %v8666_v17 = vadd.f32 %v3521_v37, %v3390_v20 }
 0xb1d   : > { %5915 = vpow2.f32 %v5042_v22  ;;  %v5043_v21 = vmul.f32 -1.442695, %v8663_v40 }
 0xb1e   : > { %v5900_v41 = vpop.eup %5899  ;;  %5917 = vpow2.f32 %v5040_v0  ;;  %v5041_v24 = vmul.f32 -1.442695, %v8666_v17  ;;  %v5316_v47 = vpop.f32.mrb[44].mxu1 }
 0xb1f   : > { %v5902_v54 = vpop.eup %5901  ;;  %v3618_v14 = vadd.f32 1.0, %v5900_v41  ;;  %5919 = vpow2.f32 %v5043_v21  ;;  %v3542_v34 = vadd.f32 %v5316_v47, %v8596_v60  ;;  %v3533_v39 = vpop.f32.mrb[45].mxu1 }
 0xb20   : > { %v5904_v2 = vpop.eup %5903  ;;  %v3616_v62 = vadd.f32 1.0, %v5902_v54  ;;  %5921 = vpow2.f32 %v5041_v24  ;;  %v3534_v44 = vadd.f32 %v8596_v60, %v3533_v39  ;;  %v5317_v5 = vpop.f32.mrb[46].mxu1 }
 0xb21   : > { %v5906_v30 = vpop.eup %5905  ;;  %5923 = vrcp.f32 %v3618_v14  ;;  %v3619_v53 = vadd.f32 1.0, %v5904_v2  ;;  %v8680_v33 = vadd.f32 %v3542_v34, %v3395_v23  ;;  %v3545_v56 = vadd.f32 %v5317_v5, %v8596_v60  ;;  %v3536_v18 = vpop.f32.mrb[47].mxu1 }
 0xb22   : > { %5925 = vrcp.f32 %v3616_v62  ;;  %v3617_v31 = vadd.f32 1.0, %v5906_v30  ;;  %v8683_v19 = vadd.f32 %v3534_v44, %v3393_v42  ;;  %v3537_v28 = vadd.f32 %v8596_v60, %v3536_v18 }
 0xb23   : > { %v5908_v4 = vpop.eup %5907  ;;  %5927 = vrcp.f32 %v3619_v53  ;;  %v5046_v7 = vmul.f32 -1.442695, %v8680_v33  ;;  %v8687_v38 = vadd.f32 %v3545_v56, %v3396_v48 }
 0xb24   : > { %v5910_v46 = vpop.eup %5909  ;;  %5929 = vrcp.f32 %v3617_v31  ;;  %v5044_v51 = vmul.f32 -1.442695, %v8683_v19  ;;  %v8690_v13 = vadd.f32 %v3537_v28, %v3394_v36  ;;  %v8703_v8 = vmul.f32 %v5908_v4, %v8604_v58 }
 0xb25   : > { %v5912_v59 = vpop.eup %5911  ;;  %5931 = vpow2.f32 %v5046_v7  ;;  %v5047_v9 = vmul.f32 -1.442695, %v8687_v38  ;;  %v8694_v12 = vmul.f32 %v5910_v46, %v8609_v1 }
 0xb26   : > { %v5914_v60 = vpop.eup %5913  ;;  %5933 = vpow2.f32 %v5044_v51  ;;  %v5045_v15 = vmul.f32 -1.442695, %v8690_v13  ;;  %v8708_v6 = vmul.f32 %v5912_v59, %v8615_v45  ;;  %v3684_v61 = vsel %vm1005_vm3, %v8703_v8, 0.0 }
 0xb27   : > { %v5916_v27 = vpop.eup %5915  ;;  %5935 = vpow2.f32 %v5047_v9  ;;  %v3678_v55 = vsel %vm1005_vm3, %v8694_v12, 0.0  ;;  %v8700_v43 = vmul.f32 %v5914_v60, %v8618_v52 }
 0xb28   : > { %v5918_v50 = vpop.eup %5917  ;;  %v3622_v3 = vadd.f32 1.0, %v5916_v27  ;;  %5937 = vpow2.f32 %v5045_v15  ;;  %3679 = vadd.xlane.f32.xlu1 %v3678_v55  ;;  %v3687_v22 = vsel %vm1005_vm3, %v8708_v6, 0.0 }
 0xb29   : > { %v5920_v1 = vpop.eup %5919  ;;  %v3620_v10 = vadd.f32 1.0, %v5918_v50  ;;  %v3681_v20 = vsel %vm1005_vm3, %v8700_v43, 0.0 }
 0xb2a   : > { %v5922_v16 = vpop.eup %5921  ;;  %5939 = vrcp.f32 %v3622_v3  ;;  %v3623_v25 = vadd.f32 1.0, %v5920_v1  ;;  %3682 = vadd.xlane.f32.xlu0 %v3681_v20 }
 0xb2b   : > { %v5924_v52 = vpop.eup %5923  ;;  %5941 = vrcp.f32 %v3620_v10  ;;  %v3621_v58 = vadd.f32 1.0, %v5922_v16 }
 0xb2c   : > { %v5926_v32 = vpop.eup %5925  ;;  %5943 = vrcp.f32 %v3623_v25  ;;  %3685 = vadd.xlane.f32.xlu1 %v3684_v61  ;;  %v8723_v47 = vmul.f32 %v5924_v52, %v8628_v29 }
 0xb2d   : > { %v5928_v37 = vpop.eup %5927  ;;  %5945 = vrcp.f32 %v3621_v58  ;;  %v8715_v45 = vmul.f32 %v5926_v32, %v8633_v63 }
 0xb2e   : > { %v5930_v0 = vpop.eup %5929  ;;  %3688 = vadd.xlane.f32.xlu0 %v3687_v22  ;;  %v8728_v23 = vmul.f32 %v5928_v37, %v8639_v35  ;;  %v3696_v29 = vsel %vm1005_vm3, %v8723_v47, 0.0 }
 0xb2f   : > { %v5932_v21 = vpop.eup %5931  ;;  %v3690_v41 = vsel %vm1005_vm3, %v8715_v45, 0.0  ;;  %v8720_v24 = vmul.f32 %v5930_v0, %v8642_v11 }
 0xb30   : > { %v5934_v42 = vpop.eup %5933  ;;  %v3626_v36 = vadd.f32 1.0, %v5932_v21  ;;  %3691 = vadd.xlane.f32.xlu1 %v3690_v41  ;;  %v3699_v44 = vsel %vm1005_vm3, %v8728_v23, 0.0 }
 0xb31   : > { %v5936_v54 = vpop.eup %5935  ;;  %v3624_v14 = vadd.f32 1.0, %v5934_v42  ;;  %v3693_v63 = vsel %vm1005_vm3, %v8720_v24, 0.0 }
 0xb32   : > { %v5938_v34 = vpop.eup %5937  ;;  %5947 = vrcp.f32 %v3626_v36  ;;  %v3627_v39 = vadd.f32 1.0, %v5936_v54  ;;  %3694 = vadd.xlane.f32.xlu0 %v3693_v63 }
 0xb33   : > { %5949 = vrcp.f32 %v3624_v14  ;;  %v3625_v11 = vadd.f32 1.0, %v5938_v34 }
 0xb34   : > { %v5940_v2 = vpop.eup %5939  ;;  %5951 = vrcp.f32 %v3627_v39  ;;  %3697 = vadd.xlane.f32.xlu1 %v3696_v29 }
 0xb35   : > { %v5942_v62 = vpop.eup %5941  ;;  %5953 = vrcp.f32 %v3625_v11  ;;  %v8743_v56 = vmul.f32 %v5940_v2, %v8656_v49 }
 0xb36   : > { %v5944_v48 = vpop.eup %5943  ;;  %3700 = vadd.xlane.f32.xlu0 %v3699_v44  ;;  %v8735_v35 = vmul.f32 %v5942_v62, %v8659_v26 }
 0xb37   : > { %v5946_v5 = vpop.eup %5945  ;;  %v8748_v31 = vmul.f32 %v5944_v48, %v8663_v40  ;;  %v3708_v28 = vsel %vm1005_vm3, %v8743_v56, 0.0 }
 0xb38   : > { %v3702_v30 = vsel %vm1005_vm3, %v8735_v35, 0.0  ;;  %v8740_v53 = vmul.f32 %v5946_v5, %v8666_v17 }
 0xb39   : > { %3703 = vadd.xlane.f32.xlu1 %v3702_v30  ;;  %v3711_v17 = vsel %vm1005_vm3, %v8748_v31, 0.0 }
 0xb3a   : > { %v3705_v18 = vsel %vm1005_vm3, %v8740_v53, 0.0 }
 0xb3b   : > { %3706 = vadd.xlane.f32.xlu0 %v3705_v18 }
 0xb3c   : > { %v5948_v26 = vpop.eup %5947 }
 0xb3d   : > { %v5950_v4 = vpop.eup %5949  ;;  %3709 = vadd.xlane.f32.xlu1 %v3708_v28  ;;  %v8763_v59 = vmul.f32 %v5948_v26, %v8680_v33  ;;  %v5469_v33 = vld [vmem:[%s9608_s5] ss:$8 sps:$4 sm:$0xff]  }
 0xb3e   : > { %v5952_v7 = vpop.eup %5951  ;;  %v8755_v49 = vmul.f32 %v5950_v4, %v8683_v19 }
 0xb3f   : > { %v5954_v46 = vpop.eup %5953  ;;  %3712 = vadd.xlane.f32.xlu0 %v3711_v17  ;;  %v8768_v60 = vmul.f32 %v5952_v7, %v8687_v38  ;;  %v3720_v19 = vsel %vm1005_vm3, %v8763_v59, 0.0 }
 0xb40   : > { %v3714_v40 = vsel %vm1005_vm3, %v8755_v49, 0.0  ;;  %v8760_v51 = vmul.f32 %v5954_v46, %v8690_v13  ;;  %v5471_v13 = vld [vmem:[%s9608_s5 + $0x4] ss:$8 sps:$4 sm:$0xff]  }
 0xb41   : > { %3715 = vadd.xlane.f32.xlu1 %v3714_v40  ;;  %v3723_v15 = vsel %vm1005_vm3, %v8768_v60, 0.0  ;;  %3994 = vmatprep.subr.bf16.mxu0 %v5471_v13 }
 0xb42   : > { %v3717_v9 = vsel %vm1005_vm3, %v8760_v51, 0.0  ;;  %3995 = vmatpush1.bf16.msra.mxu0 %v5469_v33 }
 0xb43   : > { %3718 = vadd.xlane.f32.xlu0 %v3717_v9 }
 0xb45   : > { %3721 = vadd.xlane.f32.xlu1 %v3720_v19 }
 0xb47   : > { %3724 = vadd.xlane.f32.xlu0 %v3723_v15 }
 0xbb5   : > { %v3680_v38 = vpop.xlane.xlu1 %3679 }
 0xbb6   : > { %v3726_v27 = vmul.f32 0.03125, %v3680_v38 }
 0xbb7   : > { %v3683_v55 = vpop.xlane.xlu0 %3682 }
 0xbb8   : > { %v8781_v50 = vsub.f32 %v8694_v12, %v3726_v27  ;;  %v3727_v3 = vmul.f32 0.03125, %v3683_v55 }
 0xbb9   : > { %v3686_v1 = vpop.xlane.xlu1 %3685 }
 0xbba   : > { %v8784_v10 = vsub.f32 %v8700_v43, %v3727_v3  ;;  %v3728_v20 = vmul.f32 0.03125, %v3686_v1  ;;  %v3758_v16 = vmul.f32 %v8781_v50, %v8781_v50 }
 0xbbb   : > { %v3689_v25 = vpop.xlane.xlu0 %3688 }
 0xbbc   : > { %v8789_v52 = vsub.f32 %v8703_v8, %v3728_v20  ;;  %v3729_v58 = vmul.f32 0.03125, %v3689_v25  ;;  %v3774_v61 = vsel %vm1005_vm3, %v3758_v16, 0.0  ;;  %v3759_v12 = vmul.f32 %v8784_v10, %v8784_v10 }
 0xbbd   : > { %v3692_v32 = vpop.xlane.xlu1 %3691  ;;  %3775 = vadd.xlane.f32.xlu1 %v3774_v61 }
 0xbbe   : > { %v8795_v37 = vsub.f32 %v8708_v6, %v3729_v58  ;;  %v3730_v43 = vmul.f32 0.03125, %v3692_v32  ;;  %v3777_v22 = vsel %vm1005_vm3, %v3759_v12, 0.0  ;;  %v3760_v0 = vmul.f32 %v8789_v52, %v8789_v52 }
 0xbbf   : > { %3778 = vadd.xlane.f32.xlu0 %v3777_v22  ;;  %v3695_v8 = vpop.xlane.xlu0 %3694 }
 0xbc0   : > { %v8801_v21 = vsub.f32 %v8715_v45, %v3730_v43  ;;  %v3731_v41 = vmul.f32 0.03125, %v3695_v8  ;;  %v3780_v42 = vsel %vm1005_vm3, %v3760_v0, 0.0  ;;  %v3761_v36 = vmul.f32 %v8795_v37, %v8795_v37 }
 0xbc1   : > { %v3698_v54 = vpop.xlane.xlu1 %3697  ;;  %3781 = vadd.xlane.f32.xlu1 %v3780_v42 }
 0xbc2   : > { %v8807_v6 = vsub.f32 %v8720_v24, %v3731_v41  ;;  %v3732_v14 = vmul.f32 0.03125, %v3698_v54  ;;  %v3783_v63 = vsel %vm1005_vm3, %v3761_v36, 0.0  ;;  %v3762_v34 = vmul.f32 %v8801_v21, %v8801_v21  ;;  %v5474_v36 = vld [vmem:[%s9608_s5 + $0x14] ss:$8 sps:$4 sm:$0xff]  }
 0xbc3   : > { %3784 = vadd.xlane.f32.xlu0 %v3783_v63  ;;  %v3701_v45 = vpop.xlane.xlu0 %3700  ;;  %3996 = vmatprep.subr.bf16.mxu0 %v5474_v36 }
 0xbc4   : > { %v8813_v39 = vsub.f32 %v8723_v47, %v3732_v14  ;;  %v3733_v11 = vmul.f32 0.03125, %v3701_v45  ;;  %v3786_v29 = vsel %vm1005_vm3, %v3762_v34, 0.0  ;;  %v3763_v2 = vmul.f32 %v8807_v6, %v8807_v6 }
 0xbc5   : > { %3787 = vadd.xlane.f32.xlu1 %v3786_v29 }
 0xbc6   : > { %v8819_v24 = vsub.f32 %v8728_v23, %v3733_v11  ;;  %v3704_v62 = vpop.xlane.xlu1 %3703  ;;  %v3789_v44 = vsel %vm1005_vm3, %v3763_v2, 0.0  ;;  %v3764_v48 = vmul.f32 %v8813_v39, %v8813_v39 }
 0xbc7   : > { %v3734_v5 = vmul.f32 0.03125, %v3704_v62  ;;  %3790 = vadd.xlane.f32.xlu0 %v3789_v44 }
 0xbc8   : > { %v3707_v47 = vpop.xlane.xlu0 %3706  ;;  %v3792_v30 = vsel %vm1005_vm3, %v3764_v48, 0.0  ;;  %v3765_v18 = vmul.f32 %v8819_v24, %v8819_v24 }
 0xbc9   : > { %v8828_v26 = vsub.f32 %v8735_v35, %v3734_v5  ;;  %v3735_v28 = vmul.f32 0.03125, %v3707_v47  ;;  %3793 = vadd.xlane.f32.xlu1 %v3792_v30 }
 0xbca   : > { %v3710_v23 = vpop.xlane.xlu1 %3709  ;;  %v3795_v4 = vsel %vm1005_vm3, %v3765_v18, 0.0 }
 0xbcb   : > { %v8832_v7 = vsub.f32 %v8740_v53, %v3735_v28  ;;  %v3736_v17 = vmul.f32 0.03125, %v3710_v23  ;;  %3796 = vadd.xlane.f32.xlu0 %v3795_v4  ;;  %v3766_v46 = vmul.f32 %v8828_v26, %v8828_v26 }
 0xbcc   : > { %v3713_v40 = vpop.xlane.xlu0 %3712 }
 0xbcd   : > { %v8837_v9 = vsub.f32 %v8743_v56, %v3736_v17  ;;  %v3737_v19 = vmul.f32 0.03125, %v3713_v40  ;;  %v3798_v35 = vsel %vm1005_vm3, %v3766_v46, 0.0  ;;  %v3767_v15 = vmul.f32 %v8832_v7, %v8832_v7 }
 0xbce   : > { %3799 = vadd.xlane.f32.xlu1 %v3798_v35  ;;  %v3716_v33 = vpop.xlane.xlu1 %3715 }
 0xbcf   : > { %v8843_v53 = vsub.f32 %v8748_v31, %v3737_v19  ;;  %v3738_v13 = vmul.f32 0.03125, %v3716_v33  ;;  %v3801_v38 = vsel %vm1005_vm3, %v3767_v15, 0.0  ;;  %v3768_v27 = vmul.f32 %v8837_v9, %v8837_v9  ;;  %v8885_v19 = vld [vmem:[%s9607_s4 + $0x9] ss:$0 sm:$0xff] }
 0xbd0   : > { %3802 = vadd.xlane.f32.xlu0 %v3801_v38  ;;  %v3719_v56 = vpop.xlane.xlu0 %3718 }
 0xbd1   : > { %v8849_v55 = vsub.f32 %v8755_v49, %v3738_v13  ;;  %v3739_v3 = vmul.f32 0.03125, %v3719_v56  ;;  %v3804_v1 = vsel %vm1005_vm3, %v3768_v27, 0.0  ;;  %v3769_v20 = vmul.f32 %v8843_v53, %v8843_v53 }
 0xbd2   : > { %3805 = vadd.xlane.f32.xlu1 %v3804_v1  ;;  %v3722_v31 = vpop.xlane.xlu1 %3721  ;;  %v8893_v1 = vld [vmem:[%s9607_s4 + $0xe] ss:$0 sm:$0xff] }
 0xbd3   : > { %v8855_v16 = vsub.f32 %v8760_v51, %v3739_v3  ;;  %v3740_v25 = vmul.f32 0.03125, %v3722_v31  ;;  %v3807_v58 = vsel %vm1005_vm3, %v3769_v20, 0.0  ;;  %v3770_v61 = vmul.f32 %v8849_v55, %v8849_v55 }
 0xbd4   : > { %3808 = vadd.xlane.f32.xlu0 %v3807_v58  ;;  %v3725_v49 = vpop.xlane.xlu0 %3724 }
 0xbd5   : > { %v8861_v12 = vsub.f32 %v8763_v59, %v3740_v25  ;;  %v3741_v32 = vmul.f32 0.03125, %v3725_v49  ;;  %v3810_v43 = vsel %vm1005_vm3, %v3770_v61, 0.0  ;;  %v3771_v22 = vmul.f32 %v8855_v16, %v8855_v16 }
 0xbd6   : > { %3811 = vadd.xlane.f32.xlu1 %v3810_v43 }
 0xbd7   : > { %v8867_v51 = vsub.f32 %v8768_v60, %v3741_v32  ;;  %v3813_v0 = vsel %vm1005_vm3, %v3771_v22, 0.0  ;;  %v3772_v8 = vmul.f32 %v8861_v12, %v8861_v12  ;;  %v5472_v60 = vld [vmem:[%s9608_s5 + $0x10] ss:$8 sps:$4 sm:$0xff]  }
 0xbd8   : > { %3814 = vadd.xlane.f32.xlu0 %v3813_v0  ;;  %3997 = vmatpush1.bf16.msra.mxu0 %v5472_v60 }
 0xbd9   : > { %v3816_v41 = vsel %vm1005_vm3, %v3772_v8, 0.0  ;;  %v3773_v59 = vmul.f32 %v8867_v51, %v8867_v51 }
 0xbda   : > { %3817 = vadd.xlane.f32.xlu1 %v3816_v41 }
 0xbdb   : > { %v3819_v42 = vsel %vm1005_vm3, %v3773_v59, 0.0 }
 0xbdc   : > { %3820 = vadd.xlane.f32.xlu0 %v3819_v42 }
 0xc4a   : > { %v3776_v54 = vpop.xlane.xlu1 %3775 }
 0xc4b   : > { %v3822_v14 = vmul.f32 0.03125, %v3776_v54 }
 0xc4c   : > { %v3779_v63 = vpop.xlane.xlu0 %3778 }
 0xc4d   : > { %v3838_v34 = vadd.f32 0.1, %v3822_v14  ;;  %v3823_v45 = vmul.f32 0.03125, %v3779_v63 }
 0xc4e   : > { %v3782_v11 = vpop.xlane.xlu1 %3781 }
 0xc4f   : > { %5955 = vrsqrt.f32 %v3838_v34  ;;  %v3839_v29 = vadd.f32 0.1, %v3823_v45  ;;  %v3824_v2 = vmul.f32 0.03125, %v3782_v11 }
 0xc50   : > { %v3785_v62 = vpop.xlane.xlu0 %3784 }
 0xc51   : > { %5957 = vrsqrt.f32 %v3839_v29  ;;  %v3840_v44 = vadd.f32 0.1, %v3824_v2  ;;  %v3825_v48 = vmul.f32 0.03125, %v3785_v62 }
 0xc52   : > { %v3788_v5 = vpop.xlane.xlu1 %3787 }
 0xc53   : > { %5959 = vrsqrt.f32 %v3840_v44  ;;  %v3841_v47 = vadd.f32 0.1, %v3825_v48  ;;  %v3826_v30 = vmul.f32 0.03125, %v3788_v5 }
 0xc54   : > { %v3791_v18 = vpop.xlane.xlu0 %3790 }
 0xc55   : > { %5961 = vrsqrt.f32 %v3841_v47  ;;  %v3827_v28 = vmul.f32 0.03125, %v3791_v18  ;;  %v3842_v23 = vadd.f32 0.1, %v3826_v30 }
 0xc56   : > { %v3794_v17 = vpop.xlane.xlu1 %3793 }
 0xc57   : > { %v3843_v4 = vadd.f32 0.1, %v3827_v28  ;;  %v3828_v13 = vmul.f32 0.03125, %v3794_v17 }
 0xc58   : > { %v3797_v46 = vpop.xlane.xlu0 %3796 }
 0xc59   : > { %v5956_v40 = vpop.eup %5955  ;;  %5963 = vrsqrt.f32 %v3843_v4  ;;  %v3829_v35 = vmul.f32 0.03125, %v3797_v46  ;;  %v3844_v58 = vadd.f32 0.1, %v3828_v13 }
 0xc5a   : > { %v3870_v15 = vmul.f32 %v5956_v40, %v8781_v50  ;;  %5965 = vrsqrt.f32 %v3842_v23 }
 0xc5b   : > { %v5958_v33 = vpop.eup %5957  ;;  %v3845_v3 = vadd.f32 0.1, %v3829_v35  ;;  %v3800_v50 = vpop.xlane.xlu1 %3799 }
 0xc5c   : > { %v3890_v38 = vmul.f32 %v8885_v19, %v3870_v15  ;;  %v3871_v27 = vmul.f32 %v5958_v33, %v8784_v10  ;;  %v3830_v8 = vmul.f32 0.03125, %v3800_v50 }
 0xc5d   : > { %v5960_v56 = vpop.eup %5959  ;;  %v3803_v31 = vpop.xlane.xlu0 %3802  ;;  %5967 = vrsqrt.f32 %v3845_v3 }
 0xc5e   : > { %v3891_v20 = vmul.f32 %v8885_v19, %v3871_v27  ;;  %v3910_v61 = vadd.f32 %v8893_v1, %v3890_v38  ;;  %v3872_v32 = vmul.f32 %v5960_v56, %v8789_v52  ;;  %v3831_v10 = vmul.f32 0.03125, %v3803_v31 }
 0xc5f   : > { %v5962_v25 = vpop.eup %5961  ;;  %5969 = vrsqrt.f32 %v3844_v58  ;;  %v3806_v14 = vpop.xlane.xlu1 %3805 }
 0xc60   : > { %v3911_v49 = vadd.f32 %v8893_v1, %v3891_v20  ;;  %v3873_v43 = vmul.f32 %v5962_v25, %v8795_v37  ;;  %v3892_v59 = vmul.f32 %v8885_v19, %v3872_v32  ;;  %v3847_v60 = vadd.f32 0.1, %v3831_v10 }
 0xc61   : > { %v3809_v36 = vpop.xlane.xlu0 %3808  ;;  %v3846_v37 = vadd.f32 0.1, %v3830_v8  ;;  %v3832_v62 = vmul.f32 0.03125, %v3806_v14 }
 0xc62   : > { %v3926_v22 = vpack.c.bf16 %v3911_v49, %v3910_v61  ;;  %v3893_v41 = vmul.f32 %v8885_v19, %v3873_v43  ;;  %v3912_v63 = vadd.f32 %v8893_v1, %v3892_v59  ;;  %5971 = vrsqrt.f32 %v3847_v60 }
 0xc63   : > { %v5964_v0 = vpop.eup %5963  ;;  %v3833_v45 = vmul.f32 0.03125, %v3809_v36  ;;  %5973 = vrsqrt.f32 %v3846_v37  ;;  %v3848_v30 = vadd.f32 0.1, %v3832_v62  ;;  %v3812_v18 = vpop.xlane.xlu1 %3811 }
 0xc64   : > { %5054 = vmatmul.mubr.msk.bf16.vlgmr.msra.gmra.mrb[16].mxu0 %vm1005_vm3, %v3926_v22  ;;  %v5966_v42 = vpop.eup %5965  ;;  %v3913_v52 = vadd.f32 %v8893_v1, %v3893_v41  ;;  %v3875_v54 = vmul.f32 %v5964_v0, %v8807_v6  ;;  %v3834_v35 = vmul.f32 0.03125, %v3812_v18  ;;  %v8967_v18 = vld [vmem:[%s6521_s22] sm:$0xff] }
 0xc65   : > { %4036 = vmatprep.mubr.bf16.mxu0 %v6310_v57  ;;  %v3874_v34 = vmul.f32 %v5966_v42, %v8801_v21  ;;  %v3849_v6 = vadd.f32 0.1, %v3833_v45  ;;  %v3815_v5 = vpop.xlane.xlu0 %3814 }
 0xc66   : > { %v3927_v11 = vpack.c.bf16 %v3913_v52, %v3912_v63  ;;  %v3895_v29 = vmul.f32 %v8885_v19, %v3875_v54  ;;  %v3835_v4 = vmul.f32 0.03125, %v3815_v5  ;;  %v3850_v27 = vadd.f32 0.1, %v3834_v35 }
 0xc67   : > { %v5968_v2 = vpop.eup %5967  ;;  %v3894_v44 = vmul.f32 %v8885_v19, %v3874_v34  ;;  %5975 = vrsqrt.f32 %v3849_v6  ;;  %v3818_v56 = vpop.xlane.xlu1 %3817 }
 0xc68   : > { %v3915_v47 = vadd.f32 %v8893_v1, %v3895_v29  ;;  %v3877_v21 = vmul.f32 %v5968_v2, %v8819_v24  ;;  %5977 = vrsqrt.f32 %v3848_v30  ;;  %v3851_v24 = vadd.f32 0.1, %v3835_v4 }
 0xc69   : > { %v5970_v48 = vpop.eup %5969  ;;  %v3914_v28 = vadd.f32 %v8893_v1, %v3894_v44  ;;  %v3821_v13 = vpop.xlane.xlu0 %3820  ;;  %v3836_v61 = vmul.f32 0.03125, %v3818_v56  ;;  %v8989_v56 = vld [vmem:[%s6521_s22 + $0x18] sm:$0xff] }
 0xc6a   : > { %v3876_v23 = vmul.f32 %v5970_v48, %v8813_v39  ;;  %v3897_v46 = vmul.f32 %v8885_v19, %v3877_v21  ;;  %5979 = vrsqrt.f32 %v3851_v24  ;;  %v3837_v31 = vmul.f32 0.03125, %v3821_v13 }
 0xc6b   : > { %v3928_v17 = vpack.c.bf16 %v3915_v47, %v3914_v28  ;;  %5981 = vrsqrt.f32 %v3850_v27  ;;  %v3852_v43 = vadd.f32 0.1, %v3836_v61  ;;  %v3940_v21 = vlaneseq }
 0xc6c   : > { %5055 = vmatmul.mubr.msk.bf16.gmra.mrb[20].mxu0 %vm1005_vm3, %v3927_v11  ;;  %v5972_v40 = vpop.eup %5971  ;;  %v3896_v15 = vmul.f32 %v8885_v19, %v3876_v23  ;;  %v3917_v38 = vadd.f32 %v8893_v1, %v3897_v46 }
 0xc6d   : > { %4046 = vmatprep.mubr.bf16.mxu0 %v6310_v57  ;;  %v5974_v33 = vpop.eup %5973  ;;  %v3879_v39 = vmul.f32 %v5972_v40, %v8832_v7  ;;  %v3853_v7 = vadd.f32 0.1, %v3837_v31  ;;  %v3941_v30 = vshrl.u32 %v3940_v21, 7 }
 0xc6e   : > { %v3916_v3 = vadd.f32 %v8893_v1, %v3896_v15  ;;  %v3878_v20 = vmul.f32 %v5974_v33, %v8828_v26  ;;  %v8979_v33 = vld [vmem:[%s6521_s22 + $0x10] sm:$0xff] }
 0xc6f   : > { %v3899_v58 = vmul.f32 %v8885_v19, %v3879_v39  ;;  %5983 = vrsqrt.f32 %v3853_v7  ;;  %v3942_v4 = vsub.s32 0, %v3941_v30 }
 0xc70   : > { %v3929_v25 = vpack.c.bf16 %v3917_v38, %v3916_v3  ;;  %v3898_v49 = vmul.f32 %v8885_v19, %v3878_v20  ;;  %5985 = vrsqrt.f32 %v3852_v43 }
 0xc71   : > { %v5976_v50 = vpop.eup %5975  ;;  %v3919_v10 = vadd.f32 %v8893_v1, %v3899_v58 }
 0xc72   : > { %v5978_v32 = vpop.eup %5977  ;;  %v3881_v26 = vmul.f32 %v5976_v50, %v8843_v53  ;;  %v3918_v22 = vadd.f32 %v8893_v1, %v3898_v49  ;;  %v9000_v49 = vld [vmem:[%s6521_s22 + $0x20] sm:$0xff] }
 0xc73   : > { %v3880_v0 = vmul.f32 %v5978_v32, %v8837_v9 }
 0xc74   : > { %5056 = vmatmul.mubr.msk.bf16.gmra.mrb[24].mxu0 %vm1005_vm3, %v3928_v17  ;;  %v3930_v8 = vpack.c.bf16 %v3919_v10, %v3918_v22  ;;  %v3901_v41 = vmul.f32 %v8885_v19, %v3881_v26  ;;  %v5980_v59 = vpop.eup %5979  ;;  %v8972_v17 = vld [vmem:[%s6521_s22 + $0x8] sm:$0xff]  ;;  %v9011_v22 = vld [vmem:[%s6521_s22 + $0x30] sm:$0xff] }
 0xc75   : > { %4056 = vmatprep.mubr.bf16.mxu0 %v6310_v57  ;;  %v3900_v42 = vmul.f32 %v8885_v19, %v3880_v0  ;;  %v5982_v60 = vpop.eup %5981  ;;  %v3883_v36 = vmul.f32 %v5980_v59, %v8855_v16  ;;  %v9005_v10 = vld [vmem:[%s6521_s22 + $0x28] sm:$0xff]  ;;  %v3938_v0 = vld [vmem:[%s9648_s20] sm:$0x3] }
 0xc76   : > { %v3921_v53 = vadd.f32 %v8893_v1, %v3901_v41  ;;  %v3882_v9 = vmul.f32 %v5982_v60, %v8849_v55  ;;  %v3946_v41 = vsub.s32 1, %v3941_v30 }
 0xc77   : > { %v3920_v52 = vadd.f32 %v8893_v1, %v3900_v42  ;;  %v3903_v37 = vmul.f32 %v8885_v19, %v3883_v36 }
 0xc78   : > { %v3902_v63 = vmul.f32 %v8885_v19, %v3882_v9 }
 0xc79   : > { %v3931_v54 = vpack.c.bf16 %v3921_v53, %v3920_v52  ;;  %v5984_v14 = vpop.eup %5983  ;;  %v3923_v45 = vadd.f32 %v8893_v1, %v3903_v37  ;;  %v9023_v52 = vld [vmem:[%s6521_s22 + $0x38] sm:$0xff] }
 0xc7a   : > { %v5986_v34 = vpop.eup %5985  ;;  %v3885_v11 = vmul.f32 %v5984_v14, %v8867_v51  ;;  %v3922_v16 = vadd.f32 %v8893_v1, %v3902_v63  ;;  %v4125_v51 = vld [vmem:[%s9647_s24 + $0x2] sm:$0x1]  ;;  %v9029_v63 = vrot.slane %v3938_v0, %v3942_v4 }
 0xc7b   : > { %v3884_v29 = vmul.f32 %v5986_v34, %v8861_v12  ;;  %v4124_v12 = vld [vmem:[%s9647_s24 + $0x1] sm:$0x1]  ;;  %v4381_v5 = vsub.f32 0.0, %v4125_v51 }
 0xc7c   : > { %5057 = vmatmul.mubr.msk.bf16.gmra.mrb[28].mxu0 %vm1005_vm3, %v3929_v25  ;;  %v3932_v55 = vpack.c.bf16 %v3923_v45, %v3922_v16  ;;  %v3905_v2 = vmul.f32 %v8885_v19, %v3885_v11  ;;  %v8986_v39 = vrot.slane %v4124_v12, %v3942_v4  ;;  %v8994_v25 = vrot.slane %v4125_v51, %v3942_v4 }
 0xc7d   : > { %4066 = vmatprep.mubr.bf16.mxu0 %v6310_v57  ;;  %v3904_v62 = vmul.f32 %v8885_v19, %v3884_v29  ;;  %v4162_v19 = vsub.f32 0.0, %v4124_v12  ;;  %v4382_v47 = vmul.f32 1.442695, %v4381_v5  ;;  %v9032_v16 = vrot.slane %v3938_v0, %v3946_v41  ;;  %v9073_v41 = vld [vmem:[%s6521_s22 + $0x50] sm:$0xff] }
 0xc7e   : > { %v3925_v44 = vadd.f32 %v8893_v1, %v3905_v2  ;;  %v9036_v2 = vld [vmem:[%s6521_s22 + $0x40] sm:$0xff]  ;;  %9649 = vst [vmem:[#allocation15_spill] sm:$0xff] %v9073_v41 }
 0xc7f   : > { %v3924_v48 = vadd.f32 %v8893_v1, %v3904_v62  ;;  %v8964_v1 = vld [vmem:[%s9647_s24] ss:$0 sm:$0xff] }
 0xc80   : > { %v4130_v28 = vsub.f32 %v8967_v18, %v8964_v1  ;;  %v4131_v15 = vsub.f32 %v8972_v17, %v8964_v1  ;;  %v4132_v24 = vsub.f32 %v8979_v33, %v8964_v1  ;;  %v4133_v3 = vsub.f32 %v8989_v56, %v8964_v1 }
 0xc81   : > { %v3933_v6 = vpack.c.bf16 %v3925_v44, %v3924_v48  ;;  %v4134_v7 = vsub.f32 %v9000_v49, %v8964_v1  ;;  %v4135_v43 = vsub.f32 %v9005_v10, %v8964_v1  ;;  %v4136_v42 = vsub.f32 %v9011_v22, %v8964_v1 }
 0xc82   : > { %v4146_v40 = vmul.f32 %v4130_v28, %v4130_v28  ;;  %v4147_v27 = vmul.f32 %v4131_v15, %v4131_v15  ;;  %v4148_v20 = vmul.f32 %v4132_v24, %v4132_v24  ;;  %v4149_v32 = vmul.f32 %v4133_v3, %v4133_v3 }
 0xc83   : > { %v4150_v37 = vmul.f32 %v4134_v7, %v4134_v7  ;;  %v4137_v14 = vsub.f32 %v9023_v52, %v8964_v1  ;;  %v4151_v45 = vmul.f32 %v4135_v43, %v4135_v43 }
 0xc84   : > { %5058 = vmatmul.mubr.msk.bf16.gmra.mrb[32].mxu0 %vm1005_vm3, %v3930_v8 }
 0xc85   : > { %4076 = vmatprep.mubr.bf16.mxu0 %v6310_v57  ;;  %v4153_v5 = vmul.f32 %v4137_v14, %v4137_v14  ;;  %v9086_v14 = vld [vmem:[%s6521_s22 + $0x58] sm:$0xff] }
 0xc86   : > { %9650 = vst [vmem:[#allocation16_spill] sm:$0xff] %v9086_v14 }
 0xc8c   : > { %5059 = vmatmul.mubr.msk.bf16.gmra.mrb[36].mxu0 %vm1005_vm3, %v3931_v54 }
 0xc8d   : > { %4086 = vmatprep.mubr.bf16.mxu0 %v6310_v57 }
 0xc94   : > { %5060 = vmatmul.mubr.msk.bf16.gmra.mrb[40].mxu0 %vm1005_vm3, %v3932_v55  ;;  %v4152_v55 = vmul.f32 %v4136_v42, %v4136_v42 }
 0xc95   : > { %4096 = vmatprep.mubr.bf16.mxu0 %v6310_v57  ;;  %v4163_v57 = vmul.f32 1.442695, %v4162_v19 }
 0xc97   : > { %5987 = vpow2.f32 %v4163_v57  ;;  %v9046_v57 = vld [vmem:[%s6521_s22 + $0x48] sm:$0xff] }
 0xc98   : > { %5989 = vpow2.f32 %v4382_v47  ;;  %v4139_v28 = vsub.f32 %v9046_v57, %v8964_v1 }
 0xc9a   : > { %v4155_v7 = vmul.f32 %v4139_v28, %v4139_v28 }
 0xc9c   : > { %5061 = vmatmul.mubr.msk.bf16.gmra.mrb[44].mxu0 %vm1005_vm3, %v3933_v6  ;;  %v4138_v6 = vsub.f32 %v9036_v2, %v8964_v1 }
 0xca1   : > { %v5988_v23 = vpop.eup %5987 }
 0xca2   : > { %v5990_v46 = vpop.eup %5989  ;;  %v8974_v35 = vrot.slane %v5988_v23, %v3942_v4 }
 0xca3   : > { %v8983_v13 = vrot.slane %v5990_v46, %v3942_v4 }
 0xca4   : > { %v4169_v38 = vmul.f32 %v8974_v35, %v4146_v40  ;;  %v4170_v50 = vmul.f32 %v8974_v35, %v4147_v27  ;;  %v4171_v26 = vmul.f32 %v8974_v35, %v4148_v20  ;;  %v4172_v9 = vmul.f32 %v8974_v35, %v4149_v32 }
 0xca5   : > { %v4388_v31 = vmul.f32 %v8983_v13, %v4146_v40  ;;  %v4389_v61 = vmul.f32 %v8983_v13, %v4147_v27  ;;  %v4390_v59 = vmul.f32 %v8983_v13, %v4148_v20  ;;  %v4391_v54 = vmul.f32 %v8983_v13, %v4149_v32 }
 0xca6   : > { %v4189_v58 = vadd.f32 %v8986_v39, %v4169_v38  ;;  %v4190_v36 = vadd.f32 %v8986_v39, %v4170_v50  ;;  %v4191_v34 = vadd.f32 %v8986_v39, %v4171_v26  ;;  %v4192_v51 = vadd.f32 %v8986_v39, %v4172_v9 }
 0xca7   : > { %v4408_v8 = vadd.f32 %v8994_v25, %v4388_v31  ;;  %v4409_v53 = vadd.f32 %v8994_v25, %v4389_v61  ;;  %v4410_v29 = vadd.f32 %v8994_v25, %v4390_v59  ;;  %v4411_v12 = vadd.f32 %v8994_v25, %v4391_v54 }
 0xca8   : > { %v4205_v60 = vmul.f32 -0.5, %v4189_v58  ;;  %v4206_v48 = vmul.f32 -0.5, %v4190_v36  ;;  %v4173_v19 = vmul.f32 %v8974_v35, %v4150_v37  ;;  %v4207_v47 = vmul.f32 -0.5, %v4191_v34 }
 0xca9   : > { %v4424_v11 = vmul.f32 -0.5, %v4408_v8  ;;  %v4425_v44 = vmul.f32 -0.5, %v4409_v53  ;;  %v4392_v21 = vmul.f32 %v8983_v13, %v4150_v37  ;;  %v4174_v30 = vmul.f32 %v8974_v35, %v4151_v45 }
 0xcaa   : > { %v9038_v62 = vadd.f32 -2.8160586, %v4205_v60  ;;  %v4426_v4 = vmul.f32 -0.5, %v4410_v29  ;;  %v4393_v46 = vmul.f32 %v8983_v13, %v4151_v45  ;;  %v4175_v40 = vmul.f32 %v8974_v35, %v4152_v55 }
 0xcab   : > { %v9052_v23 = vadd.f32 -3.2215235, %v4424_v11  ;;  %v9056_v15 = vadd.f32 -2.8160586, %v4206_v48  ;;  %v9058_v24 = vadd.f32 -3.2215235, %v4425_v44  ;;  %v4394_v38 = vmul.f32 %v8983_v13, %v4152_v55 }
 0xcac   : > { %v4154_v27 = vmul.f32 %v4138_v6, %v4138_v6  ;;  %v4427_v3 = vmul.f32 -0.5, %v4411_v12  ;;  %v4208_v20 = vmul.f32 -0.5, %v4192_v51  ;;  %v4193_v31 = vadd.f32 %v8986_v39, %v4173_v19  ;;  %v9092_v55 = vld [vmem:[%s6521_s22 + $0x60] sm:$0xff] }
 0xcad   : > { %v4176_v58 = vmul.f32 %v8974_v35, %v4153_v5  ;;  %v9063_v50 = vadd.f32 -2.8160586, %v4207_v47  ;;  %v4412_v61 = vadd.f32 %v8994_v25, %v4392_v21  ;;  %v4194_v32 = vadd.f32 %v8986_v39, %v4174_v30  ;;  %9651 = vst [vmem:[#allocation17_spill] sm:$0xff] %v9092_v55  ;;  %v9100_v21 = vld [vmem:[%s6521_s22 + $0x68] sm:$0xff] }
 0xcae   : > { %v9067_v26 = vadd.f32 -3.2215235, %v4426_v4  ;;  %v4413_v43 = vadd.f32 %v8994_v25, %v4393_v46  ;;  %v4195_v0 = vadd.f32 %v8986_v39, %v4175_v40  ;;  %v4395_v8 = vmul.f32 %v8983_v13, %v4153_v5  ;;  %9652 = vst [vmem:[#allocation18_spill] sm:$0xff] %v9100_v21 }
 0xcaf   : > { %v4414_v59 = vadd.f32 %v8994_v25, %v4394_v38  ;;  %v4177_v42 = vmul.f32 %v8974_v35, %v4154_v27  ;;  %v4396_v60 = vmul.f32 %v8983_v13, %v4154_v27  ;;  %v4140_v53 = vsub.f32 %v9073_v41, %v8964_v1 }
 0xcb0   : > { %v9080_v36 = vadd.f32 -2.8160586, %v4208_v20  ;;  %v9082_v9 = vadd.f32 -3.2215235, %v4427_v3  ;;  %v4209_v54 = vmul.f32 -0.5, %v4193_v31  ;;  %v4196_v37 = vadd.f32 %v8986_v39, %v4176_v58 }
 0xcb1   : > { %v4428_v34 = vmul.f32 -0.5, %v4412_v61  ;;  %v4210_v45 = vmul.f32 -0.5, %v4194_v32  ;;  %v4178_v11 = vmul.f32 %v8974_v35, %v4155_v7  ;;  %v4141_v29 = vsub.f32 %v9086_v14, %v8964_v1  ;;  %v9173_v14 = vld [vmem:[%s6521_s22 + $0x78] sm:$0xff] }
 0xcb2   : > { %v4429_v44 = vmul.f32 -0.5, %v4413_v43  ;;  %v4211_v48 = vmul.f32 -0.5, %v4195_v0  ;;  %v4415_v6 = vadd.f32 %v8994_v25, %v4395_v8  ;;  %v4142_v12 = vsub.f32 %v9092_v55, %v8964_v1 }
 0xcb3   : > { %v4430_v51 = vmul.f32 -0.5, %v4414_v59  ;;  %v4416_v19 = vadd.f32 %v8994_v25, %v4396_v60  ;;  %v4197_v5 = vadd.f32 %v8986_v39, %v4177_v42  ;;  %v4156_v47 = vmul.f32 %v4140_v53, %v4140_v53 }
 0xcb4   : > { %v9102_v30 = vadd.f32 -2.8160586, %v4209_v54  ;;  %v4212_v28 = vmul.f32 -0.5, %v4196_v37  ;;  %v4397_v4 = vmul.f32 %v8983_v13, %v4155_v7  ;;  %v4143_v46 = vsub.f32 %v9100_v21, %v8964_v1 }
 0xcb5   : > { %v9107_v40 = vadd.f32 -3.2215235, %v4428_v34  ;;  %v9109_v38 = vadd.f32 -2.8160586, %v4210_v45  ;;  %v4198_v27 = vadd.f32 %v8986_v39, %v4178_v11  ;;  %v4157_v3 = vmul.f32 %v4141_v29, %v4141_v29 }
 0xcb6   : > { %v9112_v31 = vadd.f32 -3.2215235, %v4429_v44  ;;  %v9114_v58 = vadd.f32 -2.8160586, %v4211_v48  ;;  %v4431_v61 = vmul.f32 -0.5, %v4415_v6  ;;  %v4158_v32 = vmul.f32 %v4142_v12, %v4142_v12 }
 0xcb7   : > { %v9116_v0 = vadd.f32 -3.2215235, %v4430_v51  ;;  %v4432_v7 = vmul.f32 -0.5, %v4416_v19  ;;  %v4213_v8 = vmul.f32 -0.5, %v4197_v5  ;;  %v4179_v59 = vmul.f32 %v8974_v35, %v4156_v47 }
 0xcb8   : > { %v9122_v53 = vadd.f32 -2.8160586, %v4212_v28  ;;  %v4417_v54 = vadd.f32 %v8994_v25, %v4397_v4  ;;  %v4159_v37 = vmul.f32 %v4143_v46, %v4143_v46  ;;  %v4214_v45 = vmul.f32 -0.5, %v4198_v27 }
 0xcb9   : > { %v4398_v11 = vmul.f32 %v8983_v13, %v4156_v47  ;;  %v4180_v29 = vmul.f32 %v8974_v35, %v4157_v3  ;;  %v4399_v44 = vmul.f32 %v8983_v13, %v4157_v3  ;;  %v9132_v12 = vadd.f32 -3.2215235, %v4431_v61 }
 0xcba   : > { %v4181_v51 = vmul.f32 %v8974_v35, %v4158_v32  ;;  %v9135_v19 = vadd.f32 -2.8160586, %v4213_v8  ;;  %v9137_v5 = vadd.f32 -3.2215235, %v4432_v7  ;;  %v4199_v47 = vadd.f32 %v8986_v39, %v4179_v59 }
 0xcbb   : > { %v4400_v28 = vmul.f32 %v8983_v13, %v4158_v32  ;;  %v4433_v27 = vmul.f32 -0.5, %v4417_v54  ;;  %v4182_v3 = vmul.f32 %v8974_v35, %v4159_v37  ;;  %v4418_v61 = vadd.f32 %v8994_v25, %v4398_v11 }
 0xcbc   : > { %9653 = vst [vmem:[#allocation19_spill] sm:$0xff] %v9135_v19  ;;  %9654 = vst [vmem:[#allocation20_spill] sm:$0xff] %v9137_v5  ;;  %v4419_v8 = vadd.f32 %v8994_v25, %v4399_v44  ;;  %v4200_v7 = vadd.f32 %v8986_v39, %v4180_v29  ;;  %v4201_v59 = vadd.f32 %v8986_v39, %v4181_v51 }
 0xcbd   : > { %v4401_v32 = vmul.f32 %v8983_v13, %v4159_v37  ;;  %v9160_v51 = vadd.f32 -3.2215235, %v4433_v27  ;;  %v4202_v37 = vadd.f32 %v8986_v39, %v4182_v3 }
 0xcbe   : > { %v4216_v19 = vmul.f32 -0.5, %v4200_v7  ;;  %v4145_v7 = vsub.f32 %v9173_v14, %v8964_v1 }
 0xcbf   : > { %9657 = vst [vmem:[#allocation23_spill] sm:$0xff] %v9160_v51 }
 0xd37   : > { %v4028_v20 = vpop.f32.mrb[16].mxu0 }
 0xd38   : > { %v4030_v43 = vpop.f32.mrb[17].mxu0  ;;  %v4029_v54 = vadd.f32 %v4028_v20, %v9029_v63 }
 0xd39   : > { %v9120_v42 = vadd.f32 %v4030_v43, %v9032_v16  ;;  %v4032_v60 = vpop.f32.mrb[18].mxu0  ;;  %v9143_v43 = vadd.f32 -2.8160586, %v4214_v45  ;;  %v4215_v45 = vmul.f32 -0.5, %v4199_v47  ;;  %v4435_v47 = vmul.f32 -0.5, %v4419_v8 }
 0xd3a   : > { %v4034_v34 = vpop.f32.mrb[19].mxu0  ;;  %v4237_v55 = vsub.f32 %v8967_v18, %v4029_v54  ;;  %v4218_v8 = vmul.f32 -0.5, %v4202_v37 }
 0xd3b   : > { %v4269_v48 = vsub.f32 0.0, %v9120_v42  ;;  %v9130_v6 = vadd.f32 %v4034_v34, %v9032_v16  ;;  %9655 = vst [vmem:[#allocation21_spill] sm:$0xff] %v9143_v43  ;;  %v4420_v43 = vadd.f32 %v8994_v25, %v4400_v28  ;;  %v9170_v27 = vadd.f32 -2.8160586, %v4215_v45 }
 0xd3c   : > { %v9183_v18 = vadd.f32 -3.2215235, %v4435_v47  ;;  %v4161_v47 = vmul.f32 %v4145_v7, %v4145_v7 }
 0xd3d   : > { %v4285_v4 = vmul.f32 1.442695, %v4269_v48  ;;  %v4270_v46 = vsub.f32 0.0, %v9130_v6  ;;  %v9151_v48 = vld [vmem:[%s6521_s22 + $0x70] sm:$0xff]  ;;  %9658 = vst [vmem:[#allocation24_spill] sm:$0xff] %v9170_v27  ;;  %v4436_v51 = vmul.f32 -0.5, %v4420_v43 }
 0xd3e   : > { %9656 = vst [vmem:[#allocation22_spill] sm:$0xff] %v9151_v48  ;;  %v4144_v11 = vsub.f32 %v9151_v48, %v8964_v1 }
 0xd3f   : > { %5991 = vpow2.f32 %v4285_v4  ;;  %v4287_v34 = vmul.f32 1.442695, %v4270_v46  ;;  %v4038_v5 = vpop.f32.mrb[20].mxu0  ;;  %v4033_v4 = vadd.f32 %v4032_v60, %v9029_v63  ;;  %v4434_v46 = vmul.f32 -0.5, %v4418_v61 }
 0xd40   : > { %v4040_v21 = vpop.f32.mrb[21].mxu0  ;;  %v4160_v3 = vmul.f32 %v4144_v11, %v4144_v11  ;;  %v4039_v37 = vadd.f32 %v4038_v5, %v9029_v63  ;;  %v9188_v41 = vadd.f32 -3.2215235, %v4436_v51 }
 0xd41   : > { %5993 = vpow2.f32 %v4287_v34  ;;  %v9158_v29 = vadd.f32 %v4040_v21, %v9032_v16  ;;  %v4042_v44 = vpop.f32.mrb[22].mxu0  ;;  %v4217_v34 = vmul.f32 -0.5, %v4201_v59  ;;  %v4421_v21 = vadd.f32 %v8994_v25, %v4401_v32 }
 0xd42   : > { %v4044_v20 = vpop.f32.mrb[23].mxu0  ;;  %v9179_v59 = vadd.f32 -3.2215235, %v4434_v46  ;;  %v9181_v32 = vadd.f32 -2.8160586, %v4216_v19  ;;  %9659 = vst [vmem:[#allocation25_spill] sm:$0xff] %v9188_v41  ;;  %v4183_v1 = vmul.f32 %v8974_v35, %v4160_v3  ;;  %v4402_v5 = vmul.f32 %v8983_v13, %v4160_v3 }
 0xd43   : > { %v4271_v28 = vsub.f32 0.0, %v9158_v29  ;;  %v9166_v48 = vadd.f32 %v4044_v20, %v9032_v16  ;;  %v4238_v20 = vsub.f32 %v8972_v17, %v4033_v4  ;;  %v9185_v45 = vadd.f32 -2.8160586, %v4217_v34 }
 0xd44   : > { %v4437_v11 = vmul.f32 -0.5, %v4421_v21  ;;  %v9194_v46 = vadd.f32 -2.8160586, %v4218_v8 }
 0xd45   : > { %v4289_v60 = vmul.f32 1.442695, %v4271_v28  ;;  %v4272_v61 = vsub.f32 0.0, %v9166_v48  ;;  %v4253_v28 = vmul.f32 %v4237_v55, %v4237_v55  ;;  %v4043_v55 = vadd.f32 %v4042_v44, %v9029_v63 }
 0xd46   : > { %9660 = vst [vmem:[#allocation26_spill] sm:$0xff] %v9194_v46  ;;  %v4203_v44 = vadd.f32 %v8986_v39, %v4183_v1 }
 0xd47   : > { %5995 = vpow2.f32 %v4289_v60  ;;  %v4291_v43 = vmul.f32 1.442695, %v4272_v61  ;;  %v4048_v54 = vpop.f32.mrb[24].mxu0  ;;  %v4254_v60 = vmul.f32 %v4238_v20, %v4238_v20  ;;  %v4239_v20 = vsub.f32 %v8979_v33, %v4039_v37 }
 0xd48   : > { %v4050_v27 = vpop.f32.mrb[25].mxu0  ;;  %v4049_v61 = vadd.f32 %v4048_v54, %v9029_v63  ;;  %v4184_v54 = vmul.f32 %v8974_v35, %v4161_v47 }
 0xd49   : > { %v5992_v17 = vpop.eup %5991  ;;  %5997 = vpow2.f32 %v4291_v43  ;;  %v9192_v19 = vadd.f32 %v4050_v27, %v9032_v16  ;;  %v4052_v4 = vpop.f32.mrb[26].mxu0  ;;  %v9203_v27 = vadd.f32 -3.2215235, %v4437_v11  ;;  %v4240_v11 = vsub.f32 %v8989_v56, %v4043_v55 }
 0xd4a   : > { %v4317_v34 = vmul.f32 %v5992_v17, %v4253_v28  ;;  %v4054_v21 = vpop.f32.mrb[27].mxu0  ;;  %v4053_v3 = vadd.f32 %v4052_v4, %v9029_v63 }
 0xd4b   : > { %v5994_v51 = vpop.eup %5993  ;;  %v4273_v41 = vsub.f32 0.0, %v9192_v19  ;;  %v9201_v43 = vadd.f32 %v4054_v21, %v9032_v16  ;;  %9661 = vst [vmem:[#allocation27_spill] sm:$0xff] %v9203_v27  ;;  %v9214_v27 = vadd.f32 %v8994_v25, %v4402_v5 }
 0xd4c   : > { %v4333_v8 = vadd.f32 %v4317_v34, %v9120_v42  ;;  %v4318_v7 = vmul.f32 %v5994_v51, %v4254_v60  ;;  %v4241_v42 = vsub.f32 %v9000_v49, %v4049_v61  ;;  %v4255_v34 = vmul.f32 %v4239_v20, %v4239_v20 }
 0xd4d   : > { %v4293_v28 = vmul.f32 1.442695, %v4273_v41  ;;  %v4274_v17 = vsub.f32 0.0, %v9201_v43  ;;  %v9218_v41 = vmul.f32 %v8983_v13, %v4161_v47  ;;  %v9220_v60 = vmul.f32 -0.5, %v4203_v44 }
 0xd4e   : > { %v4349_v46 = vmul.f32 -0.5, %v4333_v8  ;;  %v4334_v21 = vadd.f32 %v4318_v7, %v9130_v6  ;;  %v4242_v56 = vsub.f32 %v9005_v10, %v4053_v3  ;;  %v4257_v7 = vmul.f32 %v4241_v42, %v4241_v42 }
 0xd4f   : > { %5999 = vpow2.f32 %v4293_v28  ;;  %v4295_v33 = vmul.f32 1.442695, %v4274_v17  ;;  %v4058_v37 = vpop.f32.mrb[28].mxu0  ;;  %v9233_v10 = vadd.f32 %v8986_v39, %v4184_v54 }
 0xd50   : > { %v4365_v1 = vadd.f32 -1.2066206, %v4349_v46  ;;  %v4350_v4 = vmul.f32 -0.5, %v4334_v21  ;;  %v4060_v35 = vpop.f32.mrb[29].mxu0  ;;  %v4059_v55 = vadd.f32 %v4058_v37, %v9029_v63  ;;  %v4256_v46 = vmul.f32 %v4240_v11, %v4240_v11 }
 0xd51   : > { %v5996_v6 = vpop.eup %5995  ;;  %6001 = vpow2.f32 %v4295_v33  ;;  %v9225_v49 = vadd.f32 %v4060_v35, %v9032_v16  ;;  %v4062_v5 = vpop.f32.mrb[30].mxu0  ;;  %v4258_v11 = vmul.f32 %v4242_v56, %v4242_v56 }
 0xd52   : > { %v4456_v51 = vmax.f32 %v9038_v62, %v4365_v1  ;;  %v4366_v13 = vadd.f32 -1.2066206, %v4350_v4  ;;  %v4319_v47 = vmul.f32 %v5996_v6, %v4255_v34  ;;  %v4064_v61 = vpop.f32.mrb[31].mxu0  ;;  %v4243_v33 = vsub.f32 %v9011_v22, %v4059_v55 }
 0xd53   : > { %v5998_v8 = vpop.eup %5997  ;;  %v4275_v20 = vsub.f32 0.0, %v9225_v49  ;;  %v9230_v44 = vadd.f32 %v4064_v61, %v9032_v16  ;;  %v4063_v22 = vadd.f32 %v4062_v5, %v9029_v63 }
 0xd54   : > { %v9236_v28 = vmax.f32 %v4456_v51, %v9052_v23  ;;  %v4457_v3 = vmax.f32 %v9056_v15, %v4366_v13  ;;  %v4335_v17 = vadd.f32 %v4319_v47, %v9158_v29  ;;  %v4320_v21 = vmul.f32 %v5998_v8, %v4256_v46 }
 0xd55   : > { %v4297_v42 = vmul.f32 1.442695, %v4275_v20  ;;  %v4276_v37 = vsub.f32 0.0, %v9230_v44 }
 0xd56   : > { %v4488_v4 = vsub.f32 %v9038_v62, %v9236_v28  ;;  %v4536_v39 = vsub.f32 %v4365_v1, %v9236_v28  ;;  %v4600_v54 = vsub.f32 %v9052_v23, %v9236_v28  ;;  %v9248_v34 = vmax.f32 %v4457_v3, %v9058_v24 }
 0xd57   : > { %v4351_v35 = vmul.f32 -0.5, %v4335_v17  ;;  %v4336_v29 = vadd.f32 %v4320_v21, %v9166_v48  ;;  %6003 = vpow2.f32 %v4297_v42  ;;  %v9252_v6 = vpop.f32.mrb[32].mxu0  ;;  %v4299_v20 = vmul.f32 1.442695, %v4276_v37 }
 0xd58   : > { %v4504_v56 = vmul.f32 1.442695, %v4488_v4  ;;  %v4552_v55 = vmul.f32 1.442695, %v4536_v39  ;;  %v4616_v51 = vmul.f32 1.442695, %v4600_v54  ;;  %v4489_v62 = vsub.f32 %v9056_v15, %v9248_v34 }
 0xd59   : > { %v6000_v1 = vpop.eup %5999  ;;  %v4537_v23 = vsub.f32 %v4366_v13, %v9248_v34  ;;  %v4601_v47 = vsub.f32 %v9058_v24, %v9248_v34  ;;  %v4367_v46 = vadd.f32 -1.2066206, %v4351_v35  ;;  %v4352_v61 = vmul.f32 -0.5, %v4336_v29  ;;  %v4070_v48 = vpop.f32.mrb[33].mxu0 }
 0xd5a   : > { %6005 = vpow2.f32 %v4504_v56  ;;  %v4506_v8 = vmul.f32 1.442695, %v4489_v62  ;;  %v4321_v5 = vmul.f32 %v6000_v1, %v4257_v7  ;;  %v9259_v3 = vpop.f32.mrb[34].mxu0  ;;  %v4259_v7 = vmul.f32 %v4243_v33, %v4243_v33 }
 0xd5b   : > { %v6002_v17 = vpop.eup %6001  ;;  %6007 = vpow2.f32 %v4552_v55  ;;  %v4554_v21 = vmul.f32 1.442695, %v4537_v23  ;;  %v4618_v42 = vmul.f32 1.442695, %v4601_v47  ;;  %v4458_v15 = vmax.f32 %v9063_v50, %v4367_v46  ;;  %v9262_v4 = vpop.f32.mrb[35].mxu0 }
 0xd5c   : > { %6009 = vpow2.f32 %v4616_v51  ;;  %v4368_v13 = vadd.f32 -1.2066206, %v4352_v61  ;;  %v4337_v24 = vadd.f32 %v4321_v5, %v9192_v19  ;;  %v4322_v39 = vmul.f32 %v6002_v17, %v4258_v11 }
 0xd5d   : > { %6011 = vpow2.f32 %v4506_v8  ;;  %v9266_v54 = vmax.f32 %v4458_v15, %v9067_v26  ;;  %v4244_v37 = vsub.f32 %v9023_v52, %v4063_v22 }
 0xd5e   : > { %6013 = vpow2.f32 %v4554_v21  ;;  %v4459_v35 = vmax.f32 %v9080_v36, %v4368_v13  ;;  %v4353_v29 = vmul.f32 -0.5, %v4337_v24  ;;  %v4338_v56 = vadd.f32 %v4322_v39, %v9201_v43 }
 0xd5f   : > { %6015 = vpow2.f32 %v4618_v42  ;;  %v4490_v55 = vsub.f32 %v9063_v50, %v9266_v54  ;;  %v4538_v19 = vsub.f32 %v4367_v46, %v9266_v54  ;;  %v4602_v11 = vsub.f32 %v9067_v26, %v9266_v54  ;;  %v9276_v51 = vpop.f32.mrb[36].mxu0 }
 0xd60   : > { %v9279_v33 = vmax.f32 %v4459_v35, %v9082_v9  ;;  %v4369_v52 = vadd.f32 -1.2066206, %v4353_v29  ;;  %v4354_v22 = vmul.f32 -0.5, %v4338_v56  ;;  %6017 = vpow2.f32 %v4299_v20  ;;  %v9281_v62 = vpop.f32.mrb[37].mxu0 }
 0xd61   : > { %v6004_v43 = vpop.eup %6003  ;;  %v4508_v1 = vmul.f32 1.442695, %v4490_v55  ;;  %v4556_v23 = vmul.f32 1.442695, %v4538_v19  ;;  %v4620_v47 = vmul.f32 1.442695, %v4602_v11  ;;  %v9284_v50 = vadd.f32 %v4070_v48, %v9032_v16 }
 0xd62   : > { %v4491_v26 = vsub.f32 %v9080_v36, %v9279_v33  ;;  %v4539_v46 = vsub.f32 %v4368_v13, %v9279_v33  ;;  %v4603_v61 = vsub.f32 %v9082_v9, %v9279_v33  ;;  %v4460_v8 = vmax.f32 %v9102_v30, %v4369_v52  ;;  %v9292_v5 = vpop.f32.mrb[38].mxu0 }
 0xd63   : > { %6019 = vpow2.f32 %v4508_v1  ;;  %v4370_v20 = vadd.f32 -1.2066206, %v4354_v22  ;;  %v4323_v17 = vmul.f32 %v6004_v43, %v4259_v7  ;;  %v4260_v21 = vmul.f32 %v4244_v37, %v4244_v37  ;;  %v9294_v42 = vpop.f32.mrb[39].mxu0 }
 0xd64   : > { %v6006_v48 = vpop.eup %6005  ;;  %6021 = vpow2.f32 %v4556_v23  ;;  %v4510_v15 = vmul.f32 1.442695, %v4491_v26  ;;  %v4558_v24 = vmul.f32 1.442695, %v4539_v46  ;;  %v4622_v36 = vmul.f32 1.442695, %v4603_v61 }
 0xd65   : > { %v6008_v39 = vpop.eup %6007  ;;  %6023 = vpow2.f32 %v4620_v47  ;;  %v9297_v13 = vmax.f32 %v4460_v8, %v9107_v40  ;;  %v4461_v9 = vmax.f32 %v9109_v38, %v4370_v20  ;;  %v4339_v35 = vadd.f32 %v4323_v17, %v9225_v49 }
 0xd66   : > { %v6010_v29 = vpop.eup %6009  ;;  %v4584_v56 = vadd.f32 %v6008_v39, %v6006_v48  ;;  %6025 = vpow2.f32 %v4510_v15  ;;  %v4069_v7 = vadd.f32 %v9252_v6, %v9029_v63  ;;  %v4277_v37 = vsub.f32 0.0, %v9284_v50 }
 0xd67   : > { %v6012_v55 = vpop.eup %6011  ;;  %6027 = vpow2.f32 %v4558_v24  ;;  %v4492_v19 = vsub.f32 %v9102_v30, %v9297_v13  ;;  %v4540_v11 = vsub.f32 %v4369_v52, %v9297_v13  ;;  %v4604_v22 = vsub.f32 %v9107_v40, %v9297_v13  ;;  %v9309_v43 = vpop.f32.mrb[40].mxu0 }
 0xd68   : > { %v6014_v49 = vpop.eup %6013  ;;  %v4648_v1 = vadd.f32 %v6010_v29, %v4584_v56  ;;  %6029 = vpow2.f32 %v4622_v36  ;;  %v9312_v23 = vmax.f32 %v4461_v9, %v9112_v31  ;;  %v4355_v6 = vmul.f32 -0.5, %v4339_v35  ;;  %v9314_v47 = vpop.f32.mrb[41].mxu0 }
 0xd69   : > { %v6016_v26 = vpop.eup %6015  ;;  %v4585_v46 = vadd.f32 %v6014_v49, %v6012_v55  ;;  %v4512_v61 = vmul.f32 1.442695, %v4492_v19  ;;  %v4560_v30 = vmul.f32 1.442695, %v4540_v11  ;;  %v4624_v8 = vmul.f32 1.442695, %v4604_v22 }
 0xd6a   : > { %v6018_v52 = vpop.eup %6017  ;;  %6031 = vlog2.f32 %v4648_v1  ;;  %v4493_v40 = vsub.f32 %v9109_v38, %v9312_v23  ;;  %v4541_v17 = vsub.f32 %v4370_v20, %v9312_v23  ;;  %v4605_v48 = vsub.f32 %v9112_v31, %v9312_v23  ;;  %v9321_v15 = vpop.f32.mrb[42].mxu0 }
 0xd6b   : > { %v4649_v24 = vadd.f32 %v6016_v26, %v4585_v46  ;;  %6033 = vpow2.f32 %v4512_v61  ;;  %v4371_v36 = vadd.f32 -1.2066206, %v4355_v6  ;;  %v4324_v39 = vmul.f32 %v6018_v52, %v4260_v21  ;;  %v9323_v9 = vpop.f32.mrb[43].mxu0 }
 0xd6c   : > { %6035 = vpow2.f32 %v4560_v30  ;;  %v4514_v35 = vmul.f32 1.442695, %v4493_v40  ;;  %v4562_v29 = vmul.f32 1.442695, %v4541_v17  ;;  %v9326_v56 = vmul.f32 -0.5, %v9214_v27 }
 0xd6d   : > { %v6020_v38 = vpop.eup %6019  ;;  %6037 = vlog2.f32 %v4649_v24  ;;  %v4626_v20 = vmul.f32 1.442695, %v4605_v48  ;;  %v4462_v55 = vmax.f32 %v9114_v58, %v4371_v36  ;;  %v4340_v31 = vadd.f32 %v4324_v39, %v9230_v44 }
 0xd6e   : > { %v6022_v19 = vpop.eup %6021  ;;  %6039 = vpow2.f32 %v4624_v8  ;;  %v4245_v11 = vsub.f32 %v9036_v2, %v4069_v7  ;;  %v4301_v21 = vmul.f32 1.442695, %v4277_v37  ;;  %v9333_v22 = vadd.f32 %v9262_v4, %v9032_v16 }
 0xd6f   : > { %v6024_v49 = vpop.eup %6023  ;;  %v4586_v1 = vadd.f32 %v6022_v19, %v6020_v38  ;;  %6041 = vpow2.f32 %v4514_v35  ;;  %v9336_v27 = vmax.f32 %v4462_v55, %v9116_v0  ;;  %v4356_v6 = vmul.f32 -0.5, %v4340_v31  ;;  %v9338_v26 = vpop.f32.mrb[44].mxu0 }
 0xd70   : > { %v6026_v46 = vpop.eup %6025  ;;  %6043 = vpow2.f32 %v4562_v29  ;;  %v4073_v44 = vadd.f32 %v9259_v3, %v9029_v63  ;;  %v4278_v2 = vsub.f32 0.0, %v9333_v22  ;;  %v9343_v7 = vpop.f32.mrb[45].mxu0  ;;  %v9347_v4 = vadd.f32 %v8994_v25, %v9218_v41 }
 0xd71   : > { %v6028_v37 = vpop.eup %6027  ;;  %v4650_v61 = vadd.f32 %v6024_v49, %v4586_v1  ;;  %6045 = vpow2.f32 %v4626_v20  ;;  %v4494_v30 = vsub.f32 %v9114_v58, %v9336_v27  ;;  %v4542_v8 = vsub.f32 %v4371_v36, %v9336_v27  ;;  %v9352_v52 = vpop.f32.mrb[46].mxu0 }
 0xd72   : > { %v6030_v40 = vpop.eup %6029  ;;  %v4587_v3 = vadd.f32 %v6028_v37, %v6026_v46  ;;  %v4606_v17 = vsub.f32 %v9116_v0, %v9336_v27  ;;  %v4372_v48 = vadd.f32 -1.2066206, %v4356_v6  ;;  %6047 = vpow2.f32 %v4301_v21  ;;  %v9356_v24 = vpop.f32.mrb[47].mxu0 }
 0xd73   : > { %6049 = vlog2.f32 %v4650_v61  ;;  %v4516_v25 = vmul.f32 1.442695, %v4494_v30  ;;  %v4564_v41 = vmul.f32 1.442695, %v4542_v8  ;;  %v4261_v39 = vmul.f32 %v4245_v11, %v4245_v11 }
 0xd74   : > { %v6032_v35 = vpop.eup %6031  ;;  %v4651_v29 = vadd.f32 %v6030_v40, %v4587_v3  ;;  %v4628_v58 = vmul.f32 1.442695, %v4606_v17  ;;  %v4463_v36 = vmax.f32 %v9122_v53, %v4372_v48  ;;  %v4079_v38 = vadd.f32 %v9276_v51, %v9029_v63 }
 0xd75   : > { %v6034_v20 = vpop.eup %6033  ;;  %v4665_v55 = vmul.f32 0.6931472, %v6032_v35  ;;  %6051 = vpow2.f32 %v4516_v25  ;;  %v4303_v0 = vmul.f32 1.442695, %v4278_v2  ;;  %v9363_v31 = vadd.f32 %v9281_v62, %v9032_v16 }
 0xd76   : > { %v6036_v19 = vpop.eup %6035  ;;  %6053 = vlog2.f32 %v4651_v29  ;;  %v9366_v11 = vmax.f32 %v4463_v36, %v9132_v12  ;;  %v4246_v21 = vsub.f32 %v9046_v57, %v4073_v44  ;;  %v9371_v49 = vadd.f32 %v9294_v42, %v9032_v16 }
 0xd77   : > { %v6038_v51 = vpop.eup %6037  ;;  %v4696_v1 = vadd.f32 %v4665_v55, %v9236_v28  ;;  %v4588_v6 = vadd.f32 %v6036_v19, %v6034_v20  ;;  %6055 = vpow2.f32 %v4564_v41  ;;  %v4279_v62 = vsub.f32 0.0, %v9363_v31  ;;  %v9662_v28 = vld [vmem:[#allocation15_spill] sm:$0xff] }
 0xd78   : > { %v6040_v46 = vpop.eup %6039  ;;  %v4667_v2 = vmul.f32 0.6931472, %v6038_v51  ;;  %6057 = vpow2.f32 %v4628_v58  ;;  %v4495_v37 = vsub.f32 %v9122_v53, %v9366_v11  ;;  %v4543_v61 = vsub.f32 %v4372_v48, %v9366_v11 }
 0xd79   : > { %v6042_v57 = vpop.eup %6041  ;;  %4712 = vst [vmem:[%s6528_s16] sm:$0xff] %v4696_v1  ;;  %v4652_v42 = vadd.f32 %v6040_v46, %v4588_v6  ;;  %v4607_v44 = vsub.f32 %v9132_v12, %v9366_v11  ;;  %6059 = vpow2.f32 %v4303_v0  ;;  %v4247_v30 = vsub.f32 %v9662_v28, %v4079_v38 }
 0xd7a   : > { %v6044_v8 = vpop.eup %6043  ;;  %v4697_v40 = vadd.f32 %v4667_v2, %v9248_v34  ;;  %v4518_v3 = vmul.f32 1.442695, %v4495_v37  ;;  %v4566_v17 = vmul.f32 1.442695, %v4543_v61  ;;  %v4083_v53 = vadd.f32 %v9292_v5, %v9029_v63 }
 0xd7b   : > { %v6046_v25 = vpop.eup %6045  ;;  %6061 = vlog2.f32 %v4652_v42  ;;  %v4589_v48 = vadd.f32 %v6044_v8, %v6042_v57  ;;  %v4630_v41 = vmul.f32 1.442695, %v4607_v44  ;;  %v4280_v35 = vsub.f32 0.0, %v9371_v49  ;;  %v9664_v57 = vld [vmem:[#allocation17_spill] sm:$0xff] }
 0xd7c   : > { %v6048_v29 = vpop.eup %6047  ;;  %4713 = vst [vmem:[%s6528_s16 + $0x8] sm:$0xff] %v4697_v40  ;;  %6063 = vpow2.f32 %v4518_v3  ;;  %v4305_v12 = vmul.f32 1.442695, %v4279_v62  ;;  %v4089_v58 = vadd.f32 %v9309_v43, %v9029_v63  ;;  %v9391_v34 = vadd.f32 %v9314_v47, %v9032_v16  ;;  %v9663_v62 = vld [vmem:[#allocation16_spill] sm:$0xff] }
 0xd7d   : > { %v6050_v36 = vpop.eup %6049  ;;  %v4653_v38 = vadd.f32 %v6046_v25, %v4589_v48  ;;  %6065 = vpow2.f32 %v4566_v17  ;;  %v4325_v5 = vmul.f32 %v6048_v29, %v4261_v39  ;;  %v4307_v20 = vmul.f32 1.442695, %v4280_v35 }
 0xd7e   : > { %v4669_v55 = vmul.f32 0.6931472, %v6050_v36  ;;  %6067 = vpow2.f32 %v4630_v41  ;;  %v4262_v0 = vmul.f32 %v4246_v21, %v4246_v21  ;;  %v4281_v19 = vsub.f32 0.0, %v9391_v34  ;;  %v9666_v36 = vld [vmem:[#allocation18_spill] sm:$0xff] }
 0xd7f   : > { %v6052_v51 = vpop.eup %6051  ;;  %6069 = vlog2.f32 %v4653_v38  ;;  %v4341_v1 = vadd.f32 %v4325_v5, %v9284_v50  ;;  %v9395_v43 = vmul.f32 %v4247_v30, %v4247_v30  ;;  %v9399_v47 = vadd.f32 %v9323_v9, %v9032_v16 }
 0xd80   : > { %v6054_v6 = vpop.eup %6053  ;;  %v4698_v39 = vadd.f32 %v4669_v55, %v9266_v54  ;;  %6071 = vpow2.f32 %v4305_v12  ;;  %v4248_v46 = vsub.f32 %v9663_v62, %v4083_v53  ;;  %v4309_v21 = vmul.f32 1.442695, %v4281_v19 }
 0xd81   : > { %v6056_v2 = vpop.eup %6055  ;;  %v4671_v37 = vmul.f32 0.6931472, %v6054_v6  ;;  %v4357_v61 = vmul.f32 -0.5, %v4341_v1  ;;  %6073 = vpow2.f32 %v4307_v20  ;;  %v4249_v42 = vsub.f32 %v9664_v57, %v4089_v58  ;;  %v9667_v20 = vld [vmem:[#allocation20_spill] sm:$0xff] }
 0xd82   : > { %v6058_v50 = vpop.eup %6057  ;;  %4714 = vst [vmem:[%s6528_s16 + $0x10] sm:$0xff] %v4698_v39  ;;  %v4590_v44 = vadd.f32 %v6056_v2, %v6052_v51  ;;  %6075 = vpow2.f32 %v4309_v21  ;;  %v4093_v9 = vadd.f32 %v9321_v15, %v9029_v63  ;;  %v4282_v54 = vsub.f32 0.0, %v9399_v47  ;;  %v9665_v15 = vld [vmem:[#allocation19_spill] sm:$0xff] }
 0xd83   : > { %v6060_v28 = vpop.eup %6059  ;;  %v4699_v30 = vadd.f32 %v4671_v37, %v9279_v33  ;;  %v4373_v8 = vadd.f32 -1.2066206, %v4357_v61  ;;  %v4099_v40 = vadd.f32 %v9338_v26, %v9029_v63  ;;  %v9413_v3 = vadd.f32 %v9343_v7, %v9032_v16 }
 0xd84   : > { %v4654_v17 = vadd.f32 %v6058_v50, %v4590_v44  ;;  %v4326_v53 = vmul.f32 %v6060_v28, %v4262_v0  ;;  %v4264_v25 = vmul.f32 %v4248_v46, %v4248_v46  ;;  %v4311_v48 = vmul.f32 1.442695, %v4282_v54  ;;  %v9668_v0 = vld [vmem:[#allocation22_spill] sm:$0xff] }
 0xd85   : > { %v6062_v41 = vpop.eup %6061  ;;  %4715 = vst [vmem:[%s6528_s16 + $0x18] sm:$0xff] %v4699_v30  ;;  %v4464_v35 = vmax.f32 %v9665_v15, %v4373_v8  ;;  %v4265_v29 = vmul.f32 %v4249_v42, %v4249_v42  ;;  %v4283_v12 = vsub.f32 0.0, %v9413_v3  ;;  %v9420_v33 = vadd.f32 %v9356_v24, %v9032_v16 }
 0xd86   : > { %v6064_v26 = vpop.eup %6063  ;;  %v4673_v58 = vmul.f32 0.6931472, %v6062_v41  ;;  %6077 = vlog2.f32 %v4654_v17  ;;  %v4342_v7 = vadd.f32 %v4326_v53, %v9333_v22  ;;  %v4250_v38 = vsub.f32 %v9666_v36, %v4093_v9 }
 0xd87   : > { %v6066_v5 = vpop.eup %6065  ;;  %v9425_v55 = vmax.f32 %v4464_v35, %v9667_v20  ;;  %6079 = vpow2.f32 %v4311_v48  ;;  %v4251_v19 = vsub.f32 %v9668_v0, %v4099_v40  ;;  %v4313_v51 = vmul.f32 1.442695, %v4283_v12 }
 0xd88   : > { %v6068_v1 = vpop.eup %6067  ;;  %v4700_v16 = vadd.f32 %v4673_v58, %v9297_v13  ;;  %v4591_v24 = vadd.f32 %v6066_v5, %v6064_v26  ;;  %v4358_v6 = vmul.f32 -0.5, %v4342_v7  ;;  %v4284_v39 = vsub.f32 0.0, %v9420_v33 }
 0xd89   : > { %v6070_v62 = vpop.eup %6069  ;;  %v4496_v22 = vsub.f32 %v9665_v15, %v9425_v55  ;;  %v4544_v46 = vsub.f32 %v4373_v8, %v9425_v55  ;;  %v4608_v21 = vsub.f32 %v9667_v20, %v9425_v55  ;;  %6081 = vpow2.f32 %v4313_v51  ;;  %v9669_v8 = vld [vmem:[#allocation21_spill] sm:$0xff]  ;;  %v9670_v15 = vld [vmem:[#allocation23_spill] sm:$0xff] }
 0xd8a   : > { %v6072_v2 = vpop.eup %6071  ;;  %4716 = vst [vmem:[%s6528_s16 + $0x20] sm:$0xff] %v4700_v16  ;;  %v4675_v37 = vmul.f32 0.6931472, %v6070_v62  ;;  %v4655_v61 = vadd.f32 %v6068_v1, %v4591_v24  ;;  %v4374_v57 = vadd.f32 -1.2066206, %v4358_v6  ;;  %v4266_v13 = vmul.f32 %v4250_v38, %v4250_v38  ;;  %v9671_v1 = vld [vmem:[#allocation24_spill] sm:$0xff] }
 0xd8b   : > { %v6074_v42 = vpop.eup %6073  ;;  %v4520_v50 = vmul.f32 1.442695, %v4496_v22  ;;  %v4568_v44 = vmul.f32 1.442695, %v4544_v46  ;;  %v4632_v9 = vmul.f32 1.442695, %v4608_v21  ;;  %v4327_v54 = vmul.f32 %v6072_v2, %v9395_v43 }
 0xd8c   : > { %v6076_v28 = vpop.eup %6075  ;;  %v4701_v30 = vadd.f32 %v4675_v37, %v9312_v23  ;;  %6083 = vlog2.f32 %v4655_v61  ;;  %v4465_v40 = vmax.f32 %v9669_v8, %v4374_v57  ;;  %v4328_v17 = vmul.f32 %v6074_v42, %v4264_v25 }
 0xd8d   : > { %6085 = vpow2.f32 %v4520_v50  ;;  %v4343_v53 = vadd.f32 %v4327_v54, %v9363_v31  ;;  %v4329_v48 = vmul.f32 %v6076_v28, %v4265_v29  ;;  %v4315_v41 = vmul.f32 1.442695, %v4284_v39  ;;  %v9672_v54 = vld [vmem:[#allocation25_spill] sm:$0xff] }
 0xd8e   : > { %4717 = vst [vmem:[%s6528_s16 + $0x28] sm:$0xff] %v4701_v30  ;;  %6087 = vpow2.f32 %v4568_v44  ;;  %v9442_v35 = vmax.f32 %v4465_v40, %v9670_v15  ;;  %v4344_v12 = vadd.f32 %v4328_v17, %v9371_v49  ;;  %v4267_v43 = vmul.f32 %v4251_v19, %v4251_v19 }
 0xd8f   : > { %6089 = vpow2.f32 %v4632_v9  ;;  %v4359_v26 = vmul.f32 -0.5, %v4343_v53  ;;  %v4345_v23 = vadd.f32 %v4329_v48, %v9391_v34  ;;  %v4103_v25 = vadd.f32 %v9352_v52, %v9029_v63 }
 0xd90   : > { %v6078_v58 = vpop.eup %6077  ;;  %v4497_v31 = vsub.f32 %v9669_v8, %v9442_v35  ;;  %v4545_v29 = vsub.f32 %v4374_v57, %v9442_v35  ;;  %v4609_v7 = vsub.f32 %v9670_v15, %v9442_v35  ;;  %v4360_v36 = vmul.f32 -0.5, %v4344_v12 }
 0xd91   : > { %v6080_v38 = vpop.eup %6079  ;;  %v4677_v49 = vmul.f32 0.6931472, %v6078_v58  ;;  %v4375_v5 = vadd.f32 -1.2066206, %v4359_v26  ;;  %v4361_v20 = vmul.f32 -0.5, %v4345_v23  ;;  %6091 = vpow2.f32 %v4315_v41 }
 0xd92   : > { %v4522_v34 = vmul.f32 1.442695, %v4497_v31  ;;  %v4570_v0 = vmul.f32 1.442695, %v4545_v29  ;;  %v4634_v19 = vmul.f32 1.442695, %v4609_v7  ;;  %v4330_v63 = vmul.f32 %v6080_v38, %v4266_v13 }
 0xd93   : > { %v6082_v52 = vpop.eup %6081  ;;  %v4702_v51 = vadd.f32 %v4677_v49, %v9336_v27  ;;  %v4466_v16 = vmax.f32 %v9671_v1, %v4375_v5  ;;  %v4376_v24 = vadd.f32 -1.2066206, %v4360_v36  ;;  %v4377_v6 = vadd.f32 -1.2066206, %v4361_v20  ;;  %v9673_v7 = vld [vmem:[#allocation26_spill] sm:$0xff] }
 0xd94   : > { %6093 = vpow2.f32 %v4522_v34  ;;  %v4346_v39 = vadd.f32 %v4330_v63, %v9399_v47  ;;  %v9457_v62 = vadd.f32 -2.8160586, %v9220_v60  ;;  %v4331_v22 = vmul.f32 %v6082_v52, %v4267_v43  ;;  %v9674_v63 = vld [vmem:[#allocation27_spill] sm:$0xff] }
 0xd95   : > { %4718 = vst [vmem:[%s6528_s16 + $0x30] sm:$0xff] %v4702_v51  ;;  %6095 = vpow2.f32 %v4570_v0  ;;  %v9461_v46 = vmax.f32 %v4466_v16, %v9179_v59  ;;  %v4467_v21 = vmax.f32 %v9181_v32, %v4376_v24  ;;  %v4468_v27 = vmax.f32 %v9185_v45, %v4377_v6 }
 0xd96   : > { %v6084_v2 = vpop.eup %6083  ;;  %6097 = vpow2.f32 %v4634_v19  ;;  %v4362_v37 = vmul.f32 -0.5, %v4346_v39  ;;  %v4347_v61 = vadd.f32 %v4331_v22, %v9413_v3  ;;  %v4252_v47 = vsub.f32 %v9173_v14, %v4103_v25 }
 0xd97   : > { %v6086_v57 = vpop.eup %6085  ;;  %v4679_v60 = vmul.f32 0.6931472, %v6084_v2  ;;  %v4498_v13 = vsub.f32 %v9671_v1, %v9461_v46  ;;  %v4546_v42 = vsub.f32 %v4375_v5, %v9461_v46  ;;  %v4610_v50 = vsub.f32 %v9179_v59, %v9461_v46 }
 0xd98   : > { %v6088_v44 = vpop.eup %6087  ;;  %v9473_v9 = vmax.f32 %v4467_v21, %v9183_v18  ;;  %v9476_v28 = vmax.f32 %v4468_v27, %v9672_v54  ;;  %v4378_v3 = vadd.f32 -1.2066206, %v4362_v37  ;;  %v4363_v14 = vmul.f32 -0.5, %v4347_v61 }
 0xd99   : > { %v6090_v30 = vpop.eup %6089  ;;  %v4703_v8 = vadd.f32 %v4679_v60, %v9366_v11  ;;  %v4592_v40 = vadd.f32 %v6088_v44, %v6086_v57  ;;  %v4524_v17 = vmul.f32 1.442695, %v4498_v13  ;;  %v4572_v53 = vmul.f32 1.442695, %v4546_v42 }
 0xd9a   : > { %v4636_v48 = vmul.f32 1.442695, %v4610_v50  ;;  %v4499_v59 = vsub.f32 %v9181_v32, %v9473_v9  ;;  %v4547_v41 = vsub.f32 %v4376_v24, %v9473_v9  ;;  %v4611_v15 = vsub.f32 %v9183_v18, %v9473_v9 }
 0xd9b   : > { %v6092_v12 = vpop.eup %6091  ;;  %4719 = vst [vmem:[%s6528_s16 + $0x38] sm:$0xff] %v4703_v8  ;;  %v4656_v43 = vadd.f32 %v6090_v30, %v4592_v40  ;;  %6099 = vpow2.f32 %v4524_v17  ;;  %v4500_v26 = vsub.f32 %v9185_v45, %v9476_v28  ;;  %v4548_v11 = vsub.f32 %v4377_v6, %v9476_v28 }
 0xd9c   : > { %6101 = vpow2.f32 %v4572_v53  ;;  %v4526_v23 = vmul.f32 1.442695, %v4499_v59  ;;  %v4574_v25 = vmul.f32 1.442695, %v4547_v41  ;;  %v4268_v58 = vmul.f32 %v4252_v47, %v4252_v47 }
 0xd9d   : > { %6103 = vlog2.f32 %v4656_v43  ;;  %v4638_v32 = vmul.f32 1.442695, %v4611_v15  ;;  %v4528_v31 = vmul.f32 1.442695, %v4500_v26  ;;  %v4612_v29 = vsub.f32 %v9672_v54, %v9476_v28 }
 0xd9e   : > { %v6094_v18 = vpop.eup %6093  ;;  %6105 = vpow2.f32 %v4636_v48  ;;  %v4469_v36 = vmax.f32 %v9673_v7, %v4378_v3  ;;  %v4379_v38 = vadd.f32 -1.2066206, %v4363_v14  ;;  %v4332_v49 = vmul.f32 %v6092_v12, %v4268_v58 }
 0xd9f   : > { %v6096_v5 = vpop.eup %6095  ;;  %6107 = vpow2.f32 %v4526_v23  ;;  %v4576_v45 = vmul.f32 1.442695, %v4548_v11  ;;  %v4454_v20 = vadd.f32 -3.2215235, %v9326_v56  ;;  %v4220_v34 = vmul.f32 -0.5, %v9233_v10 }
 0xda0   : > { %v6098_v0 = vpop.eup %6097  ;;  %v4593_v19 = vadd.f32 %v6096_v5, %v6094_v18  ;;  %6109 = vpow2.f32 %v4574_v25  ;;  %v9494_v52 = vmax.f32 %v4469_v36, %v9674_v63  ;;  %v4470_v51 = vmax.f32 %v9457_v62, %v4379_v38 }
 0xda1   : > { %6111 = vpow2.f32 %v4638_v32  ;;  %v4640_v1 = vmul.f32 1.442695, %v4612_v29  ;;  %v4439_v16 = vmul.f32 -0.5, %v9347_v4  ;;  %v4348_v24 = vadd.f32 %v4332_v49, %v9420_v33 }
 0xda2   : > { %v4657_v6 = vadd.f32 %v6098_v0, %v4593_v19  ;;  %6113 = vpow2.f32 %v4528_v31  ;;  %v4501_v56 = vsub.f32 %v9673_v7, %v9494_v52  ;;  %v4549_v10 = vsub.f32 %v4378_v3, %v9494_v52 }
 0xda3   : > { %6115 = vpow2.f32 %v4576_v45  ;;  %v4613_v39 = vsub.f32 %v9674_v63, %v9494_v52  ;;  %v9504_v22 = vmax.f32 %v4470_v51, %v4454_v20  ;;  %v4364_v21 = vmul.f32 -0.5, %v4348_v24 }
 0xda4   : > { %6117 = vlog2.f32 %v4657_v6  ;;  %v4530_v27 = vmul.f32 1.442695, %v4501_v56  ;;  %v4578_v2 = vmul.f32 1.442695, %v4549_v10  ;;  %v4236_v4 = vadd.f32 -2.8160586, %v4220_v34 }
 0xda5   : > { %v6100_v37 = vpop.eup %6099  ;;  %6119 = vpow2.f32 %v4640_v1  ;;  %v4642_v33 = vmul.f32 1.442695, %v4613_v39  ;;  %v4502_v61 = vsub.f32 %v9457_v62, %v9504_v22  ;;  %v4550_v47 = vsub.f32 %v4379_v38, %v9504_v22 }
 0xda6   : > { %v6102_v57 = vpop.eup %6101  ;;  %6121 = vpow2.f32 %v4530_v27  ;;  %v4614_v60 = vsub.f32 %v4454_v20, %v9504_v22  ;;  %v4380_v13 = vadd.f32 -1.2066206, %v4364_v21  ;;  %v4455_v42 = vadd.f32 -3.2215235, %v4439_v16 }
 0xda7   : > { %v6104_v50 = vpop.eup %6103  ;;  %v4594_v44 = vadd.f32 %v6102_v57, %v6100_v37  ;;  %6123 = vpow2.f32 %v4578_v2  ;;  %v4532_v54 = vmul.f32 1.442695, %v4502_v61  ;;  %v4580_v3 = vmul.f32 1.442695, %v4550_v47 }
 0xda8   : > { %v6106_v14 = vpop.eup %6105  ;;  %v4681_v30 = vmul.f32 0.6931472, %v6104_v50  ;;  %6125 = vpow2.f32 %v4642_v33  ;;  %v4644_v8 = vmul.f32 1.442695, %v4614_v60  ;;  %v4471_v40 = vmax.f32 %v4236_v4, %v4380_v13 }
 0xda9   : > { %v6108_v62 = vpop.eup %6107  ;;  %v4658_v17 = vadd.f32 %v6106_v14, %v4594_v44  ;;  %6127 = vpow2.f32 %v4532_v54 }
 0xdaa   : > { %v6110_v53 = vpop.eup %6109  ;;  %v4704_v48 = vadd.f32 %v4681_v30, %v9425_v55  ;;  %6129 = vpow2.f32 %v4580_v3  ;;  %v9511_v59 = vmax.f32 %v4471_v40, %v4455_v42 }
 0xdab   : > { %v6112_v41 = vpop.eup %6111  ;;  %6131 = vlog2.f32 %v4658_v17  ;;  %v4595_v15 = vadd.f32 %v6110_v53, %v6108_v62 }
 0xdac   : > { %v6114_v12 = vpop.eup %6113  ;;  %4720 = vst [vmem:[%s6528_s16 + $0x40] sm:$0xff] %v4704_v48  ;;  %6133 = vpow2.f32 %v4644_v8  ;;  %v4503_v43 = vsub.f32 %v4236_v4, %v9511_v59  ;;  %v4551_v26 = vsub.f32 %v4380_v13, %v9511_v59  ;;  %v4615_v11 = vsub.f32 %v4455_v42, %v9511_v59 }
 0xdad   : > { %v6116_v23 = vpop.eup %6115  ;;  %v4659_v25 = vadd.f32 %v6112_v41, %v4595_v15 }
 0xdae   : > { %v6118_v58 = vpop.eup %6117  ;;  %v4596_v32 = vadd.f32 %v6116_v23, %v6114_v12  ;;  %v4534_v55 = vmul.f32 1.442695, %v4503_v43  ;;  %v4582_v31 = vmul.f32 1.442695, %v4551_v26  ;;  %v4646_v7 = vmul.f32 1.442695, %v4615_v11 }
 0xdaf   : > { %v6120_v29 = vpop.eup %6119  ;;  %v4683_v18 = vmul.f32 0.6931472, %v6118_v58  ;;  %6135 = vlog2.f32 %v4659_v25 }
 0xdb0   : > { %v6122_v36 = vpop.eup %6121  ;;  %v4660_v38 = vadd.f32 %v6120_v29, %v4596_v32  ;;  %6137 = vpow2.f32 %v4534_v55 }
 0xdb1   : > { %v6124_v49 = vpop.eup %6123  ;;  %v4705_v5 = vadd.f32 %v4683_v18, %v9442_v35  ;;  %6139 = vpow2.f32 %v4582_v31 }
 0xdb2   : > { %v6126_v45 = vpop.eup %6125  ;;  %6141 = vlog2.f32 %v4660_v38  ;;  %v4597_v20 = vadd.f32 %v6124_v49, %v6122_v36 }
 0xdb3   : > { %v6128_v34 = vpop.eup %6127  ;;  %4721 = vst [vmem:[%s6528_s16 + $0x48] sm:$0xff] %v4705_v5  ;;  %6143 = vpow2.f32 %v4646_v7 }
 0xdb4   : > { %v6130_v0 = vpop.eup %6129  ;;  %v4661_v19 = vadd.f32 %v6126_v45, %v4597_v20 }
 0xdb5   : > { %v6132_v63 = vpop.eup %6131  ;;  %v4598_v51 = vadd.f32 %v6130_v0, %v6128_v34 }
 0xdb6   : > { %v6134_v1 = vpop.eup %6133  ;;  %v4685_v16 = vmul.f32 0.6931472, %v6132_v63  ;;  %6145 = vlog2.f32 %v4661_v19 }
 0xdb7   : > { %v4662_v24 = vadd.f32 %v6134_v1, %v4598_v51 }
 0xdb8   : > { %v4706_v6 = vadd.f32 %v4685_v16, %v9461_v46 }
 0xdb9   : > { %v6136_v35 = vpop.eup %6135  ;;  %6147 = vlog2.f32 %v4662_v24 }
 0xdba   : > { %v6138_v56 = vpop.eup %6137  ;;  %4722 = vst [vmem:[%s6528_s16 + $0x50] sm:$0xff] %v4706_v6  ;;  %v4687_v10 = vmul.f32 0.6931472, %v6136_v35 }
 0xdbb   : > { %v6140_v39 = vpop.eup %6139 }
 0xdbc   : > { %v6142_v21 = vpop.eup %6141  ;;  %v4707_v27 = vadd.f32 %v4687_v10, %v9473_v9  ;;  %v4599_v2 = vadd.f32 %v6140_v39, %v6138_v56 }
 0xdbd   : > { %v6144_v4 = vpop.eup %6143  ;;  %v4689_v37 = vmul.f32 0.6931472, %v6142_v21 }
 0xdbe   : > { %4723 = vst [vmem:[%s6528_s16 + $0x58] sm:$0xff] %v4707_v27  ;;  %v4663_v33 = vadd.f32 %v6144_v4, %v4599_v2 }
 0xdbf   : > { %v4708_v46 = vadd.f32 %v4689_v37, %v9476_v28 }
 0xdc0   : > { %v6146_v61 = vpop.eup %6145  ;;  %6149 = vlog2.f32 %v4663_v33 }
 0xdc1   : > { %4724 = vst [vmem:[%s6528_s16 + $0x60] sm:$0xff] %v4708_v46  ;;  %v4691_v47 = vmul.f32 0.6931472, %v6146_v61 }
 0xdc3   : > { %v6148_v57 = vpop.eup %6147  ;;  %v4709_v60 = vadd.f32 %v4691_v47, %v9494_v52 }
 0xdc4   : > { %v4693_v13 = vmul.f32 0.6931472, %v6148_v57 }
 0xdc5   : > { %4725 = vst [vmem:[%s6528_s16 + $0x68] sm:$0xff] %v4709_v60 }
 0xdc6   : > { %v4710_v9 = vadd.f32 %v4693_v13, %v9504_v22 }
 0xdc8   : > { %4726 = vst [vmem:[%s6528_s16 + $0x70] sm:$0xff] %v4710_v9 }
 0xdca   : > { %v6150_v42 = vpop.eup %6149 }
 0xdcb   : > { %v4695_v50 = vmul.f32 0.6931472, %v6150_v42 }
 0xdcd   : > { %v4711_v44 = vadd.f32 %v4695_v50, %v9511_v59 }
 0xdcf   : > { %4727 = vst [vmem:[%s6528_s16 + $0x78] sm:$0xff] %v4711_v44 }
 0xdd0 PF: > { %s9675_s22 = sld [smem:[#allocation13_spill]]  ;;  %s5069_s19 = sshll.u32 %s6291_s12, 11 }
 0xdd1   : > { %s9676_s30 = sld [smem:[#allocation30_spill]]  ;;  %s4742_s26 = sshll.u32 %s6528_s16, 4  ;;  %s9538_s26 = int_to_ptr.vmem [resolvable:$true] %s4742_s26 }
 0xdd2   : > { %s9542_s11 = scalar_lea.sflag [#allocation6], %s370_s7  ;;  %s6181_s23 = scalar_lea.vmem %s9538_s26, 2048 }
 0xdd3   : > { %p6182_p0 = scmp.ne.s32.totalorder %s9538_s26, %s6181_s23  ;;  %s6311_s12 = smov [#allocation7]  }
 0xdd4   : > { %s6185_s10 = sshll.u32 %s6311_s12, 4  ;;  %s6186_s10 = int_to_ptr.vmem [resolvable:$false] %s6185_s10 }
 0xdd5   : > { %s6187_s20 = scalar_lea.vmem %s6186_s10, 4096  ;;  %p6188_p10 = scmp.lt.s32.totalorder %s9538_s26, %s6186_s10 }
 0xdd6   : > { %p9678_p1 = scmp.ne.s32.totalorder %s9675_s22, 0  ;;  %p6189_p11 = scmp.lt.s32.totalorder %s6187_s20, %s6181_s23 }
 0xdd7   : > { %s9677_s21 = smov %s9676_s30  ;;  %s9535_s25 = scalar_lea.hbm %s9676_s30, %s5069_s19 }
 0xdd8   : > { %p6183_p6 = pnand %p6182_p0, %p9678_p1  ;;  %p6190_p13 = por %p6189_p11, %p6188_p10 }
 0xdda   : > { %p6184_p8 = pneg %p6183_p6 }
 0xddc   : > { %p6191_p5 = pnand %p6190_p13, %p6184_p8 }
 0xdde   : > { %6194 = shalt.err (!%p6191_p5)
}
 0xddf   : > { %s6195_s7 = scalar_lea.hbm %s9535_s25, 2048  ;;  %s6199_s17 = scalar_lea.hbm %s9677_s21, 4096 }
 0xde0   : > { %p6196_p3 = scmp.ne.s32.totalorder %s9535_s25, %s6195_s7  ;;  %p6200_p2 = scmp.lt.u32.totalorder %s9535_s25, %s9677_s21 }
 0xde1   : > { %p6201_p7 = scmp.lt.u32.totalorder %s6199_s17, %s6195_s7  ;;  %p6203_p0 = scmp.lt.u32.totalorder %s6195_s7, %s9535_s25 }
 0xde2   : > { %p6197_p9 = pnand %p6196_p3, %p9678_p1 }
 0xde3   : > { %p6202_p4 = por %p6201_p7, %p6200_p2 }
 0xde4   : > { %p6198_p12 = pneg %p6197_p9 }
 0xde5   : > { %p6204_p6 = por %p6203_p0, %p6202_p4 }
 0xde7   : > { %p6205_p8 = pnand %p6204_p6, %p6198_p12 }
 0xde9   : > { %6208 = shalt.err (!%p6205_p8)
}
 0xdea   : > { %s6312_s23 = smov 128   ;;  %s6313_s12 = smov 8  }
 0xdeb   : > { %5320 = dma.vmem_to_hbm [thread:$0]  (%p9678_p1), %s9538_s26, 2048, %s9535_s25, %s9542_s11, %s6312_s23, %s6312_s23, %s6313_s12  }
 0xdec PF: > { %p5331_p10 = scmp.ge.s32.totalorder %s6303_s15, 2  ;;  %s4757_s10 = sand.u32 1, %s6263_s27  }
 0xded   : > { %p9679_p11 = scmp.ne.s32.totalorder %s9644_s6, 0  ;;  %s4758_s20 = scalar_lea.sflag [#allocation6], %s4757_s10 }
 0xdef   : > { %p5327_p13 = pnand %p5331_p10, %p9679_p11 }
 0xdf1   : > { %6258 = dma.done.wait (!%p5327_p13), %s4758_s20, 2048  }
 0xdf2   : > { %6260 = vsyncadd (!%p5327_p13), %s4758_s20, 4294965248  ;;  %s24_s15 = sadd.s32 1, %s6303_s15   ;;  %s9680_s22 = sld [smem:[#allocation10_spill]] }
 0xdf3   : > { %p21_p5 = scmp.ge.s32.totalorder %s24_s15, 6   ;;  %s9681_s10 = sld [smem:[#allocation14_spill]] }
 0xdf4   : > { %s9682_s25 = sld [smem:[#allocation11_spill]]  ;;  %s9683_s26 = sld [smem:[#allocation12_spill]] }
 0xdf5   : > { %s9684_s27 = smov %s6267_s28  ;;  %s9685_s28 = smov %s6271_s29 }
 0xdf6   : > { %s9686_s29 = smov %s6446_s18  ;;  %s9687_s30 = smov %s6279_s9 }
 0xdf7   : > { %s9689_s11 = smov %s6295_s13  ;;  %s9690_s12 = smov %s6299_s14 }
 0xdf8   : > { %s9688_s9 = smov %s9680_s22  ;;  %23 = sbr.rel (!%p21_p5) target bundleno = 13 (0xd), region = 114 }
 0xdfa   : > { %s9691_s13 = smov %s9682_s25  ;;  %s9692_s14 = smov %s9683_s26 }
 0xdff   :  { %4763 = vsyncpa [#allocation5], 1 }
 0xe00   :  { %4765 = vsyncpa [#allocation5 + $0x1], 1 }
 0xe01   :  { %4766 = vsyncpa [#allocation6], 1 }
 0xe02   :  { %4768 = vsyncpa [#allocation6 + $0x1], 1 }

</bundles_post_ra>
